<compile_context>
chip_gen: v6e
topology: v6e:2x2x1
jax: 0.10.0
libtpu: 0.0.40
codegen_flags: <defaults>
</compile_context>

<pallas_src>
import functools
import math

import jax
import jax.numpy as jnp
from jax.experimental import pallas as pl
from jax.experimental.pallas import tpu as pltpu


# ----------------------------------------------------------------------------
# Fused whole-model kernel: one grid step == one batch element.
# ----------------------------------------------------------------------------
def _fused_forward_kernel(
    x_ref, pos_ref, w_emb_ref, b_emb_ref,
    w_in_ref, b_in_ref, w_out_ref, b_out_ref, ln1_g_ref, ln1_b_ref,
    w_ffn1_ref, b_ffn1_ref, w_ffn2_ref, b_ffn2_ref, ln2_g_ref, ln2_b_ref,
    w_h1_ref, b_h1_ref, w_h2_ref, b_h2_ref,
    o_ref, *, n_layer, n_head):
    f32 = jnp.float32

    def layernorm(h, g, b):
        mu = jnp.mean(h, axis=-1, keepdims=True)
        var = jnp.mean((h - mu) ** 2, axis=-1, keepdims=True)
        return (h - mu) * jax.lax.rsqrt(var + 1e-5) * g + b

    # --- patch embedding + positional encoding ---
    xp = x_ref[0]                                               # (N, 3*p*p)
    tok = jnp.dot(xp, w_emb_ref[...], preferred_element_type=f32)
    tok = tok + b_emb_ref[...] + pos_ref[0]                     # (N, D)
    N, D = tok.shape
    dh = D // n_head
    scale = 1.0 / math.sqrt(dh)
    nt_dims = (((1,), (1,)), ((), ()))                          # q @ k^T

    # --- transformer encoder layers (post-norm, relu FFN, no dropout) ---
    for l in range(n_layer):
        # multi-head self-attention via per-head static weight slices
        proj = jnp.zeros((N, D), f32)
        for h in range(n_head):
            s0, s1 = h * dh, (h + 1) * dh
            qh = (jnp.dot(tok, w_in_ref[l, :, s0:s1],
                          preferred_element_type=f32)
                  + b_in_ref[l, :, s0:s1])
            kh = (jnp.dot(tok, w_in_ref[l, :, D + s0:D + s1],
                          preferred_element_type=f32)
                  + b_in_ref[l, :, D + s0:D + s1])
            vh = (jnp.dot(tok, w_in_ref[l, :, 2 * D + s0:2 * D + s1],
                          preferred_element_type=f32)
                  + b_in_ref[l, :, 2 * D + s0:2 * D + s1])
            s = jax.lax.dot_general(qh, kh, nt_dims,
                                    preferred_element_type=f32) * scale
            m = jnp.max(s, axis=-1, keepdims=True)
            p = jnp.exp(s - m)
            denom = jnp.sum(p, axis=-1, keepdims=True)
            p = p * pl.reciprocal(denom, approx=True)           # EUP, not VPU
            oh = jnp.dot(p, vh, preferred_element_type=f32)     # (N, dh)
            # out-proj folded per head: concat_h(o_h) @ W == sum_h o_h @ W[h]
            proj = proj + jnp.dot(oh, w_out_ref[l, s0:s1, :],
                                  preferred_element_type=f32)
        att = proj + b_out_ref[l]
        tok = layernorm(att + tok, ln1_g_ref[l], ln1_b_ref[l])

        ff = jnp.dot(tok, w_ffn1_ref[l], preferred_element_type=f32)
        ff = jnp.maximum(ff + b_ffn1_ref[l], 0.0)
        ff = jnp.dot(ff, w_ffn2_ref[l], preferred_element_type=f32)
        ff = ff + b_ffn2_ref[l]
        tok = layernorm(ff + tok, ln2_g_ref[l], ln2_b_ref[l])

    # --- mean pooling over sequence + MLP head, fused in the same kernel ---
    pooled = jnp.mean(tok, axis=0, keepdims=True)               # (1, D)
    h1 = jnp.dot(pooled, w_h1_ref[...], preferred_element_type=f32)
    h1 = jnp.maximum(h1 + b_h1_ref[...], 0.0)
    logits = jnp.dot(h1, w_h2_ref[...], preferred_element_type=f32)
    logits = logits + b_h2_ref[...]                             # (1, C)
    o_ref[0] = logits


# ----------------------------------------------------------------------------
# Parameters (deterministic synthetic init; shapes match the module __init__)
# ----------------------------------------------------------------------------
def init_params(key, cfg):
    D, F, C = cfg["n_embd"], cfg["n_ffn"], cfg["n_classes"]
    p, N, L = cfg["patch_size"], cfg["num_patches"], cfg["n_layer"]
    patch_dim = 3 * p * p

    def nrm(k, shape, scale=0.02):
        return (scale * jax.random.normal(k, shape)).astype(jnp.float32)

    keys = jax.random.split(key, 4 + L)
    params = {
        "w_emb": nrm(keys[0], (patch_dim, D)),          # LinearSequencing
        "b_emb": jnp.zeros((D,), jnp.float32),
        "pos": nrm(keys[1], (1, N, D), scale=1.0),      # pos_embedding ~ randn
        "w_h1": nrm(keys[2], (D, D)),                   # mlp head
        "b_h1": jnp.zeros((D,), jnp.float32),
        "w_h2": nrm(keys[3], (D, C)),
        "b_h2": jnp.zeros((C,), jnp.float32),
        "layers": [],
    }
    for li in range(L):
        lk = jax.random.split(keys[4 + li], 4)
        params["layers"].append({
            "w_in": nrm(lk[0], (D, 3 * D)),   # MHA in_proj (stored as in,out)
            "b_in": jnp.zeros((3 * D,), jnp.float32),
            "w_out": nrm(lk[1], (D, D)),      # MHA out_proj
            "b_out": jnp.zeros((D,), jnp.float32),
            "ln1_g": jnp.ones((D,), jnp.float32),
            "ln1_b": jnp.zeros((D,), jnp.float32),
            "w_ffn1": nrm(lk[2], (D, F)),
            "b_ffn1": jnp.zeros((F,), jnp.float32),
            "w_ffn2": nrm(lk[3], (F, D)),
            "b_ffn2": jnp.zeros((D,), jnp.float32),
            "ln2_g": jnp.ones((D,), jnp.float32),
            "ln2_b": jnp.zeros((D,), jnp.float32),
        })
    return params


# ----------------------------------------------------------------------------
# Forward pass: patchify in XLA, everything else in one Pallas kernel.
# ----------------------------------------------------------------------------
def patchify(x, p):
    # NCHW -> (B, N, 3*p*p); patches row-major over (hp, wp), (c, ph, pw)
    B, C, H, W = x.shape
    xp = x.reshape(B, C, H // p, p, W // p, p)
    xp = xp.transpose(0, 2, 4, 1, 3, 5)
    return xp.reshape(B, (H // p) * (W // p), C * p * p)


def face_rwkv_forward(params, x, cfg):
    B = x.shape[0]
    D, Hn, C = cfg["n_embd"], cfg["n_head"], cfg["n_classes"]
    F, L, p = cfg["n_ffn"], cfg["n_layer"], cfg["patch_size"]

    xp = patchify(x, p)                                  # (B, N, 3*p*p)
    N, P = xp.shape[1], xp.shape[2]

    # stack per-layer params into (L, ...) arrays; biases/LN as (L, 1, dim)
    def stack(name):
        return jnp.stack([lay[name] for lay in params["layers"]], axis=0)

    w_in = stack("w_in")                                 # (L, D, 3D)
    b_in = stack("b_in").reshape(L, 1, 3 * D)
    w_out = stack("w_out")                               # (L, D, D)
    b_out = stack("b_out").reshape(L, 1, D)
    ln1_g = stack("ln1_g").reshape(L, 1, D)
    ln1_b = stack("ln1_b").reshape(L, 1, D)
    w_ffn1 = stack("w_ffn1")                             # (L, D, F)
    b_ffn1 = stack("b_ffn1").reshape(L, 1, F)
    w_ffn2 = stack("w_ffn2")                             # (L, F, D)
    b_ffn2 = stack("b_ffn2").reshape(L, 1, D)
    ln2_g = stack("ln2_g").reshape(L, 1, D)
    ln2_b = stack("ln2_b").reshape(L, 1, D)

    def rep2(shape):
        return pl.BlockSpec(shape, lambda b: (0, 0))

    def rep3(shape):
        return pl.BlockSpec(shape, lambda b: (0, 0, 0))

    in_specs = [
        pl.BlockSpec((1, N, P), lambda b: (b, 0, 0)),    # x (per batch elem)
        rep3((1, N, D)),                                 # pos
        rep2((P, D)), rep2((1, D)),                      # patch embedding
        rep3((L, D, 3 * D)), rep3((L, 1, 3 * D)),        # attn in-proj
        rep3((L, D, D)), rep3((L, 1, D)),                # attn out-proj
        rep3((L, 1, D)), rep3((L, 1, D)),                # ln1
        rep3((L, D, F)), rep3((L, 1, F)),                # ffn1
        rep3((L, F, D)), rep3((L, 1, D)),                # ffn2
        rep3((L, 1, D)), rep3((L, 1, D)),                # ln2
        rep2((D, D)), rep2((1, D)),                      # head linear 1
        rep2((D, C)), rep2((1, C)),                      # head linear 2
    ]

    out = pl.pallas_call(
        functools.partial(_fused_forward_kernel, n_layer=L, n_head=Hn),
        out_shape=jax.ShapeDtypeStruct((B, 1, C), jnp.float32),
        grid=(B,),
        in_specs=in_specs,
        out_specs=pl.BlockSpec((1, 1, C), lambda b: (b, 0, 0)),
        compiler_params=pltpu.CompilerParams(
            dimension_semantics=("parallel",)),
    )(xp, params["pos"], params["w_emb"], params["b_emb"].reshape(1, D),
      w_in, b_in, w_out, b_out, ln1_g, ln1_b,
      w_ffn1, b_ffn1, w_ffn2, b_ffn2, ln2_g, ln2_b,
      params["w_h1"], params["b_h1"].reshape(1, D),
      params["w_h2"], params["b_h2"].reshape(1, C))
    return out.reshape(B, C)


# ----------------------------------------------------------------------------
# Pure-JAX reference (same math) for a sanity check
# ----------------------------------------------------------------------------
def face_rwkv_reference(params, x, cfg):
    B = x.shape[0]
    D, Hn = cfg["n_embd"], cfg["n_head"]
    dh = D // Hn
    p = cfg["patch_size"]
    hp = jax.lax.Precision.HIGHEST

    def ln(h, g, b):
        mu = jnp.mean(h, axis=-1, keepdims=True)
        var = jnp.mean((h - mu) ** 2, axis=-1, keepdims=True)
        return (h - mu) * jax.lax.rsqrt(var + 1e-5) * g + b

    xp = patchify(x, p)
    N = xp.shape[1]
    tok = (jnp.dot(xp.reshape(B * N, -1), params["w_emb"], precision=hp)
           + params["b_emb"]).reshape(B, N, D) + params["pos"]
    for layer in params["layers"]:
        x2 = tok.reshape(B * N, D)
        qkv = (jnp.dot(x2, layer["w_in"], precision=hp)
               + layer["b_in"]).reshape(B, N, 3, Hn, dh)
        q = qkv[:, :, 0].transpose(0, 2, 1, 3)
        k = qkv[:, :, 1].transpose(0, 2, 1, 3)
        v = qkv[:, :, 2].transpose(0, 2, 1, 3)
        s = jnp.einsum("bhqd,bhkd->bhqk", q, k, precision=hp) / math.sqrt(dh)
        pmat = jax.nn.softmax(s, axis=-1)
        att = jnp.einsum("bhqk,bhkd->bhqd", pmat, v, precision=hp)
        att = att.transpose(0, 2, 1, 3).reshape(B * N, D)
        att = jnp.dot(att, layer["w_out"], precision=hp) + layer["b_out"]
        x2 = ln(att + x2, layer["ln1_g"], layer["ln1_b"])
        ff = jnp.maximum(jnp.dot(x2, layer["w_ffn1"], precision=hp)
                         + layer["b_ffn1"], 0.0)
        ff = jnp.dot(ff, layer["w_ffn2"], precision=hp) + layer["b_ffn2"]
        x2 = ln(ff + x2, layer["ln2_g"], layer["ln2_b"])
        tok = x2.reshape(B, N, D)
    pooled = jnp.mean(tok, axis=1)
    h = jnp.maximum(jnp.dot(pooled, params["w_h1"], precision=hp)
                    + params["b_h1"], 0.0)
    return jnp.dot(h, params["w_h2"], precision=hp) + params["b_h2"]


# ----------------------------------------------------------------------------
if __name__ == "__main__":
    cfg = dict(
        patch_size=4, n_embd=32, n_layer=2, n_classes=10, n_head=4, n_ffn=64,
        resolution=(16, 16), mean=True, pos_enc=True, mlp_head=True,
        block="transformer", resnet=False,
    )
    cfg["num_patches"] = (cfg["resolution"][0] * cfg["resolution"][1]
                          // cfg["patch_size"] ** 2)

    key = jax.random.PRNGKey(0)
    k_param, k_x = jax.random.split(key)
    params = init_params(k_param, cfg)
    x = jax.random.normal(k_x, (2, 3, 16, 16), dtype=jnp.float32)  # NCHW

    fwd = jax.jit(functools.partial(face_rwkv_forward, cfg=cfg))
    logits = jax.block_until_ready(fwd(params, x))
    assert logits.shape == (2, cfg["n_classes"])

    ref = jax.block_until_ready(face_rwkv_reference(params, x, cfg))
    max_diff = float(jnp.max(jnp.abs(logits - ref)))
    if max_diff > 0.1:
        raise RuntimeError(f"Pallas/JAX mismatch: max_diff={max_diff}")

    print("KERNEL_OK")
</pallas_src>

<mosaic_0001>
module attributes {stable_mosaic.version = 11 : i64} {
  func.func @_fused_forward_kernel(%arg0: i32, %arg1: memref<1x16x48xf32, #tpu.memory_space<vmem>>, %arg2: memref<1x16x32xf32, #tpu.memory_space<vmem>>, %arg3: memref<48x32xf32, #tpu.memory_space<vmem>>, %arg4: memref<1x32xf32, #tpu.memory_space<vmem>>, %arg5: memref<2x32x96xf32, #tpu.memory_space<vmem>>, %arg6: memref<2x1x96xf32, #tpu.memory_space<vmem>>, %arg7: memref<2x32x32xf32, #tpu.memory_space<vmem>>, %arg8: memref<2x1x32xf32, #tpu.memory_space<vmem>>, %arg9: memref<2x1x32xf32, #tpu.memory_space<vmem>>, %arg10: memref<2x1x32xf32, #tpu.memory_space<vmem>>, %arg11: memref<2x32x64xf32, #tpu.memory_space<vmem>>, %arg12: memref<2x1x64xf32, #tpu.memory_space<vmem>>, %arg13: memref<2x64x32xf32, #tpu.memory_space<vmem>>, %arg14: memref<2x1x32xf32, #tpu.memory_space<vmem>>, %arg15: memref<2x1x32xf32, #tpu.memory_space<vmem>>, %arg16: memref<2x1x32xf32, #tpu.memory_space<vmem>>, %arg17: memref<32x32xf32, #tpu.memory_space<vmem>>, %arg18: memref<1x32xf32, #tpu.memory_space<vmem>>, %arg19: memref<32x10xf32, #tpu.memory_space<vmem>>, %arg20: memref<1x10xf32, #tpu.memory_space<vmem>>, %arg21: memref<1x1x10xf32, #tpu.memory_space<vmem>>) attributes {dimension_semantics = [#tpu.dimension_semantics<parallel>], iteration_bounds = array<i64: 2>, scalar_prefetch = 0 : i64, scratch_operands = 0 : i64, tpu.core_type = #tpu.core_type<tc>, window_params = [{transform_indices = @transform_0, window_bounds = array<i64: 1, 16, 48>}, {pipeline_mode = #tpu.pipeline_mode<synchronous>, transform_indices = @transform_1, window_bounds = array<i64: 1, 16, 32>}, {pipeline_mode = #tpu.pipeline_mode<synchronous>, transform_indices = @transform_2, window_bounds = array<i64: 48, 32>}, {pipeline_mode = #tpu.pipeline_mode<synchronous>, transform_indices = @transform_3, window_bounds = array<i64: 1, 32>}, {pipeline_mode = #tpu.pipeline_mode<synchronous>, transform_indices = @transform_4, window_bounds = array<i64: 2, 32, 96>}, {pipeline_mode = #tpu.pipeline_mode<synchronous>, transform_indices = @transform_5, window_bounds = array<i64: 2, 1, 96>}, {pipeline_mode = #tpu.pipeline_mode<synchronous>, transform_indices = @transform_6, window_bounds = array<i64: 2, 32, 32>}, {pipeline_mode = #tpu.pipeline_mode<synchronous>, transform_indices = @transform_7, window_bounds = array<i64: 2, 1, 32>}, {pipeline_mode = #tpu.pipeline_mode<synchronous>, transform_indices = @transform_8, window_bounds = array<i64: 2, 1, 32>}, {pipeline_mode = #tpu.pipeline_mode<synchronous>, transform_indices = @transform_9, window_bounds = array<i64: 2, 1, 32>}, {pipeline_mode = #tpu.pipeline_mode<synchronous>, transform_indices = @transform_10, window_bounds = array<i64: 2, 32, 64>}, {pipeline_mode = #tpu.pipeline_mode<synchronous>, transform_indices = @transform_11, window_bounds = array<i64: 2, 1, 64>}, {pipeline_mode = #tpu.pipeline_mode<synchronous>, transform_indices = @transform_12, window_bounds = array<i64: 2, 64, 32>}, {pipeline_mode = #tpu.pipeline_mode<synchronous>, transform_indices = @transform_13, window_bounds = array<i64: 2, 1, 32>}, {pipeline_mode = #tpu.pipeline_mode<synchronous>, transform_indices = @transform_14, window_bounds = array<i64: 2, 1, 32>}, {pipeline_mode = #tpu.pipeline_mode<synchronous>, transform_indices = @transform_15, window_bounds = array<i64: 2, 1, 32>}, {pipeline_mode = #tpu.pipeline_mode<synchronous>, transform_indices = @transform_16, window_bounds = array<i64: 32, 32>}, {pipeline_mode = #tpu.pipeline_mode<synchronous>, transform_indices = @transform_17, window_bounds = array<i64: 1, 32>}, {pipeline_mode = #tpu.pipeline_mode<synchronous>, transform_indices = @transform_18, window_bounds = array<i64: 32, 10>}, {pipeline_mode = #tpu.pipeline_mode<synchronous>, transform_indices = @transform_19, window_bounds = array<i64: 1, 10>}, {transform_indices = @transform_20, window_bounds = array<i64: 1, 1, 10>}]} {
    %c0 = arith.constant 0 : index
    %c0_0 = arith.constant 0 : index
    %c0_1 = arith.constant 0 : index
    %0 = vector.load %arg1[%c0, %c0_0, %c0_1] : memref<1x16x48xf32, #tpu.memory_space<vmem>>, vector<1x16x48xf32>
    %1 = vector.shape_cast %0 : vector<1x16x48xf32> to vector<16x48xf32>
    %c0_2 = arith.constant 0 : index
    %c0_3 = arith.constant 0 : index
    %2 = vector.load %arg3[%c0_2, %c0_3] : memref<48x32xf32, #tpu.memory_space<vmem>>, vector<48x32xf32>
    %cst = arith.constant dense<0.000000e+00> : vector<16x32xf32>
    %3 = tpu.matmul %1, %2, %cst {dimension_numbers = #tpu.dot_dimension_numbers<[1], [0], [0], [1], [0, 0, 1, 1], [], []>} : vector<16x48xf32>, vector<48x32xf32>, vector<16x32xf32> -> vector<16x32xf32>
    %c0_4 = arith.constant 0 : index
    %c0_5 = arith.constant 0 : index
    %4 = vector.load %arg4[%c0_4, %c0_5] : memref<1x32xf32, #tpu.memory_space<vmem>>, vector<1x32xf32>
    %5 = vector.broadcast %4 : vector<1x32xf32> to vector<16x32xf32>
    %6 = arith.addf %3, %5 : vector<16x32xf32>
    %c0_6 = arith.constant 0 : index
    %c0_7 = arith.constant 0 : index
    %c0_8 = arith.constant 0 : index
    %7 = vector.load %arg2[%c0_6, %c0_7, %c0_8] : memref<1x16x32xf32, #tpu.memory_space<vmem>>, vector<1x16x32xf32>
    %8 = vector.shape_cast %7 : vector<1x16x32xf32> to vector<16x32xf32>
    %9 = arith.addf %6, %8 : vector<16x32xf32>
    %cst_9 = arith.constant 0.000000e+00 : f32
    %10 = vector.broadcast %cst_9 : f32 to vector<16x32xf32>
    %c0_10 = arith.constant 0 : index
    %c0_11 = arith.constant 0 : index
    %c0_12 = arith.constant 0 : index
    %11 = vector.load %arg5[%c0_10, %c0_11, %c0_12] : memref<2x32x96xf32, #tpu.memory_space<vmem>>, vector<1x32x8xf32>
    %12 = vector.shape_cast %11 : vector<1x32x8xf32> to vector<32x8xf32>
    %cst_13 = arith.constant dense<0.000000e+00> : vector<16x8xf32>
    %13 = tpu.matmul %9, %12, %cst_13 {dimension_numbers = #tpu.dot_dimension_numbers<[1], [0], [0], [1], [0, 0, 1, 1], [], []>} : vector<16x32xf32>, vector<32x8xf32>, vector<16x8xf32> -> vector<16x8xf32>
    %c0_14 = arith.constant 0 : index
    %c0_15 = arith.constant 0 : index
    %c0_16 = arith.constant 0 : index
    %14 = vector.load %arg6[%c0_14, %c0_15, %c0_16] : memref<2x1x96xf32, #tpu.memory_space<vmem>>, vector<1x1x8xf32>
    %15 = vector.shape_cast %14 : vector<1x1x8xf32> to vector<1x8xf32>
    %16 = vector.broadcast %15 : vector<1x8xf32> to vector<16x8xf32>
    %17 = arith.addf %13, %16 : vector<16x8xf32>
    %c0_17 = arith.constant 0 : index
    %c0_18 = arith.constant 0 : index
    %c32 = arith.constant 32 : index
    %18 = vector.load %arg5[%c0_17, %c0_18, %c32] : memref<2x32x96xf32, #tpu.memory_space<vmem>>, vector<1x32x8xf32>
    %19 = vector.shape_cast %18 : vector<1x32x8xf32> to vector<32x8xf32>
    %cst_19 = arith.constant dense<0.000000e+00> : vector<16x8xf32>
    %20 = tpu.matmul %9, %19, %cst_19 {dimension_numbers = #tpu.dot_dimension_numbers<[1], [0], [0], [1], [0, 0, 1, 1], [], []>} : vector<16x32xf32>, vector<32x8xf32>, vector<16x8xf32> -> vector<16x8xf32>
    %c0_20 = arith.constant 0 : index
    %c0_21 = arith.constant 0 : index
    %c32_22 = arith.constant 32 : index
    %21 = vector.load %arg6[%c0_20, %c0_21, %c32_22] : memref<2x1x96xf32, #tpu.memory_space<vmem>>, vector<1x1x8xf32>
    %22 = vector.shape_cast %21 : vector<1x1x8xf32> to vector<1x8xf32>
    %23 = vector.broadcast %22 : vector<1x8xf32> to vector<16x8xf32>
    %24 = arith.addf %20, %23 : vector<16x8xf32>
    %c0_23 = arith.constant 0 : index
    %c0_24 = arith.constant 0 : index
    %c64 = arith.constant 64 : index
    %25 = vector.load %arg5[%c0_23, %c0_24, %c64] : memref<2x32x96xf32, #tpu.memory_space<vmem>>, vector<1x32x8xf32>
    %26 = vector.shape_cast %25 : vector<1x32x8xf32> to vector<32x8xf32>
    %cst_25 = arith.constant dense<0.000000e+00> : vector<16x8xf32>
    %27 = tpu.matmul %9, %26, %cst_25 {dimension_numbers = #tpu.dot_dimension_numbers<[1], [0], [0], [1], [0, 0, 1, 1], [], []>} : vector<16x32xf32>, vector<32x8xf32>, vector<16x8xf32> -> vector<16x8xf32>
    %c0_26 = arith.constant 0 : index
    %c0_27 = arith.constant 0 : index
    %c64_28 = arith.constant 64 : index
    %28 = vector.load %arg6[%c0_26, %c0_27, %c64_28] : memref<2x1x96xf32, #tpu.memory_space<vmem>>, vector<1x1x8xf32>
    %29 = vector.shape_cast %28 : vector<1x1x8xf32> to vector<1x8xf32>
    %30 = vector.broadcast %29 : vector<1x8xf32> to vector<16x8xf32>
    %31 = arith.addf %27, %30 : vector<16x8xf32>
    %cst_29 = arith.constant dense<0.000000e+00> : vector<16x16xf32>
    %32 = tpu.matmul %17, %24, %cst_29 {dimension_numbers = #tpu.dot_dimension_numbers<[1], [1], [0], [0], [0, 0, 1, 0], [], []>} : vector<16x8xf32>, vector<16x8xf32>, vector<16x16xf32> -> vector<16x16xf32>
    %cst_30 = arith.constant 0.353553385 : f32
    %33 = vector.broadcast %cst_30 : f32 to vector<16x16xf32>
    %34 = arith.mulf %32, %33 : vector<16x16xf32>
    %cst_31 = arith.constant dense<0xFF800000> : vector<16xf32>
    %35 = vector.multi_reduction <maximumf>, %34, %cst_31 [1] : vector<16x16xf32> to vector<16xf32>
    %36 = vector.shape_cast %35 : vector<16xf32> to vector<16x1xf32>
    %37 = vector.broadcast %36 : vector<16x1xf32> to vector<16x16xf32>
    %38 = arith.subf %34, %37 : vector<16x16xf32>
    %39 = math.exp %38 : vector<16x16xf32>
    %cst_32 = arith.constant dense<0.000000e+00> : vector<16xf32>
    %40 = vector.multi_reduction <add>, %39, %cst_32 [1] : vector<16x16xf32> to vector<16xf32>
    %41 = vector.shape_cast %40 : vector<16xf32> to vector<16x1xf32>
    %42 = tpu.reciprocal %41 {approx = true} : vector<16x1xf32> -> vector<16x1xf32>
    %43 = vector.broadcast %42 : vector<16x1xf32> to vector<16x16xf32>
    %44 = arith.mulf %39, %43 : vector<16x16xf32>
    %cst_33 = arith.constant dense<0.000000e+00> : vector<16x8xf32>
    %45 = tpu.matmul %44, %31, %cst_33 {dimension_numbers = #tpu.dot_dimension_numbers<[1], [0], [0], [1], [0, 0, 1, 1], [], []>} : vector<16x16xf32>, vector<16x8xf32>, vector<16x8xf32> -> vector<16x8xf32>
    %c0_34 = arith.constant 0 : index
    %c0_35 = arith.constant 0 : index
    %c0_36 = arith.constant 0 : index
    %46 = vector.load %arg7[%c0_34, %c0_35, %c0_36] : memref<2x32x32xf32, #tpu.memory_space<vmem>>, vector<1x8x32xf32>
    %47 = vector.shape_cast %46 : vector<1x8x32xf32> to vector<8x32xf32>
    %cst_37 = arith.constant dense<0.000000e+00> : vector<16x32xf32>
    %48 = tpu.matmul %45, %47, %cst_37 {dimension_numbers = #tpu.dot_dimension_numbers<[1], [0], [0], [1], [0, 0, 1, 1], [], []>} : vector<16x8xf32>, vector<8x32xf32>, vector<16x32xf32> -> vector<16x32xf32>
    %49 = arith.addf %10, %48 : vector<16x32xf32>
    %c0_38 = arith.constant 0 : index
    %c0_39 = arith.constant 0 : index
    %c8 = arith.constant 8 : index
    %50 = vector.load %arg5[%c0_38, %c0_39, %c8] : memref<2x32x96xf32, #tpu.memory_space<vmem>>, vector<1x32x8xf32>
    %51 = vector.shape_cast %50 : vector<1x32x8xf32> to vector<32x8xf32>
    %cst_40 = arith.constant dense<0.000000e+00> : vector<16x8xf32>
    %52 = tpu.matmul %9, %51, %cst_40 {dimension_numbers = #tpu.dot_dimension_numbers<[1], [0], [0], [1], [0, 0, 1, 1], [], []>} : vector<16x32xf32>, vector<32x8xf32>, vector<16x8xf32> -> vector<16x8xf32>
    %c0_41 = arith.constant 0 : index
    %c0_42 = arith.constant 0 : index
    %c8_43 = arith.constant 8 : index
    %53 = vector.load %arg6[%c0_41, %c0_42, %c8_43] : memref<2x1x96xf32, #tpu.memory_space<vmem>>, vector<1x1x8xf32>
    %54 = vector.shape_cast %53 : vector<1x1x8xf32> to vector<1x8xf32>
    %55 = vector.broadcast %54 : vector<1x8xf32> to vector<16x8xf32>
    %56 = arith.addf %52, %55 : vector<16x8xf32>
    %c0_44 = arith.constant 0 : index
    %c0_45 = arith.constant 0 : index
    %c40 = arith.constant 40 : index
    %57 = vector.load %arg5[%c0_44, %c0_45, %c40] : memref<2x32x96xf32, #tpu.memory_space<vmem>>, vector<1x32x8xf32>
    %58 = vector.shape_cast %57 : vector<1x32x8xf32> to vector<32x8xf32>
    %cst_46 = arith.constant dense<0.000000e+00> : vector<16x8xf32>
    %59 = tpu.matmul %9, %58, %cst_46 {dimension_numbers = #tpu.dot_dimension_numbers<[1], [0], [0], [1], [0, 0, 1, 1], [], []>} : vector<16x32xf32>, vector<32x8xf32>, vector<16x8xf32> -> vector<16x8xf32>
    %c0_47 = arith.constant 0 : index
    %c0_48 = arith.constant 0 : index
    %c40_49 = arith.constant 40 : index
    %60 = vector.load %arg6[%c0_47, %c0_48, %c40_49] : memref<2x1x96xf32, #tpu.memory_space<vmem>>, vector<1x1x8xf32>
    %61 = vector.shape_cast %60 : vector<1x1x8xf32> to vector<1x8xf32>
    %62 = vector.broadcast %61 : vector<1x8xf32> to vector<16x8xf32>
    %63 = arith.addf %59, %62 : vector<16x8xf32>
    %c0_50 = arith.constant 0 : index
    %c0_51 = arith.constant 0 : index
    %c72 = arith.constant 72 : index
    %64 = vector.load %arg5[%c0_50, %c0_51, %c72] : memref<2x32x96xf32, #tpu.memory_space<vmem>>, vector<1x32x8xf32>
    %65 = vector.shape_cast %64 : vector<1x32x8xf32> to vector<32x8xf32>
    %cst_52 = arith.constant dense<0.000000e+00> : vector<16x8xf32>
    %66 = tpu.matmul %9, %65, %cst_52 {dimension_numbers = #tpu.dot_dimension_numbers<[1], [0], [0], [1], [0, 0, 1, 1], [], []>} : vector<16x32xf32>, vector<32x8xf32>, vector<16x8xf32> -> vector<16x8xf32>
    %c0_53 = arith.constant 0 : index
    %c0_54 = arith.constant 0 : index
    %c72_55 = arith.constant 72 : index
    %67 = vector.load %arg6[%c0_53, %c0_54, %c72_55] : memref<2x1x96xf32, #tpu.memory_space<vmem>>, vector<1x1x8xf32>
    %68 = vector.shape_cast %67 : vector<1x1x8xf32> to vector<1x8xf32>
    %69 = vector.broadcast %68 : vector<1x8xf32> to vector<16x8xf32>
    %70 = arith.addf %66, %69 : vector<16x8xf32>
    %cst_56 = arith.constant dense<0.000000e+00> : vector<16x16xf32>
    %71 = tpu.matmul %56, %63, %cst_56 {dimension_numbers = #tpu.dot_dimension_numbers<[1], [1], [0], [0], [0, 0, 1, 0], [], []>} : vector<16x8xf32>, vector<16x8xf32>, vector<16x16xf32> -> vector<16x16xf32>
    %cst_57 = arith.constant 0.353553385 : f32
    %72 = vector.broadcast %cst_57 : f32 to vector<16x16xf32>
    %73 = arith.mulf %71, %72 : vector<16x16xf32>
    %cst_58 = arith.constant dense<0xFF800000> : vector<16xf32>
    %74 = vector.multi_reduction <maximumf>, %73, %cst_58 [1] : vector<16x16xf32> to vector<16xf32>
    %75 = vector.shape_cast %74 : vector<16xf32> to vector<16x1xf32>
    %76 = vector.broadcast %75 : vector<16x1xf32> to vector<16x16xf32>
    %77 = arith.subf %73, %76 : vector<16x16xf32>
    %78 = math.exp %77 : vector<16x16xf32>
    %cst_59 = arith.constant dense<0.000000e+00> : vector<16xf32>
    %79 = vector.multi_reduction <add>, %78, %cst_59 [1] : vector<16x16xf32> to vector<16xf32>
    %80 = vector.shape_cast %79 : vector<16xf32> to vector<16x1xf32>
    %81 = tpu.reciprocal %80 {approx = true} : vector<16x1xf32> -> vector<16x1xf32>
    %82 = vector.broadcast %81 : vector<16x1xf32> to vector<16x16xf32>
    %83 = arith.mulf %78, %82 : vector<16x16xf32>
    %cst_60 = arith.constant dense<0.000000e+00> : vector<16x8xf32>
    %84 = tpu.matmul %83, %70, %cst_60 {dimension_numbers = #tpu.dot_dimension_numbers<[1], [0], [0], [1], [0, 0, 1, 1], [], []>} : vector<16x16xf32>, vector<16x8xf32>, vector<16x8xf32> -> vector<16x8xf32>
    %c0_61 = arith.constant 0 : index
    %c8_62 = arith.constant 8 : index
    %c0_63 = arith.constant 0 : index
    %85 = vector.load %arg7[%c0_61, %c8_62, %c0_63] : memref<2x32x32xf32, #tpu.memory_space<vmem>>, vector<1x8x32xf32>
    %86 = vector.shape_cast %85 : vector<1x8x32xf32> to vector<8x32xf32>
    %cst_64 = arith.constant dense<0.000000e+00> : vector<16x32xf32>
    %87 = tpu.matmul %84, %86, %cst_64 {dimension_numbers = #tpu.dot_dimension_numbers<[1], [0], [0], [1], [0, 0, 1, 1], [], []>} : vector<16x8xf32>, vector<8x32xf32>, vector<16x32xf32> -> vector<16x32xf32>
    %88 = arith.addf %49, %87 : vector<16x32xf32>
    %c0_65 = arith.constant 0 : index
    %c0_66 = arith.constant 0 : index
    %c16 = arith.constant 16 : index
    %89 = vector.load %arg5[%c0_65, %c0_66, %c16] : memref<2x32x96xf32, #tpu.memory_space<vmem>>, vector<1x32x8xf32>
    %90 = vector.shape_cast %89 : vector<1x32x8xf32> to vector<32x8xf32>
    %cst_67 = arith.constant dense<0.000000e+00> : vector<16x8xf32>
    %91 = tpu.matmul %9, %90, %cst_67 {dimension_numbers = #tpu.dot_dimension_numbers<[1], [0], [0], [1], [0, 0, 1, 1], [], []>} : vector<16x32xf32>, vector<32x8xf32>, vector<16x8xf32> -> vector<16x8xf32>
    %c0_68 = arith.constant 0 : index
    %c0_69 = arith.constant 0 : index
    %c16_70 = arith.constant 16 : index
    %92 = vector.load %arg6[%c0_68, %c0_69, %c16_70] : memref<2x1x96xf32, #tpu.memory_space<vmem>>, vector<1x1x8xf32>
    %93 = vector.shape_cast %92 : vector<1x1x8xf32> to vector<1x8xf32>
    %94 = vector.broadcast %93 : vector<1x8xf32> to vector<16x8xf32>
    %95 = arith.addf %91, %94 : vector<16x8xf32>
    %c0_71 = arith.constant 0 : index
    %c0_72 = arith.constant 0 : index
    %c48 = arith.constant 48 : index
    %96 = vector.load %arg5[%c0_71, %c0_72, %c48] : memref<2x32x96xf32, #tpu.memory_space<vmem>>, vector<1x32x8xf32>
    %97 = vector.shape_cast %96 : vector<1x32x8xf32> to vector<32x8xf32>
    %cst_73 = arith.constant dense<0.000000e+00> : vector<16x8xf32>
    %98 = tpu.matmul %9, %97, %cst_73 {dimension_numbers = #tpu.dot_dimension_numbers<[1], [0], [0], [1], [0, 0, 1, 1], [], []>} : vector<16x32xf32>, vector<32x8xf32>, vector<16x8xf32> -> vector<16x8xf32>
    %c0_74 = arith.constant 0 : index
    %c0_75 = arith.constant 0 : index
    %c48_76 = arith.constant 48 : index
    %99 = vector.load %arg6[%c0_74, %c0_75, %c48_76] : memref<2x1x96xf32, #tpu.memory_space<vmem>>, vector<1x1x8xf32>
    %100 = vector.shape_cast %99 : vector<1x1x8xf32> to vector<1x8xf32>
    %101 = vector.broadcast %100 : vector<1x8xf32> to vector<16x8xf32>
    %102 = arith.addf %98, %101 : vector<16x8xf32>
    %c0_77 = arith.constant 0 : index
    %c0_78 = arith.constant 0 : index
    %c80 = arith.constant 80 : index
    %103 = vector.load %arg5[%c0_77, %c0_78, %c80] : memref<2x32x96xf32, #tpu.memory_space<vmem>>, vector<1x32x8xf32>
    %104 = vector.shape_cast %103 : vector<1x32x8xf32> to vector<32x8xf32>
    %cst_79 = arith.constant dense<0.000000e+00> : vector<16x8xf32>
    %105 = tpu.matmul %9, %104, %cst_79 {dimension_numbers = #tpu.dot_dimension_numbers<[1], [0], [0], [1], [0, 0, 1, 1], [], []>} : vector<16x32xf32>, vector<32x8xf32>, vector<16x8xf32> -> vector<16x8xf32>
    %c0_80 = arith.constant 0 : index
    %c0_81 = arith.constant 0 : index
    %c80_82 = arith.constant 80 : index
    %106 = vector.load %arg6[%c0_80, %c0_81, %c80_82] : memref<2x1x96xf32, #tpu.memory_space<vmem>>, vector<1x1x8xf32>
    %107 = vector.shape_cast %106 : vector<1x1x8xf32> to vector<1x8xf32>
    %108 = vector.broadcast %107 : vector<1x8xf32> to vector<16x8xf32>
    %109 = arith.addf %105, %108 : vector<16x8xf32>
    %cst_83 = arith.constant dense<0.000000e+00> : vector<16x16xf32>
    %110 = tpu.matmul %95, %102, %cst_83 {dimension_numbers = #tpu.dot_dimension_numbers<[1], [1], [0], [0], [0, 0, 1, 0], [], []>} : vector<16x8xf32>, vector<16x8xf32>, vector<16x16xf32> -> vector<16x16xf32>
    %cst_84 = arith.constant 0.353553385 : f32
    %111 = vector.broadcast %cst_84 : f32 to vector<16x16xf32>
    %112 = arith.mulf %110, %111 : vector<16x16xf32>
    %cst_85 = arith.constant dense<0xFF800000> : vector<16xf32>
    %113 = vector.multi_reduction <maximumf>, %112, %cst_85 [1] : vector<16x16xf32> to vector<16xf32>
    %114 = vector.shape_cast %113 : vector<16xf32> to vector<16x1xf32>
    %115 = vector.broadcast %114 : vector<16x1xf32> to vector<16x16xf32>
    %116 = arith.subf %112, %115 : vector<16x16xf32>
    %117 = math.exp %116 : vector<16x16xf32>
    %cst_86 = arith.constant dense<0.000000e+00> : vector<16xf32>
    %118 = vector.multi_reduction <add>, %117, %cst_86 [1] : vector<16x16xf32> to vector<16xf32>
    %119 = vector.shape_cast %118 : vector<16xf32> to vector<16x1xf32>
    %120 = tpu.reciprocal %119 {approx = true} : vector<16x1xf32> -> vector<16x1xf32>
    %121 = vector.broadcast %120 : vector<16x1xf32> to vector<16x16xf32>
    %122 = arith.mulf %117, %121 : vector<16x16xf32>
    %cst_87 = arith.constant dense<0.000000e+00> : vector<16x8xf32>
    %123 = tpu.matmul %122, %109, %cst_87 {dimension_numbers = #tpu.dot_dimension_numbers<[1], [0], [0], [1], [0, 0, 1, 1], [], []>} : vector<16x16xf32>, vector<16x8xf32>, vector<16x8xf32> -> vector<16x8xf32>
    %c0_88 = arith.constant 0 : index
    %c16_89 = arith.constant 16 : index
    %c0_90 = arith.constant 0 : index
    %124 = vector.load %arg7[%c0_88, %c16_89, %c0_90] : memref<2x32x32xf32, #tpu.memory_space<vmem>>, vector<1x8x32xf32>
    %125 = vector.shape_cast %124 : vector<1x8x32xf32> to vector<8x32xf32>
    %cst_91 = arith.constant dense<0.000000e+00> : vector<16x32xf32>
    %126 = tpu.matmul %123, %125, %cst_91 {dimension_numbers = #tpu.dot_dimension_numbers<[1], [0], [0], [1], [0, 0, 1, 1], [], []>} : vector<16x8xf32>, vector<8x32xf32>, vector<16x32xf32> -> vector<16x32xf32>
    %127 = arith.addf %88, %126 : vector<16x32xf32>
    %c0_92 = arith.constant 0 : index
    %c0_93 = arith.constant 0 : index
    %c24 = arith.constant 24 : index
    %128 = vector.load %arg5[%c0_92, %c0_93, %c24] : memref<2x32x96xf32, #tpu.memory_space<vmem>>, vector<1x32x8xf32>
    %129 = vector.shape_cast %128 : vector<1x32x8xf32> to vector<32x8xf32>
    %cst_94 = arith.constant dense<0.000000e+00> : vector<16x8xf32>
    %130 = tpu.matmul %9, %129, %cst_94 {dimension_numbers = #tpu.dot_dimension_numbers<[1], [0], [0], [1], [0, 0, 1, 1], [], []>} : vector<16x32xf32>, vector<32x8xf32>, vector<16x8xf32> -> vector<16x8xf32>
    %c0_95 = arith.constant 0 : index
    %c0_96 = arith.constant 0 : index
    %c24_97 = arith.constant 24 : index
    %131 = vector.load %arg6[%c0_95, %c0_96, %c24_97] : memref<2x1x96xf32, #tpu.memory_space<vmem>>, vector<1x1x8xf32>
    %132 = vector.shape_cast %131 : vector<1x1x8xf32> to vector<1x8xf32>
    %133 = vector.broadcast %132 : vector<1x8xf32> to vector<16x8xf32>
    %134 = arith.addf %130, %133 : vector<16x8xf32>
    %c0_98 = arith.constant 0 : index
    %c0_99 = arith.constant 0 : index
    %c56 = arith.constant 56 : index
    %135 = vector.load %arg5[%c0_98, %c0_99, %c56] : memref<2x32x96xf32, #tpu.memory_space<vmem>>, vector<1x32x8xf32>
    %136 = vector.shape_cast %135 : vector<1x32x8xf32> to vector<32x8xf32>
    %cst_100 = arith.constant dense<0.000000e+00> : vector<16x8xf32>
    %137 = tpu.matmul %9, %136, %cst_100 {dimension_numbers = #tpu.dot_dimension_numbers<[1], [0], [0], [1], [0, 0, 1, 1], [], []>} : vector<16x32xf32>, vector<32x8xf32>, vector<16x8xf32> -> vector<16x8xf32>
    %c0_101 = arith.constant 0 : index
    %c0_102 = arith.constant 0 : index
    %c56_103 = arith.constant 56 : index
    %138 = vector.load %arg6[%c0_101, %c0_102, %c56_103] : memref<2x1x96xf32, #tpu.memory_space<vmem>>, vector<1x1x8xf32>
    %139 = vector.shape_cast %138 : vector<1x1x8xf32> to vector<1x8xf32>
    %140 = vector.broadcast %139 : vector<1x8xf32> to vector<16x8xf32>
    %141 = arith.addf %137, %140 : vector<16x8xf32>
    %c0_104 = arith.constant 0 : index
    %c0_105 = arith.constant 0 : index
    %c88 = arith.constant 88 : index
    %142 = vector.load %arg5[%c0_104, %c0_105, %c88] : memref<2x32x96xf32, #tpu.memory_space<vmem>>, vector<1x32x8xf32>
    %143 = vector.shape_cast %142 : vector<1x32x8xf32> to vector<32x8xf32>
    %cst_106 = arith.constant dense<0.000000e+00> : vector<16x8xf32>
    %144 = tpu.matmul %9, %143, %cst_106 {dimension_numbers = #tpu.dot_dimension_numbers<[1], [0], [0], [1], [0, 0, 1, 1], [], []>} : vector<16x32xf32>, vector<32x8xf32>, vector<16x8xf32> -> vector<16x8xf32>
    %c0_107 = arith.constant 0 : index
    %c0_108 = arith.constant 0 : index
    %c88_109 = arith.constant 88 : index
    %145 = vector.load %arg6[%c0_107, %c0_108, %c88_109] : memref<2x1x96xf32, #tpu.memory_space<vmem>>, vector<1x1x8xf32>
    %146 = vector.shape_cast %145 : vector<1x1x8xf32> to vector<1x8xf32>
    %147 = vector.broadcast %146 : vector<1x8xf32> to vector<16x8xf32>
    %148 = arith.addf %144, %147 : vector<16x8xf32>
    %cst_110 = arith.constant dense<0.000000e+00> : vector<16x16xf32>
    %149 = tpu.matmul %134, %141, %cst_110 {dimension_numbers = #tpu.dot_dimension_numbers<[1], [1], [0], [0], [0, 0, 1, 0], [], []>} : vector<16x8xf32>, vector<16x8xf32>, vector<16x16xf32> -> vector<16x16xf32>
    %cst_111 = arith.constant 0.353553385 : f32
    %150 = vector.broadcast %cst_111 : f32 to vector<16x16xf32>
    %151 = arith.mulf %149, %150 : vector<16x16xf32>
    %cst_112 = arith.constant dense<0xFF800000> : vector<16xf32>
    %152 = vector.multi_reduction <maximumf>, %151, %cst_112 [1] : vector<16x16xf32> to vector<16xf32>
    %153 = vector.shape_cast %152 : vector<16xf32> to vector<16x1xf32>
    %154 = vector.broadcast %153 : vector<16x1xf32> to vector<16x16xf32>
    %155 = arith.subf %151, %154 : vector<16x16xf32>
    %156 = math.exp %155 : vector<16x16xf32>
    %cst_113 = arith.constant dense<0.000000e+00> : vector<16xf32>
    %157 = vector.multi_reduction <add>, %156, %cst_113 [1] : vector<16x16xf32> to vector<16xf32>
    %158 = vector.shape_cast %157 : vector<16xf32> to vector<16x1xf32>
    %159 = tpu.reciprocal %158 {approx = true} : vector<16x1xf32> -> vector<16x1xf32>
    %160 = vector.broadcast %159 : vector<16x1xf32> to vector<16x16xf32>
    %161 = arith.mulf %156, %160 : vector<16x16xf32>
    %cst_114 = arith.constant dense<0.000000e+00> : vector<16x8xf32>
    %162 = tpu.matmul %161, %148, %cst_114 {dimension_numbers = #tpu.dot_dimension_numbers<[1], [0], [0], [1], [0, 0, 1, 1], [], []>} : vector<16x16xf32>, vector<16x8xf32>, vector<16x8xf32> -> vector<16x8xf32>
    %c0_115 = arith.constant 0 : index
    %c24_116 = arith.constant 24 : index
    %c0_117 = arith.constant 0 : index
    %163 = vector.load %arg7[%c0_115, %c24_116, %c0_117] : memref<2x32x32xf32, #tpu.memory_space<vmem>>, vector<1x8x32xf32>
    %164 = vector.shape_cast %163 : vector<1x8x32xf32> to vector<8x32xf32>
    %cst_118 = arith.constant dense<0.000000e+00> : vector<16x32xf32>
    %165 = tpu.matmul %162, %164, %cst_118 {dimension_numbers = #tpu.dot_dimension_numbers<[1], [0], [0], [1], [0, 0, 1, 1], [], []>} : vector<16x8xf32>, vector<8x32xf32>, vector<16x32xf32> -> vector<16x32xf32>
    %166 = arith.addf %127, %165 : vector<16x32xf32>
    %c0_119 = arith.constant 0 : index
    %c0_120 = arith.constant 0 : index
    %c0_121 = arith.constant 0 : index
    %167 = vector.load %arg8[%c0_119, %c0_120, %c0_121] : memref<2x1x32xf32, #tpu.memory_space<vmem>>, vector<1x1x32xf32>
    %168 = vector.shape_cast %167 : vector<1x1x32xf32> to vector<1x32xf32>
    %169 = vector.broadcast %168 : vector<1x32xf32> to vector<16x32xf32>
    %170 = arith.addf %166, %169 : vector<16x32xf32>
    %171 = arith.addf %170, %9 : vector<16x32xf32>
    %c0_122 = arith.constant 0 : index
    %c0_123 = arith.constant 0 : index
    %c0_124 = arith.constant 0 : index
    %172 = vector.load %arg9[%c0_122, %c0_123, %c0_124] : memref<2x1x32xf32, #tpu.memory_space<vmem>>, vector<1x1x32xf32>
    %173 = vector.shape_cast %172 : vector<1x1x32xf32> to vector<1x32xf32>
    %c0_125 = arith.constant 0 : index
    %c0_126 = arith.constant 0 : index
    %c0_127 = arith.constant 0 : index
    %174 = vector.load %arg10[%c0_125, %c0_126, %c0_127] : memref<2x1x32xf32, #tpu.memory_space<vmem>>, vector<1x1x32xf32>
    %175 = vector.shape_cast %174 : vector<1x1x32xf32> to vector<1x32xf32>
    %cst_128 = arith.constant dense<0.000000e+00> : vector<16xf32>
    %176 = vector.multi_reduction <add>, %171, %cst_128 [1] : vector<16x32xf32> to vector<16xf32>
    %177 = vector.shape_cast %176 : vector<16xf32> to vector<16x1xf32>
    %cst_129 = arith.constant 3.200000e+01 : f32
    %178 = vector.broadcast %cst_129 : f32 to vector<16x1xf32>
    %179 = arith.divf %177, %178 : vector<16x1xf32>
    %180 = vector.broadcast %179 : vector<16x1xf32> to vector<16x32xf32>
    %181 = arith.subf %171, %180 : vector<16x32xf32>
    %182 = arith.mulf %181, %181 : vector<16x32xf32>
    %cst_130 = arith.constant dense<0.000000e+00> : vector<16xf32>
    %183 = vector.multi_reduction <add>, %182, %cst_130 [1] : vector<16x32xf32> to vector<16xf32>
    %184 = vector.shape_cast %183 : vector<16xf32> to vector<16x1xf32>
    %cst_131 = arith.constant 3.200000e+01 : f32
    %185 = vector.broadcast %cst_131 : f32 to vector<16x1xf32>
    %186 = arith.divf %184, %185 : vector<16x1xf32>
    %187 = vector.broadcast %179 : vector<16x1xf32> to vector<16x32xf32>
    %188 = arith.subf %171, %187 : vector<16x32xf32>
    %cst_132 = arith.constant 9.99999974E-6 : f32
    %189 = vector.broadcast %cst_132 : f32 to vector<16x1xf32>
    %190 = arith.addf %186, %189 : vector<16x1xf32>
    %191 = math.rsqrt %190 : vector<16x1xf32>
    %192 = vector.broadcast %191 : vector<16x1xf32> to vector<16x32xf32>
    %193 = arith.mulf %188, %192 : vector<16x32xf32>
    %194 = vector.broadcast %173 : vector<1x32xf32> to vector<16x32xf32>
    %195 = arith.mulf %193, %194 : vector<16x32xf32>
    %196 = vector.broadcast %175 : vector<1x32xf32> to vector<16x32xf32>
    %197 = arith.addf %195, %196 : vector<16x32xf32>
    %c0_133 = arith.constant 0 : index
    %c0_134 = arith.constant 0 : index
    %c0_135 = arith.constant 0 : index
    %198 = vector.load %arg11[%c0_133, %c0_134, %c0_135] : memref<2x32x64xf32, #tpu.memory_space<vmem>>, vector<1x32x64xf32>
    %199 = vector.shape_cast %198 : vector<1x32x64xf32> to vector<32x64xf32>
    %cst_136 = arith.constant dense<0.000000e+00> : vector<16x64xf32>
    %200 = tpu.matmul %197, %199, %cst_136 {dimension_numbers = #tpu.dot_dimension_numbers<[1], [0], [0], [1], [0, 0, 1, 1], [], []>} : vector<16x32xf32>, vector<32x64xf32>, vector<16x64xf32> -> vector<16x64xf32>
    %c0_137 = arith.constant 0 : index
    %c0_138 = arith.constant 0 : index
    %c0_139 = arith.constant 0 : index
    %201 = vector.load %arg12[%c0_137, %c0_138, %c0_139] : memref<2x1x64xf32, #tpu.memory_space<vmem>>, vector<1x1x64xf32>
    %202 = vector.shape_cast %201 : vector<1x1x64xf32> to vector<1x64xf32>
    %203 = vector.broadcast %202 : vector<1x64xf32> to vector<16x64xf32>
    %204 = arith.addf %200, %203 : vector<16x64xf32>
    %cst_140 = arith.constant 0.000000e+00 : f32
    %205 = vector.broadcast %cst_140 : f32 to vector<16x64xf32>
    %206 = arith.maximumf %204, %205 : vector<16x64xf32>
    %c0_141 = arith.constant 0 : index
    %c0_142 = arith.constant 0 : index
    %c0_143 = arith.constant 0 : index
    %207 = vector.load %arg13[%c0_141, %c0_142, %c0_143] : memref<2x64x32xf32, #tpu.memory_space<vmem>>, vector<1x64x32xf32>
    %208 = vector.shape_cast %207 : vector<1x64x32xf32> to vector<64x32xf32>
    %cst_144 = arith.constant dense<0.000000e+00> : vector<16x32xf32>
    %209 = tpu.matmul %206, %208, %cst_144 {dimension_numbers = #tpu.dot_dimension_numbers<[1], [0], [0], [1], [0, 0, 1, 1], [], []>} : vector<16x64xf32>, vector<64x32xf32>, vector<16x32xf32> -> vector<16x32xf32>
    %c0_145 = arith.constant 0 : index
    %c0_146 = arith.constant 0 : index
    %c0_147 = arith.constant 0 : index
    %210 = vector.load %arg14[%c0_145, %c0_146, %c0_147] : memref<2x1x32xf32, #tpu.memory_space<vmem>>, vector<1x1x32xf32>
    %211 = vector.shape_cast %210 : vector<1x1x32xf32> to vector<1x32xf32>
    %212 = vector.broadcast %211 : vector<1x32xf32> to vector<16x32xf32>
    %213 = arith.addf %209, %212 : vector<16x32xf32>
    %214 = arith.addf %213, %197 : vector<16x32xf32>
    %c0_148 = arith.constant 0 : index
    %c0_149 = arith.constant 0 : index
    %c0_150 = arith.constant 0 : index
    %215 = vector.load %arg15[%c0_148, %c0_149, %c0_150] : memref<2x1x32xf32, #tpu.memory_space<vmem>>, vector<1x1x32xf32>
    %216 = vector.shape_cast %215 : vector<1x1x32xf32> to vector<1x32xf32>
    %c0_151 = arith.constant 0 : index
    %c0_152 = arith.constant 0 : index
    %c0_153 = arith.constant 0 : index
    %217 = vector.load %arg16[%c0_151, %c0_152, %c0_153] : memref<2x1x32xf32, #tpu.memory_space<vmem>>, vector<1x1x32xf32>
    %218 = vector.shape_cast %217 : vector<1x1x32xf32> to vector<1x32xf32>
    %cst_154 = arith.constant dense<0.000000e+00> : vector<16xf32>
    %219 = vector.multi_reduction <add>, %214, %cst_154 [1] : vector<16x32xf32> to vector<16xf32>
    %220 = vector.shape_cast %219 : vector<16xf32> to vector<16x1xf32>
    %cst_155 = arith.constant 3.200000e+01 : f32
    %221 = vector.broadcast %cst_155 : f32 to vector<16x1xf32>
    %222 = arith.divf %220, %221 : vector<16x1xf32>
    %223 = vector.broadcast %222 : vector<16x1xf32> to vector<16x32xf32>
    %224 = arith.subf %214, %223 : vector<16x32xf32>
    %225 = arith.mulf %224, %224 : vector<16x32xf32>
    %cst_156 = arith.constant dense<0.000000e+00> : vector<16xf32>
    %226 = vector.multi_reduction <add>, %225, %cst_156 [1] : vector<16x32xf32> to vector<16xf32>
    %227 = vector.shape_cast %226 : vector<16xf32> to vector<16x1xf32>
    %cst_157 = arith.constant 3.200000e+01 : f32
    %228 = vector.broadcast %cst_157 : f32 to vector<16x1xf32>
    %229 = arith.divf %227, %228 : vector<16x1xf32>
    %230 = vector.broadcast %222 : vector<16x1xf32> to vector<16x32xf32>
    %231 = arith.subf %214, %230 : vector<16x32xf32>
    %cst_158 = arith.constant 9.99999974E-6 : f32
    %232 = vector.broadcast %cst_158 : f32 to vector<16x1xf32>
    %233 = arith.addf %229, %232 : vector<16x1xf32>
    %234 = math.rsqrt %233 : vector<16x1xf32>
    %235 = vector.broadcast %234 : vector<16x1xf32> to vector<16x32xf32>
    %236 = arith.mulf %231, %235 : vector<16x32xf32>
    %237 = vector.broadcast %216 : vector<1x32xf32> to vector<16x32xf32>
    %238 = arith.mulf %236, %237 : vector<16x32xf32>
    %239 = vector.broadcast %218 : vector<1x32xf32> to vector<16x32xf32>
    %240 = arith.addf %238, %239 : vector<16x32xf32>
    %cst_159 = arith.constant 0.000000e+00 : f32
    %241 = vector.broadcast %cst_159 : f32 to vector<16x32xf32>
    %c1 = arith.constant 1 : index
    %c0_160 = arith.constant 0 : index
    %c0_161 = arith.constant 0 : index
    %242 = vector.load %arg5[%c1, %c0_160, %c0_161] : memref<2x32x96xf32, #tpu.memory_space<vmem>>, vector<1x32x8xf32>
    %243 = vector.shape_cast %242 : vector<1x32x8xf32> to vector<32x8xf32>
    %cst_162 = arith.constant dense<0.000000e+00> : vector<16x8xf32>
    %244 = tpu.matmul %240, %243, %cst_162 {dimension_numbers = #tpu.dot_dimension_numbers<[1], [0], [0], [1], [0, 0, 1, 1], [], []>} : vector<16x32xf32>, vector<32x8xf32>, vector<16x8xf32> -> vector<16x8xf32>
    %c1_163 = arith.constant 1 : index
    %c0_164 = arith.constant 0 : index
    %c0_165 = arith.constant 0 : index
    %245 = vector.load %arg6[%c1_163, %c0_164, %c0_165] : memref<2x1x96xf32, #tpu.memory_space<vmem>>, vector<1x1x8xf32>
    %246 = vector.shape_cast %245 : vector<1x1x8xf32> to vector<1x8xf32>
    %247 = vector.broadcast %246 : vector<1x8xf32> to vector<16x8xf32>
    %248 = arith.addf %244, %247 : vector<16x8xf32>
    %c1_166 = arith.constant 1 : index
    %c0_167 = arith.constant 0 : index
    %c32_168 = arith.constant 32 : index
    %249 = vector.load %arg5[%c1_166, %c0_167, %c32_168] : memref<2x32x96xf32, #tpu.memory_space<vmem>>, vector<1x32x8xf32>
    %250 = vector.shape_cast %249 : vector<1x32x8xf32> to vector<32x8xf32>
    %cst_169 = arith.constant dense<0.000000e+00> : vector<16x8xf32>
    %251 = tpu.matmul %240, %250, %cst_169 {dimension_numbers = #tpu.dot_dimension_numbers<[1], [0], [0], [1], [0, 0, 1, 1], [], []>} : vector<16x32xf32>, vector<32x8xf32>, vector<16x8xf32> -> vector<16x8xf32>
    %c1_170 = arith.constant 1 : index
    %c0_171 = arith.constant 0 : index
    %c32_172 = arith.constant 32 : index
    %252 = vector.load %arg6[%c1_170, %c0_171, %c32_172] : memref<2x1x96xf32, #tpu.memory_space<vmem>>, vector<1x1x8xf32>
    %253 = vector.shape_cast %252 : vector<1x1x8xf32> to vector<1x8xf32>
    %254 = vector.broadcast %253 : vector<1x8xf32> to vector<16x8xf32>
    %255 = arith.addf %251, %254 : vector<16x8xf32>
    %c1_173 = arith.constant 1 : index
    %c0_174 = arith.constant 0 : index
    %c64_175 = arith.constant 64 : index
    %256 = vector.load %arg5[%c1_173, %c0_174, %c64_175] : memref<2x32x96xf32, #tpu.memory_space<vmem>>, vector<1x32x8xf32>
    %257 = vector.shape_cast %256 : vector<1x32x8xf32> to vector<32x8xf32>
    %cst_176 = arith.constant dense<0.000000e+00> : vector<16x8xf32>
    %258 = tpu.matmul %240, %257, %cst_176 {dimension_numbers = #tpu.dot_dimension_numbers<[1], [0], [0], [1], [0, 0, 1, 1], [], []>} : vector<16x32xf32>, vector<32x8xf32>, vector<16x8xf32> -> vector<16x8xf32>
    %c1_177 = arith.constant 1 : index
    %c0_178 = arith.constant 0 : index
    %c64_179 = arith.constant 64 : index
    %259 = vector.load %arg6[%c1_177, %c0_178, %c64_179] : memref<2x1x96xf32, #tpu.memory_space<vmem>>, vector<1x1x8xf32>
    %260 = vector.shape_cast %259 : vector<1x1x8xf32> to vector<1x8xf32>
    %261 = vector.broadcast %260 : vector<1x8xf32> to vector<16x8xf32>
    %262 = arith.addf %258, %261 : vector<16x8xf32>
    %cst_180 = arith.constant dense<0.000000e+00> : vector<16x16xf32>
    %263 = tpu.matmul %248, %255, %cst_180 {dimension_numbers = #tpu.dot_dimension_numbers<[1], [1], [0], [0], [0, 0, 1, 0], [], []>} : vector<16x8xf32>, vector<16x8xf32>, vector<16x16xf32> -> vector<16x16xf32>
    %cst_181 = arith.constant 0.353553385 : f32
    %264 = vector.broadcast %cst_181 : f32 to vector<16x16xf32>
    %265 = arith.mulf %263, %264 : vector<16x16xf32>
    %cst_182 = arith.constant dense<0xFF800000> : vector<16xf32>
    %266 = vector.multi_reduction <maximumf>, %265, %cst_182 [1] : vector<16x16xf32> to vector<16xf32>
    %267 = vector.shape_cast %266 : vector<16xf32> to vector<16x1xf32>
    %268 = vector.broadcast %267 : vector<16x1xf32> to vector<16x16xf32>
    %269 = arith.subf %265, %268 : vector<16x16xf32>
    %270 = math.exp %269 : vector<16x16xf32>
    %cst_183 = arith.constant dense<0.000000e+00> : vector<16xf32>
    %271 = vector.multi_reduction <add>, %270, %cst_183 [1] : vector<16x16xf32> to vector<16xf32>
    %272 = vector.shape_cast %271 : vector<16xf32> to vector<16x1xf32>
    %273 = tpu.reciprocal %272 {approx = true} : vector<16x1xf32> -> vector<16x1xf32>
    %274 = vector.broadcast %273 : vector<16x1xf32> to vector<16x16xf32>
    %275 = arith.mulf %270, %274 : vector<16x16xf32>
    %cst_184 = arith.constant dense<0.000000e+00> : vector<16x8xf32>
    %276 = tpu.matmul %275, %262, %cst_184 {dimension_numbers = #tpu.dot_dimension_numbers<[1], [0], [0], [1], [0, 0, 1, 1], [], []>} : vector<16x16xf32>, vector<16x8xf32>, vector<16x8xf32> -> vector<16x8xf32>
    %c1_185 = arith.constant 1 : index
    %c0_186 = arith.constant 0 : index
    %c0_187 = arith.constant 0 : index
    %277 = vector.load %arg7[%c1_185, %c0_186, %c0_187] : memref<2x32x32xf32, #tpu.memory_space<vmem>>, vector<1x8x32xf32>
    %278 = vector.shape_cast %277 : vector<1x8x32xf32> to vector<8x32xf32>
    %cst_188 = arith.constant dense<0.000000e+00> : vector<16x32xf32>
    %279 = tpu.matmul %276, %278, %cst_188 {dimension_numbers = #tpu.dot_dimension_numbers<[1], [0], [0], [1], [0, 0, 1, 1], [], []>} : vector<16x8xf32>, vector<8x32xf32>, vector<16x32xf32> -> vector<16x32xf32>
    %280 = arith.addf %241, %279 : vector<16x32xf32>
    %c1_189 = arith.constant 1 : index
    %c0_190 = arith.constant 0 : index
    %c8_191 = arith.constant 8 : index
    %281 = vector.load %arg5[%c1_189, %c0_190, %c8_191] : memref<2x32x96xf32, #tpu.memory_space<vmem>>, vector<1x32x8xf32>
    %282 = vector.shape_cast %281 : vector<1x32x8xf32> to vector<32x8xf32>
    %cst_192 = arith.constant dense<0.000000e+00> : vector<16x8xf32>
    %283 = tpu.matmul %240, %282, %cst_192 {dimension_numbers = #tpu.dot_dimension_numbers<[1], [0], [0], [1], [0, 0, 1, 1], [], []>} : vector<16x32xf32>, vector<32x8xf32>, vector<16x8xf32> -> vector<16x8xf32>
    %c1_193 = arith.constant 1 : index
    %c0_194 = arith.constant 0 : index
    %c8_195 = arith.constant 8 : index
    %284 = vector.load %arg6[%c1_193, %c0_194, %c8_195] : memref<2x1x96xf32, #tpu.memory_space<vmem>>, vector<1x1x8xf32>
    %285 = vector.shape_cast %284 : vector<1x1x8xf32> to vector<1x8xf32>
    %286 = vector.broadcast %285 : vector<1x8xf32> to vector<16x8xf32>
    %287 = arith.addf %283, %286 : vector<16x8xf32>
    %c1_196 = arith.constant 1 : index
    %c0_197 = arith.constant 0 : index
    %c40_198 = arith.constant 40 : index
    %288 = vector.load %arg5[%c1_196, %c0_197, %c40_198] : memref<2x32x96xf32, #tpu.memory_space<vmem>>, vector<1x32x8xf32>
    %289 = vector.shape_cast %288 : vector<1x32x8xf32> to vector<32x8xf32>
    %cst_199 = arith.constant dense<0.000000e+00> : vector<16x8xf32>
    %290 = tpu.matmul %240, %289, %cst_199 {dimension_numbers = #tpu.dot_dimension_numbers<[1], [0], [0], [1], [0, 0, 1, 1], [], []>} : vector<16x32xf32>, vector<32x8xf32>, vector<16x8xf32> -> vector<16x8xf32>
    %c1_200 = arith.constant 1 : index
    %c0_201 = arith.constant 0 : index
    %c40_202 = arith.constant 40 : index
    %291 = vector.load %arg6[%c1_200, %c0_201, %c40_202] : memref<2x1x96xf32, #tpu.memory_space<vmem>>, vector<1x1x8xf32>
    %292 = vector.shape_cast %291 : vector<1x1x8xf32> to vector<1x8xf32>
    %293 = vector.broadcast %292 : vector<1x8xf32> to vector<16x8xf32>
    %294 = arith.addf %290, %293 : vector<16x8xf32>
    %c1_203 = arith.constant 1 : index
    %c0_204 = arith.constant 0 : index
    %c72_205 = arith.constant 72 : index
    %295 = vector.load %arg5[%c1_203, %c0_204, %c72_205] : memref<2x32x96xf32, #tpu.memory_space<vmem>>, vector<1x32x8xf32>
    %296 = vector.shape_cast %295 : vector<1x32x8xf32> to vector<32x8xf32>
    %cst_206 = arith.constant dense<0.000000e+00> : vector<16x8xf32>
    %297 = tpu.matmul %240, %296, %cst_206 {dimension_numbers = #tpu.dot_dimension_numbers<[1], [0], [0], [1], [0, 0, 1, 1], [], []>} : vector<16x32xf32>, vector<32x8xf32>, vector<16x8xf32> -> vector<16x8xf32>
    %c1_207 = arith.constant 1 : index
    %c0_208 = arith.constant 0 : index
    %c72_209 = arith.constant 72 : index
    %298 = vector.load %arg6[%c1_207, %c0_208, %c72_209] : memref<2x1x96xf32, #tpu.memory_space<vmem>>, vector<1x1x8xf32>
    %299 = vector.shape_cast %298 : vector<1x1x8xf32> to vector<1x8xf32>
    %300 = vector.broadcast %299 : vector<1x8xf32> to vector<16x8xf32>
    %301 = arith.addf %297, %300 : vector<16x8xf32>
    %cst_210 = arith.constant dense<0.000000e+00> : vector<16x16xf32>
    %302 = tpu.matmul %287, %294, %cst_210 {dimension_numbers = #tpu.dot_dimension_numbers<[1], [1], [0], [0], [0, 0, 1, 0], [], []>} : vector<16x8xf32>, vector<16x8xf32>, vector<16x16xf32> -> vector<16x16xf32>
    %cst_211 = arith.constant 0.353553385 : f32
    %303 = vector.broadcast %cst_211 : f32 to vector<16x16xf32>
    %304 = arith.mulf %302, %303 : vector<16x16xf32>
    %cst_212 = arith.constant dense<0xFF800000> : vector<16xf32>
    %305 = vector.multi_reduction <maximumf>, %304, %cst_212 [1] : vector<16x16xf32> to vector<16xf32>
    %306 = vector.shape_cast %305 : vector<16xf32> to vector<16x1xf32>
    %307 = vector.broadcast %306 : vector<16x1xf32> to vector<16x16xf32>
    %308 = arith.subf %304, %307 : vector<16x16xf32>
    %309 = math.exp %308 : vector<16x16xf32>
    %cst_213 = arith.constant dense<0.000000e+00> : vector<16xf32>
    %310 = vector.multi_reduction <add>, %309, %cst_213 [1] : vector<16x16xf32> to vector<16xf32>
    %311 = vector.shape_cast %310 : vector<16xf32> to vector<16x1xf32>
    %312 = tpu.reciprocal %311 {approx = true} : vector<16x1xf32> -> vector<16x1xf32>
    %313 = vector.broadcast %312 : vector<16x1xf32> to vector<16x16xf32>
    %314 = arith.mulf %309, %313 : vector<16x16xf32>
    %cst_214 = arith.constant dense<0.000000e+00> : vector<16x8xf32>
    %315 = tpu.matmul %314, %301, %cst_214 {dimension_numbers = #tpu.dot_dimension_numbers<[1], [0], [0], [1], [0, 0, 1, 1], [], []>} : vector<16x16xf32>, vector<16x8xf32>, vector<16x8xf32> -> vector<16x8xf32>
    %c1_215 = arith.constant 1 : index
    %c8_216 = arith.constant 8 : index
    %c0_217 = arith.constant 0 : index
    %316 = vector.load %arg7[%c1_215, %c8_216, %c0_217] : memref<2x32x32xf32, #tpu.memory_space<vmem>>, vector<1x8x32xf32>
    %317 = vector.shape_cast %316 : vector<1x8x32xf32> to vector<8x32xf32>
    %cst_218 = arith.constant dense<0.000000e+00> : vector<16x32xf32>
    %318 = tpu.matmul %315, %317, %cst_218 {dimension_numbers = #tpu.dot_dimension_numbers<[1], [0], [0], [1], [0, 0, 1, 1], [], []>} : vector<16x8xf32>, vector<8x32xf32>, vector<16x32xf32> -> vector<16x32xf32>
    %319 = arith.addf %280, %318 : vector<16x32xf32>
    %c1_219 = arith.constant 1 : index
    %c0_220 = arith.constant 0 : index
    %c16_221 = arith.constant 16 : index
    %320 = vector.load %arg5[%c1_219, %c0_220, %c16_221] : memref<2x32x96xf32, #tpu.memory_space<vmem>>, vector<1x32x8xf32>
    %321 = vector.shape_cast %320 : vector<1x32x8xf32> to vector<32x8xf32>
    %cst_222 = arith.constant dense<0.000000e+00> : vector<16x8xf32>
    %322 = tpu.matmul %240, %321, %cst_222 {dimension_numbers = #tpu.dot_dimension_numbers<[1], [0], [0], [1], [0, 0, 1, 1], [], []>} : vector<16x32xf32>, vector<32x8xf32>, vector<16x8xf32> -> vector<16x8xf32>
    %c1_223 = arith.constant 1 : index
    %c0_224 = arith.constant 0 : index
    %c16_225 = arith.constant 16 : index
    %323 = vector.load %arg6[%c1_223, %c0_224, %c16_225] : memref<2x1x96xf32, #tpu.memory_space<vmem>>, vector<1x1x8xf32>
    %324 = vector.shape_cast %323 : vector<1x1x8xf32> to vector<1x8xf32>
    %325 = vector.broadcast %324 : vector<1x8xf32> to vector<16x8xf32>
    %326 = arith.addf %322, %325 : vector<16x8xf32>
    %c1_226 = arith.constant 1 : index
    %c0_227 = arith.constant 0 : index
    %c48_228 = arith.constant 48 : index
    %327 = vector.load %arg5[%c1_226, %c0_227, %c48_228] : memref<2x32x96xf32, #tpu.memory_space<vmem>>, vector<1x32x8xf32>
    %328 = vector.shape_cast %327 : vector<1x32x8xf32> to vector<32x8xf32>
    %cst_229 = arith.constant dense<0.000000e+00> : vector<16x8xf32>
    %329 = tpu.matmul %240, %328, %cst_229 {dimension_numbers = #tpu.dot_dimension_numbers<[1], [0], [0], [1], [0, 0, 1, 1], [], []>} : vector<16x32xf32>, vector<32x8xf32>, vector<16x8xf32> -> vector<16x8xf32>
    %c1_230 = arith.constant 1 : index
    %c0_231 = arith.constant 0 : index
    %c48_232 = arith.constant 48 : index
    %330 = vector.load %arg6[%c1_230, %c0_231, %c48_232] : memref<2x1x96xf32, #tpu.memory_space<vmem>>, vector<1x1x8xf32>
    %331 = vector.shape_cast %330 : vector<1x1x8xf32> to vector<1x8xf32>
    %332 = vector.broadcast %331 : vector<1x8xf32> to vector<16x8xf32>
    %333 = arith.addf %329, %332 : vector<16x8xf32>
    %c1_233 = arith.constant 1 : index
    %c0_234 = arith.constant 0 : index
    %c80_235 = arith.constant 80 : index
    %334 = vector.load %arg5[%c1_233, %c0_234, %c80_235] : memref<2x32x96xf32, #tpu.memory_space<vmem>>, vector<1x32x8xf32>
    %335 = vector.shape_cast %334 : vector<1x32x8xf32> to vector<32x8xf32>
    %cst_236 = arith.constant dense<0.000000e+00> : vector<16x8xf32>
    %336 = tpu.matmul %240, %335, %cst_236 {dimension_numbers = #tpu.dot_dimension_numbers<[1], [0], [0], [1], [0, 0, 1, 1], [], []>} : vector<16x32xf32>, vector<32x8xf32>, vector<16x8xf32> -> vector<16x8xf32>
    %c1_237 = arith.constant 1 : index
    %c0_238 = arith.constant 0 : index
    %c80_239 = arith.constant 80 : index
    %337 = vector.load %arg6[%c1_237, %c0_238, %c80_239] : memref<2x1x96xf32, #tpu.memory_space<vmem>>, vector<1x1x8xf32>
    %338 = vector.shape_cast %337 : vector<1x1x8xf32> to vector<1x8xf32>
    %339 = vector.broadcast %338 : vector<1x8xf32> to vector<16x8xf32>
    %340 = arith.addf %336, %339 : vector<16x8xf32>
    %cst_240 = arith.constant dense<0.000000e+00> : vector<16x16xf32>
    %341 = tpu.matmul %326, %333, %cst_240 {dimension_numbers = #tpu.dot_dimension_numbers<[1], [1], [0], [0], [0, 0, 1, 0], [], []>} : vector<16x8xf32>, vector<16x8xf32>, vector<16x16xf32> -> vector<16x16xf32>
    %cst_241 = arith.constant 0.353553385 : f32
    %342 = vector.broadcast %cst_241 : f32 to vector<16x16xf32>
    %343 = arith.mulf %341, %342 : vector<16x16xf32>
    %cst_242 = arith.constant dense<0xFF800000> : vector<16xf32>
    %344 = vector.multi_reduction <maximumf>, %343, %cst_242 [1] : vector<16x16xf32> to vector<16xf32>
    %345 = vector.shape_cast %344 : vector<16xf32> to vector<16x1xf32>
    %346 = vector.broadcast %345 : vector<16x1xf32> to vector<16x16xf32>
    %347 = arith.subf %343, %346 : vector<16x16xf32>
    %348 = math.exp %347 : vector<16x16xf32>
    %cst_243 = arith.constant dense<0.000000e+00> : vector<16xf32>
    %349 = vector.multi_reduction <add>, %348, %cst_243 [1] : vector<16x16xf32> to vector<16xf32>
    %350 = vector.shape_cast %349 : vector<16xf32> to vector<16x1xf32>
    %351 = tpu.reciprocal %350 {approx = true} : vector<16x1xf32> -> vector<16x1xf32>
    %352 = vector.broadcast %351 : vector<16x1xf32> to vector<16x16xf32>
    %353 = arith.mulf %348, %352 : vector<16x16xf32>
    %cst_244 = arith.constant dense<0.000000e+00> : vector<16x8xf32>
    %354 = tpu.matmul %353, %340, %cst_244 {dimension_numbers = #tpu.dot_dimension_numbers<[1], [0], [0], [1], [0, 0, 1, 1], [], []>} : vector<16x16xf32>, vector<16x8xf32>, vector<16x8xf32> -> vector<16x8xf32>
    %c1_245 = arith.constant 1 : index
    %c16_246 = arith.constant 16 : index
    %c0_247 = arith.constant 0 : index
    %355 = vector.load %arg7[%c1_245, %c16_246, %c0_247] : memref<2x32x32xf32, #tpu.memory_space<vmem>>, vector<1x8x32xf32>
    %356 = vector.shape_cast %355 : vector<1x8x32xf32> to vector<8x32xf32>
    %cst_248 = arith.constant dense<0.000000e+00> : vector<16x32xf32>
    %357 = tpu.matmul %354, %356, %cst_248 {dimension_numbers = #tpu.dot_dimension_numbers<[1], [0], [0], [1], [0, 0, 1, 1], [], []>} : vector<16x8xf32>, vector<8x32xf32>, vector<16x32xf32> -> vector<16x32xf32>
    %358 = arith.addf %319, %357 : vector<16x32xf32>
    %c1_249 = arith.constant 1 : index
    %c0_250 = arith.constant 0 : index
    %c24_251 = arith.constant 24 : index
    %359 = vector.load %arg5[%c1_249, %c0_250, %c24_251] : memref<2x32x96xf32, #tpu.memory_space<vmem>>, vector<1x32x8xf32>
    %360 = vector.shape_cast %359 : vector<1x32x8xf32> to vector<32x8xf32>
    %cst_252 = arith.constant dense<0.000000e+00> : vector<16x8xf32>
    %361 = tpu.matmul %240, %360, %cst_252 {dimension_numbers = #tpu.dot_dimension_numbers<[1], [0], [0], [1], [0, 0, 1, 1], [], []>} : vector<16x32xf32>, vector<32x8xf32>, vector<16x8xf32> -> vector<16x8xf32>
    %c1_253 = arith.constant 1 : index
    %c0_254 = arith.constant 0 : index
    %c24_255 = arith.constant 24 : index
    %362 = vector.load %arg6[%c1_253, %c0_254, %c24_255] : memref<2x1x96xf32, #tpu.memory_space<vmem>>, vector<1x1x8xf32>
    %363 = vector.shape_cast %362 : vector<1x1x8xf32> to vector<1x8xf32>
    %364 = vector.broadcast %363 : vector<1x8xf32> to vector<16x8xf32>
    %365 = arith.addf %361, %364 : vector<16x8xf32>
    %c1_256 = arith.constant 1 : index
    %c0_257 = arith.constant 0 : index
    %c56_258 = arith.constant 56 : index
    %366 = vector.load %arg5[%c1_256, %c0_257, %c56_258] : memref<2x32x96xf32, #tpu.memory_space<vmem>>, vector<1x32x8xf32>
    %367 = vector.shape_cast %366 : vector<1x32x8xf32> to vector<32x8xf32>
    %cst_259 = arith.constant dense<0.000000e+00> : vector<16x8xf32>
    %368 = tpu.matmul %240, %367, %cst_259 {dimension_numbers = #tpu.dot_dimension_numbers<[1], [0], [0], [1], [0, 0, 1, 1], [], []>} : vector<16x32xf32>, vector<32x8xf32>, vector<16x8xf32> -> vector<16x8xf32>
    %c1_260 = arith.constant 1 : index
    %c0_261 = arith.constant 0 : index
    %c56_262 = arith.constant 56 : index
    %369 = vector.load %arg6[%c1_260, %c0_261, %c56_262] : memref<2x1x96xf32, #tpu.memory_space<vmem>>, vector<1x1x8xf32>
    %370 = vector.shape_cast %369 : vector<1x1x8xf32> to vector<1x8xf32>
    %371 = vector.broadcast %370 : vector<1x8xf32> to vector<16x8xf32>
    %372 = arith.addf %368, %371 : vector<16x8xf32>
    %c1_263 = arith.constant 1 : index
    %c0_264 = arith.constant 0 : index
    %c88_265 = arith.constant 88 : index
    %373 = vector.load %arg5[%c1_263, %c0_264, %c88_265] : memref<2x32x96xf32, #tpu.memory_space<vmem>>, vector<1x32x8xf32>
    %374 = vector.shape_cast %373 : vector<1x32x8xf32> to vector<32x8xf32>
    %cst_266 = arith.constant dense<0.000000e+00> : vector<16x8xf32>
    %375 = tpu.matmul %240, %374, %cst_266 {dimension_numbers = #tpu.dot_dimension_numbers<[1], [0], [0], [1], [0, 0, 1, 1], [], []>} : vector<16x32xf32>, vector<32x8xf32>, vector<16x8xf32> -> vector<16x8xf32>
    %c1_267 = arith.constant 1 : index
    %c0_268 = arith.constant 0 : index
    %c88_269 = arith.constant 88 : index
    %376 = vector.load %arg6[%c1_267, %c0_268, %c88_269] : memref<2x1x96xf32, #tpu.memory_space<vmem>>, vector<1x1x8xf32>
    %377 = vector.shape_cast %376 : vector<1x1x8xf32> to vector<1x8xf32>
    %378 = vector.broadcast %377 : vector<1x8xf32> to vector<16x8xf32>
    %379 = arith.addf %375, %378 : vector<16x8xf32>
    %cst_270 = arith.constant dense<0.000000e+00> : vector<16x16xf32>
    %380 = tpu.matmul %365, %372, %cst_270 {dimension_numbers = #tpu.dot_dimension_numbers<[1], [1], [0], [0], [0, 0, 1, 0], [], []>} : vector<16x8xf32>, vector<16x8xf32>, vector<16x16xf32> -> vector<16x16xf32>
    %cst_271 = arith.constant 0.353553385 : f32
    %381 = vector.broadcast %cst_271 : f32 to vector<16x16xf32>
    %382 = arith.mulf %380, %381 : vector<16x16xf32>
    %cst_272 = arith.constant dense<0xFF800000> : vector<16xf32>
    %383 = vector.multi_reduction <maximumf>, %382, %cst_272 [1] : vector<16x16xf32> to vector<16xf32>
    %384 = vector.shape_cast %383 : vector<16xf32> to vector<16x1xf32>
    %385 = vector.broadcast %384 : vector<16x1xf32> to vector<16x16xf32>
    %386 = arith.subf %382, %385 : vector<16x16xf32>
    %387 = math.exp %386 : vector<16x16xf32>
    %cst_273 = arith.constant dense<0.000000e+00> : vector<16xf32>
    %388 = vector.multi_reduction <add>, %387, %cst_273 [1] : vector<16x16xf32> to vector<16xf32>
    %389 = vector.shape_cast %388 : vector<16xf32> to vector<16x1xf32>
    %390 = tpu.reciprocal %389 {approx = true} : vector<16x1xf32> -> vector<16x1xf32>
    %391 = vector.broadcast %390 : vector<16x1xf32> to vector<16x16xf32>
    %392 = arith.mulf %387, %391 : vector<16x16xf32>
    %cst_274 = arith.constant dense<0.000000e+00> : vector<16x8xf32>
    %393 = tpu.matmul %392, %379, %cst_274 {dimension_numbers = #tpu.dot_dimension_numbers<[1], [0], [0], [1], [0, 0, 1, 1], [], []>} : vector<16x16xf32>, vector<16x8xf32>, vector<16x8xf32> -> vector<16x8xf32>
    %c1_275 = arith.constant 1 : index
    %c24_276 = arith.constant 24 : index
    %c0_277 = arith.constant 0 : index
    %394 = vector.load %arg7[%c1_275, %c24_276, %c0_277] : memref<2x32x32xf32, #tpu.memory_space<vmem>>, vector<1x8x32xf32>
    %395 = vector.shape_cast %394 : vector<1x8x32xf32> to vector<8x32xf32>
    %cst_278 = arith.constant dense<0.000000e+00> : vector<16x32xf32>
    %396 = tpu.matmul %393, %395, %cst_278 {dimension_numbers = #tpu.dot_dimension_numbers<[1], [0], [0], [1], [0, 0, 1, 1], [], []>} : vector<16x8xf32>, vector<8x32xf32>, vector<16x32xf32> -> vector<16x32xf32>
    %397 = arith.addf %358, %396 : vector<16x32xf32>
    %c1_279 = arith.constant 1 : index
    %c0_280 = arith.constant 0 : index
    %c0_281 = arith.constant 0 : index
    %398 = vector.load %arg8[%c1_279, %c0_280, %c0_281] : memref<2x1x32xf32, #tpu.memory_space<vmem>>, vector<1x1x32xf32>
    %399 = vector.shape_cast %398 : vector<1x1x32xf32> to vector<1x32xf32>
    %400 = vector.broadcast %399 : vector<1x32xf32> to vector<16x32xf32>
    %401 = arith.addf %397, %400 : vector<16x32xf32>
    %402 = arith.addf %401, %240 : vector<16x32xf32>
    %c1_282 = arith.constant 1 : index
    %c0_283 = arith.constant 0 : index
    %c0_284 = arith.constant 0 : index
    %403 = vector.load %arg9[%c1_282, %c0_283, %c0_284] : memref<2x1x32xf32, #tpu.memory_space<vmem>>, vector<1x1x32xf32>
    %404 = vector.shape_cast %403 : vector<1x1x32xf32> to vector<1x32xf32>
    %c1_285 = arith.constant 1 : index
    %c0_286 = arith.constant 0 : index
    %c0_287 = arith.constant 0 : index
    %405 = vector.load %arg10[%c1_285, %c0_286, %c0_287] : memref<2x1x32xf32, #tpu.memory_space<vmem>>, vector<1x1x32xf32>
    %406 = vector.shape_cast %405 : vector<1x1x32xf32> to vector<1x32xf32>
    %cst_288 = arith.constant dense<0.000000e+00> : vector<16xf32>
    %407 = vector.multi_reduction <add>, %402, %cst_288 [1] : vector<16x32xf32> to vector<16xf32>
    %408 = vector.shape_cast %407 : vector<16xf32> to vector<16x1xf32>
    %cst_289 = arith.constant 3.200000e+01 : f32
    %409 = vector.broadcast %cst_289 : f32 to vector<16x1xf32>
    %410 = arith.divf %408, %409 : vector<16x1xf32>
    %411 = vector.broadcast %410 : vector<16x1xf32> to vector<16x32xf32>
    %412 = arith.subf %402, %411 : vector<16x32xf32>
    %413 = arith.mulf %412, %412 : vector<16x32xf32>
    %cst_290 = arith.constant dense<0.000000e+00> : vector<16xf32>
    %414 = vector.multi_reduction <add>, %413, %cst_290 [1] : vector<16x32xf32> to vector<16xf32>
    %415 = vector.shape_cast %414 : vector<16xf32> to vector<16x1xf32>
    %cst_291 = arith.constant 3.200000e+01 : f32
    %416 = vector.broadcast %cst_291 : f32 to vector<16x1xf32>
    %417 = arith.divf %415, %416 : vector<16x1xf32>
    %418 = vector.broadcast %410 : vector<16x1xf32> to vector<16x32xf32>
    %419 = arith.subf %402, %418 : vector<16x32xf32>
    %cst_292 = arith.constant 9.99999974E-6 : f32
    %420 = vector.broadcast %cst_292 : f32 to vector<16x1xf32>
    %421 = arith.addf %417, %420 : vector<16x1xf32>
    %422 = math.rsqrt %421 : vector<16x1xf32>
    %423 = vector.broadcast %422 : vector<16x1xf32> to vector<16x32xf32>
    %424 = arith.mulf %419, %423 : vector<16x32xf32>
    %425 = vector.broadcast %404 : vector<1x32xf32> to vector<16x32xf32>
    %426 = arith.mulf %424, %425 : vector<16x32xf32>
    %427 = vector.broadcast %406 : vector<1x32xf32> to vector<16x32xf32>
    %428 = arith.addf %426, %427 : vector<16x32xf32>
    %c1_293 = arith.constant 1 : index
    %c0_294 = arith.constant 0 : index
    %c0_295 = arith.constant 0 : index
    %429 = vector.load %arg11[%c1_293, %c0_294, %c0_295] : memref<2x32x64xf32, #tpu.memory_space<vmem>>, vector<1x32x64xf32>
    %430 = vector.shape_cast %429 : vector<1x32x64xf32> to vector<32x64xf32>
    %cst_296 = arith.constant dense<0.000000e+00> : vector<16x64xf32>
    %431 = tpu.matmul %428, %430, %cst_296 {dimension_numbers = #tpu.dot_dimension_numbers<[1], [0], [0], [1], [0, 0, 1, 1], [], []>} : vector<16x32xf32>, vector<32x64xf32>, vector<16x64xf32> -> vector<16x64xf32>
    %c1_297 = arith.constant 1 : index
    %c0_298 = arith.constant 0 : index
    %c0_299 = arith.constant 0 : index
    %432 = vector.load %arg12[%c1_297, %c0_298, %c0_299] : memref<2x1x64xf32, #tpu.memory_space<vmem>>, vector<1x1x64xf32>
    %433 = vector.shape_cast %432 : vector<1x1x64xf32> to vector<1x64xf32>
    %434 = vector.broadcast %433 : vector<1x64xf32> to vector<16x64xf32>
    %435 = arith.addf %431, %434 : vector<16x64xf32>
    %cst_300 = arith.constant 0.000000e+00 : f32
    %436 = vector.broadcast %cst_300 : f32 to vector<16x64xf32>
    %437 = arith.maximumf %435, %436 : vector<16x64xf32>
    %c1_301 = arith.constant 1 : index
    %c0_302 = arith.constant 0 : index
    %c0_303 = arith.constant 0 : index
    %438 = vector.load %arg13[%c1_301, %c0_302, %c0_303] : memref<2x64x32xf32, #tpu.memory_space<vmem>>, vector<1x64x32xf32>
    %439 = vector.shape_cast %438 : vector<1x64x32xf32> to vector<64x32xf32>
    %cst_304 = arith.constant dense<0.000000e+00> : vector<16x32xf32>
    %440 = tpu.matmul %437, %439, %cst_304 {dimension_numbers = #tpu.dot_dimension_numbers<[1], [0], [0], [1], [0, 0, 1, 1], [], []>} : vector<16x64xf32>, vector<64x32xf32>, vector<16x32xf32> -> vector<16x32xf32>
    %c1_305 = arith.constant 1 : index
    %c0_306 = arith.constant 0 : index
    %c0_307 = arith.constant 0 : index
    %441 = vector.load %arg14[%c1_305, %c0_306, %c0_307] : memref<2x1x32xf32, #tpu.memory_space<vmem>>, vector<1x1x32xf32>
    %442 = vector.shape_cast %441 : vector<1x1x32xf32> to vector<1x32xf32>
    %443 = vector.broadcast %442 : vector<1x32xf32> to vector<16x32xf32>
    %444 = arith.addf %440, %443 : vector<16x32xf32>
    %445 = arith.addf %444, %428 : vector<16x32xf32>
    %c1_308 = arith.constant 1 : index
    %c0_309 = arith.constant 0 : index
    %c0_310 = arith.constant 0 : index
    %446 = vector.load %arg15[%c1_308, %c0_309, %c0_310] : memref<2x1x32xf32, #tpu.memory_space<vmem>>, vector<1x1x32xf32>
    %447 = vector.shape_cast %446 : vector<1x1x32xf32> to vector<1x32xf32>
    %c1_311 = arith.constant 1 : index
    %c0_312 = arith.constant 0 : index
    %c0_313 = arith.constant 0 : index
    %448 = vector.load %arg16[%c1_311, %c0_312, %c0_313] : memref<2x1x32xf32, #tpu.memory_space<vmem>>, vector<1x1x32xf32>
    %449 = vector.shape_cast %448 : vector<1x1x32xf32> to vector<1x32xf32>
    %cst_314 = arith.constant dense<0.000000e+00> : vector<16xf32>
    %450 = vector.multi_reduction <add>, %445, %cst_314 [1] : vector<16x32xf32> to vector<16xf32>
    %451 = vector.shape_cast %450 : vector<16xf32> to vector<16x1xf32>
    %cst_315 = arith.constant 3.200000e+01 : f32
    %452 = vector.broadcast %cst_315 : f32 to vector<16x1xf32>
    %453 = arith.divf %451, %452 : vector<16x1xf32>
    %454 = vector.broadcast %453 : vector<16x1xf32> to vector<16x32xf32>
    %455 = arith.subf %445, %454 : vector<16x32xf32>
    %456 = arith.mulf %455, %455 : vector<16x32xf32>
    %cst_316 = arith.constant dense<0.000000e+00> : vector<16xf32>
    %457 = vector.multi_reduction <add>, %456, %cst_316 [1] : vector<16x32xf32> to vector<16xf32>
    %458 = vector.shape_cast %457 : vector<16xf32> to vector<16x1xf32>
    %cst_317 = arith.constant 3.200000e+01 : f32
    %459 = vector.broadcast %cst_317 : f32 to vector<16x1xf32>
    %460 = arith.divf %458, %459 : vector<16x1xf32>
    %461 = vector.broadcast %453 : vector<16x1xf32> to vector<16x32xf32>
    %462 = arith.subf %445, %461 : vector<16x32xf32>
    %cst_318 = arith.constant 9.99999974E-6 : f32
    %463 = vector.broadcast %cst_318 : f32 to vector<16x1xf32>
    %464 = arith.addf %460, %463 : vector<16x1xf32>
    %465 = math.rsqrt %464 : vector<16x1xf32>
    %466 = vector.broadcast %465 : vector<16x1xf32> to vector<16x32xf32>
    %467 = arith.mulf %462, %466 : vector<16x32xf32>
    %468 = vector.broadcast %447 : vector<1x32xf32> to vector<16x32xf32>
    %469 = arith.mulf %467, %468 : vector<16x32xf32>
    %470 = vector.broadcast %449 : vector<1x32xf32> to vector<16x32xf32>
    %471 = arith.addf %469, %470 : vector<16x32xf32>
    %cst_319 = arith.constant dense<0.000000e+00> : vector<32xf32>
    %472 = vector.multi_reduction <add>, %471, %cst_319 [0] : vector<16x32xf32> to vector<32xf32>
    %473 = vector.shape_cast %472 : vector<32xf32> to vector<1x32xf32>
    %cst_320 = arith.constant 1.600000e+01 : f32
    %474 = vector.broadcast %cst_320 : f32 to vector<1x32xf32>
    %475 = arith.divf %473, %474 : vector<1x32xf32>
    %c0_321 = arith.constant 0 : index
    %c0_322 = arith.constant 0 : index
    %476 = vector.load %arg17[%c0_321, %c0_322] : memref<32x32xf32, #tpu.memory_space<vmem>>, vector<32x32xf32>
    %cst_323 = arith.constant dense<0.000000e+00> : vector<1x32xf32>
    %477 = tpu.matmul %475, %476, %cst_323 {dimension_numbers = #tpu.dot_dimension_numbers<[1], [0], [0], [1], [0, 0, 1, 1], [], []>} : vector<1x32xf32>, vector<32x32xf32>, vector<1x32xf32> -> vector<1x32xf32>
    %c0_324 = arith.constant 0 : index
    %c0_325 = arith.constant 0 : index
    %478 = vector.load %arg18[%c0_324, %c0_325] : memref<1x32xf32, #tpu.memory_space<vmem>>, vector<1x32xf32>
    %479 = arith.addf %477, %478 : vector<1x32xf32>
    %cst_326 = arith.constant 0.000000e+00 : f32
    %480 = vector.broadcast %cst_326 : f32 to vector<1x32xf32>
    %481 = arith.maximumf %479, %480 : vector<1x32xf32>
    %c0_327 = arith.constant 0 : index
    %c0_328 = arith.constant 0 : index
    %482 = vector.load %arg19[%c0_327, %c0_328] : memref<32x10xf32, #tpu.memory_space<vmem>>, vector<32x10xf32>
    %cst_329 = arith.constant dense<0.000000e+00> : vector<1x10xf32>
    %483 = tpu.matmul %481, %482, %cst_329 {dimension_numbers = #tpu.dot_dimension_numbers<[1], [0], [0], [1], [0, 0, 1, 1], [], []>} : vector<1x32xf32>, vector<32x10xf32>, vector<1x10xf32> -> vector<1x10xf32>
    %c0_330 = arith.constant 0 : index
    %c0_331 = arith.constant 0 : index
    %484 = vector.load %arg20[%c0_330, %c0_331] : memref<1x10xf32, #tpu.memory_space<vmem>>, vector<1x10xf32>
    %485 = arith.addf %483, %484 : vector<1x10xf32>
    %c0_332 = arith.constant 0 : index
    %c0_333 = arith.constant 0 : index
    %c0_334 = arith.constant 0 : index
    %486 = vector.load %arg21[%c0_332, %c0_333, %c0_334] : memref<1x1x10xf32, #tpu.memory_space<vmem>>, vector<1x1x10xf32>
    %487 = vector.shape_cast %486 : vector<1x1x10xf32> to vector<1x10xf32>
    %488 = vector.shape_cast %485 : vector<1x10xf32> to vector<1x1x10xf32>
    tpu.vector_store %arg21[%c0_332, %c0_333, %c0_334], %488 {strides = array<i32>} : memref<1x1x10xf32, #tpu.memory_space<vmem>>, vector<1x1x10xf32>,
    return
  }
  func.func @transform_0(%arg0: i32) -> (i32, i32, i32) {
    %c0_i32 = arith.constant 0 : i32
    %c0_i32_0 = arith.constant 0 : i32
    %c0_i32_1 = arith.constant 0 : i32
    return %arg0, %c0_i32, %c0_i32_0 : i32, i32, i32
  }
  func.func @transform_1(%arg0: i32) -> (i32, i32, i32) {
    %c0_i32 = arith.constant 0 : i32
    %c0_i32_0 = arith.constant 0 : i32
    %c0_i32_1 = arith.constant 0 : i32
    %c0_i32_2 = arith.constant 0 : i32
    return %c0_i32, %c0_i32_0, %c0_i32_1 : i32, i32, i32
  }
  func.func @transform_2(%arg0: i32) -> (i32, i32) {
    %c0_i32 = arith.constant 0 : i32
    %c0_i32_0 = arith.constant 0 : i32
    %c0_i32_1 = arith.constant 0 : i32
    return %c0_i32, %c0_i32_0 : i32, i32
  }
  func.func @transform_3(%arg0: i32) -> (i32, i32) {
    %c0_i32 = arith.constant 0 : i32
    %c0_i32_0 = arith.constant 0 : i32
    %c0_i32_1 = arith.constant 0 : i32
    return %c0_i32, %c0_i32_0 : i32, i32
  }
  func.func @transform_4(%arg0: i32) -> (i32, i32, i32) {
    %c0_i32 = arith.constant 0 : i32
    %c0_i32_0 = arith.constant 0 : i32
    %c0_i32_1 = arith.constant 0 : i32
    %c0_i32_2 = arith.constant 0 : i32
    return %c0_i32, %c0_i32_0, %c0_i32_1 : i32, i32, i32
  }
  func.func @transform_5(%arg0: i32) -> (i32, i32, i32) {
    %c0_i32 = arith.constant 0 : i32
    %c0_i32_0 = arith.constant 0 : i32
    %c0_i32_1 = arith.constant 0 : i32
    %c0_i32_2 = arith.constant 0 : i32
    return %c0_i32, %c0_i32_0, %c0_i32_1 : i32, i32, i32
  }
  func.func @transform_6(%arg0: i32) -> (i32, i32, i32) {
    %c0_i32 = arith.constant 0 : i32
    %c0_i32_0 = arith.constant 0 : i32
    %c0_i32_1 = arith.constant 0 : i32
    %c0_i32_2 = arith.constant 0 : i32
    return %c0_i32, %c0_i32_0, %c0_i32_1 : i32, i32, i32
  }
  func.func @transform_7(%arg0: i32) -> (i32, i32, i32) {
    %c0_i32 = arith.constant 0 : i32
    %c0_i32_0 = arith.constant 0 : i32
    %c0_i32_1 = arith.constant 0 : i32
    %c0_i32_2 = arith.constant 0 : i32
    return %c0_i32, %c0_i32_0, %c0_i32_1 : i32, i32, i32
  }
  func.func @transform_8(%arg0: i32) -> (i32, i32, i32) {
    %c0_i32 = arith.constant 0 : i32
    %c0_i32_0 = arith.constant 0 : i32
    %c0_i32_1 = arith.constant 0 : i32
    %c0_i32_2 = arith.constant 0 : i32
    return %c0_i32, %c0_i32_0, %c0_i32_1 : i32, i32, i32
  }
  func.func @transform_9(%arg0: i32) -> (i32, i32, i32) {
    %c0_i32 = arith.constant 0 : i32
    %c0_i32_0 = arith.constant 0 : i32
    %c0_i32_1 = arith.constant 0 : i32
    %c0_i32_2 = arith.constant 0 : i32
    return %c0_i32, %c0_i32_0, %c0_i32_1 : i32, i32, i32
  }
  func.func @transform_10(%arg0: i32) -> (i32, i32, i32) {
    %c0_i32 = arith.constant 0 : i32
    %c0_i32_0 = arith.constant 0 : i32
    %c0_i32_1 = arith.constant 0 : i32
    %c0_i32_2 = arith.constant 0 : i32
    return %c0_i32, %c0_i32_0, %c0_i32_1 : i32, i32, i32
  }
  func.func @transform_11(%arg0: i32) -> (i32, i32, i32) {
    %c0_i32 = arith.constant 0 : i32
    %c0_i32_0 = arith.constant 0 : i32
    %c0_i32_1 = arith.constant 0 : i32
    %c0_i32_2 = arith.constant 0 : i32
    return %c0_i32, %c0_i32_0, %c0_i32_1 : i32, i32, i32
  }
  func.func @transform_12(%arg0: i32) -> (i32, i32, i32) {
    %c0_i32 = arith.constant 0 : i32
    %c0_i32_0 = arith.constant 0 : i32
    %c0_i32_1 = arith.constant 0 : i32
    %c0_i32_2 = arith.constant 0 : i32
    return %c0_i32, %c0_i32_0, %c0_i32_1 : i32, i32, i32
  }
  func.func @transform_13(%arg0: i32) -> (i32, i32, i32) {
    %c0_i32 = arith.constant 0 : i32
    %c0_i32_0 = arith.constant 0 : i32
    %c0_i32_1 = arith.constant 0 : i32
    %c0_i32_2 = arith.constant 0 : i32
    return %c0_i32, %c0_i32_0, %c0_i32_1 : i32, i32, i32
  }
  func.func @transform_14(%arg0: i32) -> (i32, i32, i32) {
    %c0_i32 = arith.constant 0 : i32
    %c0_i32_0 = arith.constant 0 : i32
    %c0_i32_1 = arith.constant 0 : i32
    %c0_i32_2 = arith.constant 0 : i32
    return %c0_i32, %c0_i32_0, %c0_i32_1 : i32, i32, i32
  }
  func.func @transform_15(%arg0: i32) -> (i32, i32, i32) {
    %c0_i32 = arith.constant 0 : i32
    %c0_i32_0 = arith.constant 0 : i32
    %c0_i32_1 = arith.constant 0 : i32
    %c0_i32_2 = arith.constant 0 : i32
    return %c0_i32, %c0_i32_0, %c0_i32_1 : i32, i32, i32
  }
  func.func @transform_16(%arg0: i32) -> (i32, i32) {
    %c0_i32 = arith.constant 0 : i32
    %c0_i32_0 = arith.constant 0 : i32
    %c0_i32_1 = arith.constant 0 : i32
    return %c0_i32, %c0_i32_0 : i32, i32
  }
  func.func @transform_17(%arg0: i32) -> (i32, i32) {
    %c0_i32 = arith.constant 0 : i32
    %c0_i32_0 = arith.constant 0 : i32
    %c0_i32_1 = arith.constant 0 : i32
    return %c0_i32, %c0_i32_0 : i32, i32
  }
  func.func @transform_18(%arg0: i32) -> (i32, i32) {
    %c0_i32 = arith.constant 0 : i32
    %c0_i32_0 = arith.constant 0 : i32
    %c0_i32_1 = arith.constant 0 : i32
    return %c0_i32, %c0_i32_0 : i32, i32
  }
  func.func @transform_19(%arg0: i32) -> (i32, i32) {
    %c0_i32 = arith.constant 0 : i32
    %c0_i32_0 = arith.constant 0 : i32
    %c0_i32_1 = arith.constant 0 : i32
    return %c0_i32, %c0_i32_0 : i32, i32
  }
  func.func @transform_20(%arg0: i32) -> (i32, i32, i32) {
    %c0_i32 = arith.constant 0 : i32
    %c0_i32_0 = arith.constant 0 : i32
    %c0_i32_1 = arith.constant 0 : i32
    return %arg0, %c0_i32, %c0_i32_0 : i32, i32, i32
  }
}

</mosaic_0001>

<bundles_post_ra>
// kernel: face_rwkv_forward.1
= control target key start
LH: loop header
LB: loop body
LE: loop exit
PB: predicated region body
PF: predicated region fallthrough
CT: control target
= control target key end

     0   :  { %s8102_s0 = inlined_call_operand.vmem [shape: f32[2,16,48], index: 0, kind: input, shape index: {}]   ;;  %s8103_s1 = inlined_call_operand.vmem [shape: f32[1,16,32], index: 1, kind: input, shape index: {}]   ;;  %s8104_s2 = inlined_call_operand.vmem [shape: f32[48,32], index: 2, kind: input, shape index: {}]   ;;  %s8105_s3 = inlined_call_operand.vmem [shape: f32[1,32], index: 3, kind: input, shape index: {}]   ;;  %s8106_s4 = inlined_call_operand.vmem [shape: f32[2,32,96], index: 4, kind: input, shape index: {}]   ;;  %s8107_s5 = inlined_call_operand.vmem [shape: f32[2,1,96], index: 5, kind: input, shape index: {}]   ;;  %s8108_s6 = inlined_call_operand.vmem [shape: f32[2,32,32], index: 6, kind: input, shape index: {}]   ;;  %s8109_s7 = inlined_call_operand.vmem [shape: f32[2,1,32], index: 7, kind: input, shape index: {}]   ;;  %s8110_s8 = inlined_call_operand.vmem [shape: f32[2,1,32], index: 8, kind: input, shape index: {}]   ;;  %s8111_s9 = inlined_call_operand.vmem [shape: f32[2,1,32], index: 9, kind: input, shape index: {}]   ;;  %s8112_s10 = inlined_call_operand.vmem [shape: f32[2,32,64], index: 10, kind: input, shape index: {}]   ;;  %s8113_s11 = inlined_call_operand.vmem [shape: f32[2,1,64], index: 11, kind: input, shape index: {}]   ;;  %s8114_s12 = inlined_call_operand.vmem [shape: f32[2,64,32], index: 12, kind: input, shape index: {}]   ;;  %s8115_s13 = inlined_call_operand.vmem [shape: f32[2,1,32], index: 13, kind: input, shape index: {}]   ;;  %s8116_s14 = inlined_call_operand.vmem [shape: f32[2,1,32], index: 14, kind: input, shape index: {}]   ;;  %s8117_s15 = inlined_call_operand.vmem [shape: f32[2,1,32], index: 15, kind: input, shape index: {}]   ;;  %s8118_s16 = inlined_call_operand.vmem [shape: f32[32,32], index: 16, kind: input, shape index: {}]   ;;  %s8119_s17 = inlined_call_operand.vmem [shape: f32[1,32], index: 17, kind: input, shape index: {}]   ;;  %s8120_s18 = inlined_call_operand.vmem [shape: f32[32,10], index: 18, kind: input, shape index: {}]   ;;  %s8121_s19 = inlined_call_operand.vmem [shape: f32[1,10], index: 19, kind: input, shape index: {}]   ;;  %s8122_s20 = inlined_call_operand.hbm [shape: f32[2,1,10], index: 20, kind: output, shape index: {}]  }
   0x1   :  { %8153 = sst [smem:[#allocation11_spill]] %s8102_s0 }
   0x2   :  { %8154 = sst [smem:[#allocation12_spill]] %s8103_s1 }
   0x3   :  { %8155 = sst [smem:[#allocation13_spill]] %s8104_s2 }
   0x4   :  { %8156 = sst [smem:[#allocation14_spill]] %s8105_s3 }
   0x5   :  { %8157 = sst [smem:[#allocation15_spill]] %s8106_s4 }
   0x6   :  { %8158 = sst [smem:[#allocation16_spill]] %s8107_s5 }
   0x7   :  { %8159 = sst [smem:[#allocation17_spill]] %s8108_s6 }
   0x8   :  { %8160 = sst [smem:[#allocation18_spill]] %s8109_s7 }
   0x9   :  { %8161 = sst [smem:[#allocation19_spill]] %s8122_s20 }
   0xa   :  { %25 = vsyncpa [#allocation3], 0 }
   0xb   :  { %27 = vsyncpa [#allocation3 + $0x1], 0  ;;  %s7224_s1 = smov 0   ;;  %s7226_s22 = smov 0  }
   0xc   :  { %s7228_s23 = smov 0   ;;  %s7230_s24 = smov 0  }
   0xd LB: > { %8162 = sst [smem:[#allocation5_spill]] %s7091_s1  ;;  %s7245_s2 = sadd.s32 4294967295, %s7103_s24   ;;  %s7103_s24 = sphi %s7230_s24, %s8194_s24   ;;  %s7099_s23 = sphi %s7228_s23, %s8196_s23   ;;  %s7095_s22 = sphi %s7226_s22, %s8198_s22   ;;  %s7091_s1 = sphi %s7224_s1, %s8197_s1  }
   0xe   : > { %8163 = sst [smem:[#allocation6_spill]] %s7099_s23  ;;  %s5937_s25 = sadd.s32 4294967294, %s7103_s24  }
   0xf   : > { %8164 = sst [smem:[#allocation7_spill]] %s7103_s24  ;;  %s7249_s3 = sadd.s32 1, %s7103_s24  }
  0x10   : > { %8165 = sst [smem:[#allocation8_spill]] %s7249_s3  ;;  %s465_s26 = sadd.s32 1, %s7099_s23 }
  0x11   : > { %s462_s27 = ssub.s32 %s7103_s24, %s7249_s3  ;;  %p475_p0 = scmp.ne.s32.totalorder %s7099_s23, %s7095_s22 }
  0x12   : > { %p463_p1 = scmp.eq.s32.totalorder %s462_s27, 0  ;;  %p476_p2 = scmp.eq.s32.totalorder %s7245_s2, 1 }
  0x13   : > { %p481_p3 = scmp.ne.s32.totalorder %s7095_s22, %s7091_s1  ;;  %p482_p4 = scmp.eq.s32.totalorder %s5937_s25, 1 }
  0x14   : > { %s7260_s28 = scalar_select %p463_p1, %s7099_s23, %s465_s26  }
  0x15   : > { %p7262_p5 = por %p476_p2, %p475_p0  ;;  %p7266_p6 = por %p482_p4, %p481_p3 }
  0x16   : > { %8166 = sst [smem:[#allocation9_spill]] %s7260_s28  ;;  %p5940_p7 = scmp.ge.s32.totalorder %s7103_s24, 1 }
  0x17   : > { %s8168_s29 = scalar_select %p7266_p6, 1, 0 }
  0x18   : > { %p565_p8 = scmp.lt.s32.totalorder %s7103_s24, 3 }
  0x19   : > { %8169 = sst [smem:[#allocation10_spill]] %s8168_s29 }
  0x1a   : > { %p566_p9 = pnand %p5940_p7, %p565_p8 }
  0x1b   : > { %s8170_s21 = sld [smem:[#allocation13_spill]] (!%p566_p9)  ;;  %p622_p10 = scmp.lt.s32.totalorder (!%p566_p9), %s7245_s2, 1 }
  0x1c   : > { %569 = sbr.rel (%p566_p9) target bundleno = 10052 (0x2744), region = 100  ;;  %s8171_s1 = sld [smem:[#allocation15_spill]] (!%p566_p9) }
  0x1d   : > { %s8133_s25 = smov (!%p566_p9), 96   ;;  %s8173_s29 = sld [smem:[#allocation11_spill]] (!%p566_p9) }
  0x1e   : > { %s8175_s5 = sld [smem:[#allocation16_spill]] (!%p566_p9)  ;;  %s8149_s0 = smov (!%p566_p9), 120  }
  0x1f   : > { %s8176_s26 = sld [smem:[#allocation14_spill]] (!%p566_p9)  ;;  %s8147_s28 = smov (!%p566_p9), 80  }
  0x20   : > { %s8177_s24 = sld [smem:[#allocation12_spill]] (!%p566_p9)  ;;  %s8141_s3 = smov (!%p566_p9), 40  }
  0x21   : > { %v634_v0 = vld [vmem:[%s8170_s21 + $0x28] sm:$0xff]  ;;  %v633_v1 = vld [vmem:[%s8170_s21 + $0x20] sm:$0xff]  ;;  %v632_v2 = vld [vmem:[%s8170_s21 + $0x18] sm:$0xff]  ;;  %s623_s23 = scalar_select %p622_p10, %s7245_s2, 1  ;;  %vm642_vm0 = vcmask 392192   ;;  %vm739_vm1 = vcmask 261120  }
  0x22   : > { %6398 = vmatprep.subr.mxu0 %v634_v0  ;;  %s8172_s20 = smov %s8171_s1  ;;  %v7286_v3 = vld [vmem:[%s8171_s1 + $0x18] sm:$0xff]  ;;  %v631_v5 = vld [vmem:[%s8170_s21 + $0x10] sm:$0xff]  ;;  %v630_v7 = vld [vmem:[%s8170_s21 + $0x8] sm:$0xff]  ;;  %s8174_s1 = smov 96   ;;  %vm1005_vm2 = vcmask 64512   ;;  %vm1095_vm3 = vcmask 130048  }
  0x23   : > { %6399 = vmatpush3.msra.mxu0 %v634_v0  ;;  %v7291_v4 = vld [vmem:[%s8172_s20 + $0x8] sm:$0xff]  ;;  %831 = vrot.lane.b32.xlu0 %v7286_v3, %s8133_s25  ;;  %s6115_s27 = sshll.u32 %s623_s23, 4  ;;  %v7306_v6 = vld [vmem:[%s8172_s20 + $0x10] sm:$0xff]  ;;  %v7315_v9 = vld [vmem:[%s8172_s20] sm:$0xff]  ;;  %s8179_s6 = sld [smem:[#allocation17_spill]]  ;;  %vm3082_vm4 = vcmask 523264  }
  0x24   : > { %6400 = vmatprep.subr.mxu0 %v633_v1  ;;  %827 = vrot.lane.b32.xlu1 %v7291_v4, %s8133_s25  ;;  %s626_s30 = scalar_lea.vmem %s8173_s29, %s6115_s27  ;;  %v629_v10 = vld [vmem:[%s8170_s21] sm:$0xff]  ;;  %s7106_s29 = smov 64   ;;  %vm7117_vm5 = vmmov 0   ;;  %vm5867_vm6 = vcmask 73728  }
  0x25   : > { %6401 = vmatpush3.msra.mxu0 %v633_v1  ;;  %6413 = vmatprep.subr.mxu1 %v7286_v3  ;;  %v627_v8 = vld [vmem:[%s626_s30] sm:$0xff]  ;;  %v628_v12 = vld [vmem:[%s626_s30 + $0x8] sm:$0xff]  ;;  %s8151_s30 = smov 88   ;;  %s8137_s23 = smov 48  }
  0x26   : > { %6402 = vmatprep.subr.mxu0 %v632_v2  ;;  %6414 = vmatpush3.msra.mxu1 %v7286_v3  ;;  %v7329_v11 = vld [vmem:[%s8175_s5] ss:$0 sm:$0xff]  ;;  %s8178_s27 = smov %s8177_s24  ;;  %s8143_s25 = smov 104  }
  0x27   : > { %6403 = vmatpush3.msra.mxu0 %v632_v2  ;;  %6410 = vmatprep.mubr.msk.f32.mxu0 %vm642_vm0, %v627_v8  ;;  %v5943_v22 = vld [vmem:[%s8176_s26] ss:$0 sm:$0xff]  ;;  %v725_v27 = vld [vmem:[%s8178_s27 + $0x8] sm:$0xff]  ;;  %s8135_s26 = smov 56   ;;  %s8180_s7 = sld [smem:[#allocation18_spill]] }
  0x28   : > { %6404 = vmatprep.subr.mxu0 %v631_v5  ;;  %829 = vrot.lane.b32.xlu0 %v7306_v6, %s8174_s1  ;;  %v724_v26 = vld [vmem:[%s8177_s24] sm:$0xff]  ;;  %s8145_s24 = smov 72  }
  0x29   : > { %6405 = vmatpush3.msra.mxu0 %v631_v5  ;;  %825 = vrot.lane.b32.xlu1 %v7315_v9, %s8174_s1 }
  0x2a   : > { %6406 = vmatprep.subr.mxu0 %v630_v7  ;;  %6415 = vmatprep.subr.mxu1 %v7306_v6 }
  0x2b   : > { %6407 = vmatpush3.msra.mxu0 %v630_v7  ;;  %6416 = vmatpush3.msra.mxu1 %v7306_v6 }
  0x2c   : > { %6408 = vmatprep.subr.mxu0 %v629_v10  ;;  %837 = vrot.lane.b32.xlu0 %v7329_v11, %s8174_s1 }
  0x2d   : > { %6409 = vmatpush3.msra.mxu0 %v629_v10  ;;  %921 = vrot.lane.b32.xlu1 %v7286_v3, %s7106_s29 }
  0x2e   : > { %6411 = vmatmul.mubr.msk.f32.vlgmr.msra.gmra.mxu0 %vm642_vm0, %v628_v12  ;;  %6417 = vmatprep.subr.mxu1 %v7291_v4 }
  0x2f   : > { %6418 = vmatpush3.msra.mxu1 %v7291_v4 }
  0x30   : > { %919 = vrot.lane.b32.xlu0 %v7306_v6, %s7106_s29  ;;  %6419 = vmatprep.subr.mxu1 %v7315_v9 }
  0x31   : > { %917 = vrot.lane.b32.xlu1 %v7291_v4, %s7106_s29  ;;  %6420 = vmatpush3.msra.mxu1 %v7315_v9 }
  0x34   : > { %915 = vrot.lane.b32.xlu0 %v7315_v9, %s7106_s29 }
  0x95   : > { %v832_v13 = vpop.permute.xlu0 %831 }
  0x96   : > { %v828_v14 = vpop.permute.xlu1 %827  ;;  %6424 = vmatprep.subr.mxu1 %v832_v13 }
  0x9a   : > { %v830_v15 = vpop.permute.xlu0 %829 }
  0x9b   : > { %v826_v16 = vpop.permute.xlu1 %825 }
  0x9e   : > { %v838_v17 = vpop.permute.xlu0 %837 }
  0x9f   : > { %v922_v18 = vpop.permute.xlu1 %921 }
  0xa0   : > { %6435 = vmatprep.subr.mxu0 %v922_v18 }
  0xa1   : > { %6436 = vmatpush3.msra.mxu0 %v922_v18 }
  0xa2   : > { %v920_v19 = vpop.permute.xlu0 %919 }
  0xa3   : > { %6437 = vmatprep.subr.mxu0 %v920_v19  ;;  %v918_v20 = vpop.permute.xlu1 %917 }
  0xa4   : > { %6438 = vmatpush3.msra.mxu0 %v920_v19 }
  0xa5   : > { %6439 = vmatprep.subr.mxu0 %v918_v20 }
  0xa6   : > { %v916_v21 = vpop.permute.xlu0 %915  ;;  %6440 = vmatpush3.msra.mxu0 %v918_v20 }
  0xa7   : > { %6441 = vmatprep.subr.mxu0 %v916_v21 }
  0xa8   : > { %6442 = vmatpush3.msra.mxu0 %v916_v21 }
  0xee   : > { %v6412_v23 = vpop.f32.mrf.mxu0 }
  0xef   : > { %v721_v24 = vadd.f32 %v6412_v23, %v5943_v22 }
  0xf0   : > { %v715_v25 = vpop.f32.mrf.mxu0 }
  0xf1   : > { %v716_v28 = vadd.f32 %v5943_v22, %v715_v25  ;;  %v7359_v30 = vadd.f32 %v725_v27, %v721_v24 }
  0xf3   : > { %v7357_v29 = vadd.f32 %v724_v26, %v716_v28 }
  0xf5   : > { %6421 = vmatprep.mubr.msk.f32.mxu1 %vm739_vm1, %v7357_v29  ;;  %6443 = vmatprep.mubr.msk.f32.mxu0 %vm739_vm1, %v7357_v29 }
  0xf6   : > { %6422 = vmatmul.mubr.msk.f32.vlgmr.msra.gmra.mxu1 %vm739_vm1, %v7359_v30  ;;  %6444 = vmatmul.mubr.msk.f32.vlgmr.msra.gmra.mxu0 %vm739_vm1, %v7359_v30 }
  0xf7   : > { %6425 = vmatpush3.msra.mxu1 %v832_v13  ;;  %6432 = vmatprep.mubr.msk.f32.mxu1 %vm739_vm1, %v7357_v29 }
  0xf8   : > { %6426 = vmatprep.subr.mxu1 %v830_v15 }
  0xf9   : > { %6427 = vmatpush3.msra.mxu1 %v830_v15 }
  0xfa   : > { %6428 = vmatprep.subr.mxu1 %v828_v14 }
  0xfb   : > { %6429 = vmatpush3.msra.mxu1 %v828_v14 }
  0xfc   : > { %6430 = vmatprep.subr.mxu1 %v826_v16 }
  0xfd   : > { %6431 = vmatpush3.msra.mxu1 %v826_v16 }
  0xfe   : > { %6433 = vmatmul.mubr.msk.f32.vlgmr.msra.gmra.mxu1 %vm739_vm1, %v7359_v30 }
 0x1b6   : > { %v6423_v31 = vpop.f32.mrf.mxu1  ;;  %v6445_v47 = vpop.f32.mrf.mxu0 }
 0x1b7   : > { %v818_v38 = vadd.f32 %v6423_v31, %v7329_v11 }
 0x1b8   : > { %v812_v32 = vpop.f32.mrf.mxu1  ;;  %v996_v54 = vpop.f32.mrf.mxu0 }
 0x1b9   : > { %v813_v33 = vadd.f32 %v7329_v11, %v812_v32 }
 0x1bb   : > { %6450 = vmatprep.mubr.msk.f32.mxu1 %vm1005_vm2, %v813_v33 }
 0x1be   : > { %v6434_v34 = vpop.f32.mrf.mxu1 }
 0x1bf   : > { %v912_v35 = vadd.f32 %v6434_v34, %v838_v17 }
 0x1c0   : > { %v906_v36 = vpop.f32.mrf.mxu1 }
 0x1c1   : > { %v907_v37 = vadd.f32 %v906_v36, %v838_v17  ;;  %6446 = vmatprep.subr.msk.mxu1 %vm1005_vm2, %v912_v35 }
 0x1c2   : > { %6447 = vmatpush3.xpose.msk.msra.mxu1 %vm1005_vm2, %v912_v35 }
 0x1c3   : > { %6448 = vmatprep.subr.msk.mxu1 %vm1005_vm2, %v907_v37 }
 0x1c6   : > { %6449 = vmatpush3.xpose.msk.msra.mxu1 %vm1005_vm2, %v907_v37 }
 0x1c9   : > { %6451 = vmatmul.mubr.msk.f32.vlgmr.msra.gmra.mxu1 %vm1005_vm2, %v818_v38 }
 0x1ca   : > { %6479 = vmatprep.mubr.msk.f32.mxu1 %vm739_vm1, %v7357_v29 }
 0x289   : > { %v6452_v39 = vpop.f32.mrf.mxu1 }
 0x28a   : > { %v1094_v40 = vmul.f32 0.35355338, %v6452_v39 }
 0x28b   : > { %v1084_v41 = vpop.f32.mrf.mxu1 }
 0x28c   : > { %v1093_v42 = vmul.f32 0.35355338, %v1084_v41  ;;  %v1099_v43 = vsel %vm1095_vm3, %v1094_v40, -inf }
 0x28d   : > { %1100 = vmax.xlane.f32.xlu0 %v1099_v43 }
 0x28e   : > { %v1096_v44 = vsel %vm1095_vm3, %v1093_v42, -inf }
 0x28f   : > { %1097 = vmax.xlane.f32.xlu1 %v1096_v44 }
 0x2a0   : > { %1296 = vrot.lane.b32.xlu1 %v7286_v3, %s8151_s30 }
 0x2a3   : > { %927 = vrot.lane.b32.xlu0 %v7329_v11, %s7106_s29 }
 0x2a4   : > { %1294 = vrot.lane.b32.xlu1 %v7306_v6, %s8151_s30 }
 0x2a7   : > { %1292 = vrot.lane.b32.xlu0 %v7291_v4, %s8151_s30 }
 0x2a8   : > { %1206 = vrot.lane.b32.xlu1 %v7286_v3, %s8149_s0 }
 0x316   : > { %v1101_v45 = vpop.xlane.xlu0 %1100 }
 0x317   : > { %v1103_v46 = vsub.f32 %v1094_v40, %v1101_v45 }
 0x318   : > { %v1098_v48 = vpop.xlane.xlu1 %1097 }
 0x319   : > { %v1106_v49 = vmul.f32 1.442695, %v1103_v46  ;;  %v1102_v50 = vsub.f32 %v1093_v42, %v1098_v48 }
 0x31a   : > { %v928_v51 = vpop.permute.xlu0 %927 }
 0x31b   : > { %6963 = vpow2.f32 %v1106_v49  ;;  %v1104_v52 = vmul.f32 1.442695, %v1102_v50  ;;  %v1002_v53 = vadd.f32 %v6445_v47, %v928_v51  ;;  %v997_v56 = vadd.f32 %v996_v54, %v928_v51  ;;  %v1199_v54 = vld [vmem:[%s8179_s6] sm:$0xff] }
 0x31c   : > { %v1297_v55 = vpop.permute.xlu1 %1296 }
 0x31d   : > { %6965 = vpow2.f32 %v1104_v52  ;;  %6453 = vmatprep.subr.mxu0 %v1002_v53  ;;  %6471 = vmatprep.subr.mxu1 %v1297_v55 }
 0x31e   : > { %6454 = vmatpush3.msra.mxu0 %v1002_v53  ;;  %6472 = vmatpush3.msra.mxu1 %v1297_v55  ;;  %v1293_v58 = vpop.permute.xlu0 %1292  ;;  %v1662_v55 = vld [vmem:[%s8179_s6 + $0x8] sm:$0xff] }
 0x31f   : > { %6455 = vmatprep.subr.mxu0 %v997_v56 }
 0x320   : > { %6456 = vmatpush3.msra.mxu0 %v997_v56  ;;  %v1295_v57 = vpop.permute.xlu1 %1294 }
 0x321   : > { %6473 = vmatprep.subr.mxu1 %v1295_v57 }
 0x322   : > { %6474 = vmatpush3.msra.mxu1 %v1295_v57 }
 0x323   : > { %6475 = vmatprep.subr.mxu1 %v1293_v58 }
 0x324   : > { %v1207_v59 = vpop.permute.xlu1 %1206  ;;  %6476 = vmatpush3.msra.mxu1 %v1293_v58 }
 0x325   : > { %6460 = vmatprep.subr.mxu0 %v1207_v59 }
 0x328   : > { %v6964_v60 = vpop.eup %6963 }
 0x329   : > { %v1111_v61 = vsel %vm1095_vm3, %v6964_v60, 0.0 }
 0x32a   : > { %v6966_v62 = vpop.eup %6965  ;;  %1112 = vadd.xlane.f32.xlu1 %v1111_v61 }
 0x32b   : > { %v1108_v63 = vsel %vm1095_vm3, %v6966_v62, 0.0 }
 0x32c   : > { %1109 = vadd.xlane.f32.xlu0 %v1108_v63 }
 0x33b   : > { %1204 = vrot.lane.b32.xlu1 %v7306_v6, %s8149_s0 }
 0x33f   : > { %1200 = vrot.lane.b32.xlu1 %v7315_v9, %s8149_s0 }
 0x342   : > { %1290 = vrot.lane.b32.xlu0 %v7315_v9, %s8151_s30 }
 0x343   : > { %1212 = vrot.lane.b32.xlu1 %v7329_v11, %s8149_s0 }
 0x346   : > { %1202 = vrot.lane.b32.xlu0 %v7291_v4, %s8149_s0  ;;  %s8184_s0 = smov 80  }
 0x347   : > { %1384 = vrot.lane.b32.xlu1 %v7306_v6, %s8135_s26 }
 0x34a   : > { %1302 = vrot.lane.b32.xlu0 %v7329_v11, %s8151_s30  ;;  %s8182_s30 = smov 120  }
 0x34b   : > { %1380 = vrot.lane.b32.xlu1 %v7315_v9, %s8135_s26 }
 0x34e   : > { %1386 = vrot.lane.b32.xlu0 %v7286_v3, %s8135_s26 }
 0x352   : > { %1382 = vrot.lane.b32.xlu0 %v7291_v4, %s8135_s26 }
 0x3b3   : > { %v1113_v0 = vpop.xlane.xlu1 %1112 }
 0x3b4   : > { %6967 = vrcp.f32 %v1113_v0 }
 0x3b5   : > { %v1110_v1 = vpop.xlane.xlu0 %1109 }
 0x3b6   : > { %6969 = vrcp.f32 %v1110_v1 }
 0x3b7   : > { %v1205_v5 = vpop.permute.xlu1 %1204 }
 0x3b9   : > { %v1291_v2 = vpop.permute.xlu0 %1290 }
 0x3ba   : > { %6477 = vmatprep.subr.mxu1 %v1291_v2 }
 0x3bb   : > { %6478 = vmatpush3.msra.mxu1 %v1291_v2  ;;  %v1201_v8 = vpop.permute.xlu1 %1200 }
 0x3bc   : > { %6480 = vmatmul.mubr.msk.f32.vlgmr.msra.gmra.mxu1 %vm739_vm1, %v7359_v30 }
 0x3bd   : > { %v1203_v7 = vpop.permute.xlu0 %1202 }
 0x3bf   : > { %v1213_v16 = vpop.permute.xlu1 %1212 }
 0x3c1   : > { %v6968_v10 = vpop.eup %6967  ;;  %v1303_v14 = vpop.permute.xlu0 %1302 }
 0x3c2   : > { %v1117_v15 = vmul.f32 %v6968_v10, %v6964_v60 }
 0x3c3   : > { %v6970_v12 = vpop.eup %6969  ;;  %v1385_v18 = vpop.permute.xlu1 %1384 }
 0x3c4   : > { %v1116_v13 = vmul.f32 %v6970_v12, %v6966_v62 }
 0x3c5   : > { %v1387_v17 = vpop.permute.xlu0 %1386 }
 0x3c6   : > { %6457 = vmatprep.mubr.msk.f32.mxu0 %vm1095_vm3, %v1116_v13 }
 0x3c7   : > { %6458 = vmatmul.mubr.msk.f32.vlgmr.msra.gmra.mxu0 %vm1095_vm3, %v1117_v15  ;;  %v1381_v20 = vpop.permute.xlu1 %1380 }
 0x3c8   : > { %6461 = vmatpush3.msra.mxu0 %v1207_v59  ;;  %6468 = vmatprep.mubr.msk.f32.mxu0 %vm739_vm1, %v7357_v29 }
 0x3c9   : > { %6462 = vmatprep.subr.mxu0 %v1205_v5  ;;  %v1383_v19 = vpop.permute.xlu0 %1382 }
 0x3ca   : > { %6463 = vmatpush3.msra.mxu0 %v1205_v5 }
 0x3cb   : > { %6464 = vmatprep.subr.mxu0 %v1203_v7 }
 0x3cc   : > { %6465 = vmatpush3.msra.mxu0 %v1203_v7 }
 0x3cd   : > { %6466 = vmatprep.subr.mxu0 %v1201_v8 }
 0x3ce   : > { %6467 = vmatpush3.msra.mxu0 %v1201_v8 }
 0x3cf   : > { %6469 = vmatmul.mubr.msk.f32.vlgmr.msra.gmra.mxu0 %vm739_vm1, %v7359_v30  ;;  %6482 = vmatprep.subr.mxu0 %v1387_v17 }
 0x3d0   : > { %6483 = vmatpush3.msra.mxu0 %v1387_v17  ;;  %6490 = vmatprep.mubr.msk.f32.mxu0 %vm739_vm1, %v7357_v29 }
 0x3d1   : > { %6484 = vmatprep.subr.mxu0 %v1385_v18 }
 0x3d2   : > { %6485 = vmatpush3.msra.mxu0 %v1385_v18 }
 0x3d3   : > { %6486 = vmatprep.subr.mxu0 %v1383_v19 }
 0x3d4   : > { %6487 = vmatpush3.msra.mxu0 %v1383_v19 }
 0x3d5   : > { %6488 = vmatprep.subr.mxu0 %v1381_v20 }
 0x3d6   : > { %6489 = vmatpush3.msra.mxu0 %v1381_v20 }
 0x3d7   : > { %6491 = vmatmul.mubr.msk.f32.vlgmr.msra.gmra.mxu0 %vm739_vm1, %v7359_v30 }
 0x47c   : > { %v6481_v21 = vpop.f32.mrf.mxu1 }
 0x47d   : > { %v1377_v22 = vadd.f32 %v6481_v21, %v1303_v14 }
 0x47e   : > { %v1371_v23 = vpop.f32.mrf.mxu1 }
 0x47f   : > { %v1372_v24 = vadd.f32 %v1371_v23, %v1303_v14  ;;  %6493 = vmatprep.subr.msk.mxu1 %vm1005_vm2, %v1377_v22 }
 0x480   : > { %6494 = vmatpush3.xpose.msk.msra.mxu1 %vm1005_vm2, %v1377_v22 }
 0x481   : > { %6495 = vmatprep.subr.msk.mxu1 %vm1005_vm2, %v1372_v24 }
 0x484   : > { %6496 = vmatpush3.xpose.msk.msra.mxu1 %vm1005_vm2, %v1372_v24 }
 0x485   : > { %6507 = vmatprep.subr.mxu1 %v1662_v55 }
 0x487   : > { %v7433_v25 = vpop.f32.mrf.mxu0 }
 0x489   : > { %v7435_v26 = vpop.f32.mrf.mxu0 }
 0x48f   : > { %v6470_v27 = vpop.f32.mrf.mxu0 }
 0x490   : > { %v1287_v32 = vadd.f32 %v6470_v27, %v1213_v16 }
 0x491   : > { %v1281_v28 = vpop.f32.mrf.mxu0 }
 0x492   : > { %v1282_v31 = vadd.f32 %v1281_v28, %v1213_v16 }
 0x494   : > { %6497 = vmatprep.mubr.msk.f32.mxu1 %vm1005_vm2, %v1282_v31 }
 0x495   : > { %6498 = vmatmul.mubr.msk.f32.vlgmr.msra.gmra.mxu1 %vm1005_vm2, %v1287_v32 }
 0x496   : > { %6508 = vmatpush3.msra.mxu1 %v1662_v55 }
 0x497   : > { %v6492_v41 = vpop.f32.mrf.mxu0 }
 0x499   : > { %v1461_v48 = vpop.f32.mrf.mxu0 }
 0x555   : > { %v6499_v33 = vpop.f32.mrf.mxu1 }
 0x556   : > { %v1558_v34 = vmul.f32 0.35355338, %v6499_v33 }
 0x557   : > { %v1548_v35 = vpop.f32.mrf.mxu1 }
 0x558   : > { %v1557_v36 = vmul.f32 0.35355338, %v1548_v35  ;;  %v1562_v37 = vsel %vm1095_vm3, %v1558_v34, -inf }
 0x559   : > { %1563 = vmax.xlane.f32.xlu1 %v1562_v37 }
 0x55a   : > { %v1559_v38 = vsel %vm1095_vm3, %v1557_v36, -inf }
 0x55b   : > { %1560 = vmax.xlane.f32.xlu0 %v1559_v38 }
 0x56a   : > { %1392 = vrot.lane.b32.xlu1 %v7329_v11, %s8135_s26  ;;  %s8139_s26 = smov 112  }
 0x56e   : > { %1919 = vrot.lane.b32.xlu1 %v7306_v6, %s8147_s28 }
 0x572   : > { %1917 = vrot.lane.b32.xlu1 %v7291_v4, %s8147_s28 }
 0x576   : > { %1915 = vrot.lane.b32.xlu1 %v7315_v9, %s8147_s28 }
 0x57a   : > { %1827 = vrot.lane.b32.xlu1 %v7291_v4, %s8139_s26 }
 0x57e   : > { %1927 = vrot.lane.b32.xlu1 %v7329_v11, %s8147_s28 }
 0x582   : > { %2011 = vrot.lane.b32.xlu1 %v7286_v3, %s8137_s23 }
 0x586   : > { %2007 = vrot.lane.b32.xlu1 %v7291_v4, %s8137_s23 }
 0x5e2   : > { %v1564_v39 = vpop.xlane.xlu1 %1563 }
 0x5e3   : > { %v1566_v40 = vsub.f32 %v1558_v34, %v1564_v39 }
 0x5e4   : > { %v1561_v42 = vpop.xlane.xlu0 %1560 }
 0x5e5   : > { %v1565_v43 = vsub.f32 %v1557_v36, %v1561_v42  ;;  %v1569_v45 = vmul.f32 1.442695, %v1566_v40 }
 0x5e6   : > { %v1393_v44 = vpop.permute.xlu1 %1392 }
 0x5e7   : > { %v1567_v46 = vmul.f32 1.442695, %v1565_v43  ;;  %v1467_v47 = vadd.f32 %v6492_v41, %v1393_v44  ;;  %v1462_v49 = vadd.f32 %v1461_v48, %v1393_v44 }
 0x5e9   : > { %6971 = vpow2.f32 %v1567_v46  ;;  %6500 = vmatprep.subr.mxu0 %v1467_v47 }
 0x5ea   : > { %6501 = vmatpush3.msra.mxu0 %v1467_v47  ;;  %6973 = vpow2.f32 %v1569_v45  ;;  %v1920_v60 = vpop.permute.xlu1 %1919 }
 0x5eb   : > { %6502 = vmatprep.subr.mxu0 %v1462_v49 }
 0x5ec   : > { %6503 = vmatpush3.msra.mxu0 %v1462_v49  ;;  %v2287_v49 = vld [vmem:[%s8179_s6 + $0x10] sm:$0xff] }
 0x5ed   : > { %6512 = vmatprep.subr.mxu0 %v1199_v54 }
 0x5ee   : > { %v1918_v1 = vpop.permute.xlu1 %1917 }
 0x5f2   : > { %v1916_v2 = vpop.permute.xlu1 %1915 }
 0x5f6   : > { %v6972_v50 = vpop.eup %6971  ;;  %v1828_v7 = vpop.permute.xlu1 %1827 }
 0x5f7   : > { %v1571_v51 = vsel %vm1095_vm3, %v6972_v50, 0.0  ;;  %v6974_v52 = vpop.eup %6973 }
 0x5f8   : > { %1572 = vadd.xlane.f32.xlu0 %v1571_v51  ;;  %v1574_v53 = vsel %vm1095_vm3, %v6974_v52, 0.0 }
 0x5fa   : > { %v1928_v12 = vpop.permute.xlu1 %1927 }
 0x5fc   : > { %1575 = vadd.xlane.f32.xlu0 %v1574_v53 }
 0x5fe   : > { %v2012_v16 = vpop.permute.xlu1 %2011 }
 0x602   : > { %v2008_v21 = vpop.permute.xlu1 %2007 }
 0x612   : > { %1921 = vrot.lane.b32.xlu0 %v7286_v3, %s8147_s28 }
 0x616   : > { %1831 = vrot.lane.b32.xlu0 %v7286_v3, %s8139_s26 }
 0x61a   : > { %1829 = vrot.lane.b32.xlu0 %v7306_v6, %s8139_s26 }
 0x61e   : > { %1825 = vrot.lane.b32.xlu0 %v7315_v9, %s8139_s26 }
 0x622   : > { %1837 = vrot.lane.b32.xlu0 %v7329_v11, %s8139_s26  ;;  %s8185_s26 = smov 112  }
 0x626   : > { %2009 = vrot.lane.b32.xlu0 %v7306_v6, %s8137_s23 }
 0x62a   : > { %2005 = vrot.lane.b32.xlu0 %v7315_v9, %s8137_s23 }
 0x681   : > { %v1573_v56 = vpop.xlane.xlu0 %1572 }
 0x682   : > { %6975 = vrcp.f32 %v1573_v56 }
 0x685   : > { %v1576_v57 = vpop.xlane.xlu0 %1575 }
 0x686   : > { %6977 = vrcp.f32 %v1576_v57 }
 0x689   : > { %v1922_v61 = vpop.permute.xlu0 %1921 }
 0x68d   : > { %v1832_v0 = vpop.permute.xlu0 %1831 }
 0x68e   : > { %6517 = vmatprep.subr.mxu1 %v1832_v0 }
 0x68f   : > { %v6976_v58 = vpop.eup %6975 }
 0x690   : > { %v1579_v59 = vmul.f32 %v6976_v58, %v6972_v50 }
 0x691   : > { %v1830_v5 = vpop.permute.xlu0 %1829 }
 0x692   : > { %6504 = vmatprep.mubr.msk.f32.mxu0 %vm1095_vm3, %v1579_v59 }
 0x693   : > { %v6978_v62 = vpop.eup %6977 }
 0x694   : > { %v1580_v63 = vmul.f32 %v6978_v62, %v6974_v52 }
 0x695   : > { %v1826_v8 = vpop.permute.xlu0 %1825 }
 0x696   : > { %6505 = vmatmul.mubr.msk.f32.vlgmr.msra.gmra.mxu0 %vm1095_vm3, %v1580_v63 }
 0x697   : > { %6514 = vmatprep.mubr.msk.f32.mxu0 %vm1005_vm2, %v7435_v26  ;;  %6513 = vmatpush3.msra.mxu0 %v1199_v54 }
 0x698   : > { %6528 = vmatprep.subr.mxu0 %v1922_v61 }
 0x699   : > { %v1838_v14 = vpop.permute.xlu0 %1837 }
 0x69a   : > { %6515 = vmatmul.mubr.msk.f32.vlgmr.msra.gmra.mxu0 %vm1005_vm2, %v7433_v25 }
 0x69b   : > { %6529 = vmatpush3.msra.mxu0 %v1922_v61  ;;  %6536 = vmatprep.mubr.msk.f32.mxu0 %vm739_vm1, %v7357_v29 }
 0x69c   : > { %6530 = vmatprep.subr.mxu0 %v1920_v60 }
 0x69d   : > { %6531 = vmatpush3.msra.mxu0 %v1920_v60  ;;  %v2010_v17 = vpop.permute.xlu0 %2009 }
 0x69e   : > { %6532 = vmatprep.subr.mxu0 %v1918_v1 }
 0x69f   : > { %6533 = vmatpush3.msra.mxu0 %v1918_v1 }
 0x6a0   : > { %6534 = vmatprep.subr.mxu0 %v1916_v2 }
 0x6a1   : > { %6535 = vmatpush3.msra.mxu0 %v1916_v2  ;;  %v2006_v24 = vpop.permute.xlu0 %2005 }
 0x6a2   : > { %6537 = vmatmul.mubr.msk.f32.vlgmr.msra.gmra.mxu0 %vm739_vm1, %v7359_v30 }
 0x756   : > { %v6506_v10 = vpop.f32.mrf.mxu0 }
 0x758   : > { %v1653_v13 = vpop.f32.mrf.mxu0 }
 0x759   : > { %6509 = vmatprep.mubr.msk.f32.mxu1 %vm1005_vm2, %v1653_v13 }
 0x75a   : > { %6510 = vmatmul.mubr.msk.f32.vlgmr.msra.gmra.mxu1 %vm1005_vm2, %v6506_v10  ;;  %v7493_v15 = vpop.f32.mrf.mxu0 }
 0x75b   : > { %6518 = vmatpush3.msra.mxu1 %v1832_v0  ;;  %6525 = vmatprep.mubr.msk.f32.mxu1 %vm739_vm1, %v7357_v29 }
 0x75c   : > { %6519 = vmatprep.subr.mxu1 %v1830_v5  ;;  %v7495_v18 = vpop.f32.mrf.mxu0 }
 0x75d   : > { %6520 = vmatpush3.msra.mxu1 %v1830_v5 }
 0x75e   : > { %6521 = vmatprep.subr.mxu1 %v1828_v7 }
 0x75f   : > { %6522 = vmatpush3.msra.mxu1 %v1828_v7 }
 0x760   : > { %6523 = vmatprep.subr.mxu1 %v1826_v8 }
 0x761   : > { %6524 = vmatpush3.msra.mxu1 %v1826_v8 }
 0x762   : > { %6526 = vmatmul.mubr.msk.f32.vlgmr.msra.gmra.mxu1 %vm739_vm1, %v7359_v30  ;;  %v6538_v19 = vpop.f32.mrf.mxu0  ;;  %6539 = vmatprep.subr.mxu1 %v2012_v16 }
 0x763   : > { %v2002_v20 = vadd.f32 %v6538_v19, %v1928_v12  ;;  %6540 = vmatpush3.msra.mxu1 %v2012_v16  ;;  %6547 = vmatprep.mubr.msk.f32.mxu1 %vm739_vm1, %v7357_v29 }
 0x764   : > { %v1996_v22 = vpop.f32.mrf.mxu0  ;;  %6541 = vmatprep.subr.mxu1 %v2010_v17 }
 0x765   : > { %v1997_v23 = vadd.f32 %v1996_v22, %v1928_v12  ;;  %6542 = vmatpush3.msra.mxu1 %v2010_v17  ;;  %6550 = vmatprep.subr.msk.mxu0 %vm1005_vm2, %v2002_v20 }
 0x766   : > { %6543 = vmatprep.subr.mxu1 %v2008_v21  ;;  %6551 = vmatpush3.xpose.msk.msra.mxu0 %vm1005_vm2, %v2002_v20 }
 0x767   : > { %6544 = vmatpush3.msra.mxu1 %v2008_v21  ;;  %6552 = vmatprep.subr.msk.mxu0 %vm1005_vm2, %v1997_v23 }
 0x768   : > { %6545 = vmatprep.subr.mxu1 %v2006_v24 }
 0x769   : > { %6546 = vmatpush3.msra.mxu1 %v2006_v24 }
 0x76a   : > { %6548 = vmatmul.mubr.msk.f32.vlgmr.msra.gmra.mxu1 %vm739_vm1, %v7359_v30  ;;  %6553 = vmatpush3.xpose.msk.msra.mxu0 %vm1005_vm2, %v1997_v23 }
 0x76b   : > { %6564 = vmatprep.subr.mxu0 %v2287_v49 }
 0x81a   : > { %v7507_v25 = vpop.f32.mrf.mxu1 }
 0x81b   : > { %v1822_v19 = vadd.f32 %v7493_v15, %v7507_v25 }
 0x81c   : > { %v7509_v26 = vpop.f32.mrf.mxu1 }
 0x81d   : > { %v1817_v21 = vadd.f32 %v7495_v18, %v7509_v26 }
 0x822   : > { %v6527_v27 = vpop.f32.mrf.mxu1 }
 0x823   : > { %v1912_v32 = vadd.f32 %v6527_v27, %v1838_v14 }
 0x824   : > { %v1906_v28 = vpop.f32.mrf.mxu1 }
 0x825   : > { %v1907_v31 = vadd.f32 %v1906_v28, %v1838_v14 }
 0x827   : > { %6554 = vmatprep.mubr.msk.f32.mxu0 %vm1005_vm2, %v1907_v31 }
 0x828   : > { %6555 = vmatmul.mubr.msk.f32.vlgmr.msra.gmra.mxu0 %vm1005_vm2, %v1912_v32 }
 0x829   : > { %6565 = vmatpush3.msra.mxu0 %v2287_v49 }
 0x8e8   : > { %v6556_v33 = vpop.f32.mrf.mxu0 }
 0x8e9   : > { %v2183_v34 = vmul.f32 0.35355338, %v6556_v33 }
 0x8ea   : > { %v2173_v35 = vpop.f32.mrf.mxu0 }
 0x8eb   : > { %v2182_v36 = vmul.f32 0.35355338, %v2173_v35  ;;  %v2187_v37 = vsel %vm1095_vm3, %v2183_v34, -inf }
 0x8ec   : > { %2188 = vmax.xlane.f32.xlu0 %v2187_v37 }
 0x8ed   : > { %v2184_v38 = vsel %vm1095_vm3, %v2182_v36, -inf }
 0x8ee   : > { %2185 = vmax.xlane.f32.xlu1 %v2184_v38 }
 0x975   : > { %v2189_v39 = vpop.xlane.xlu0 %2188 }
 0x976   : > { %v2191_v40 = vsub.f32 %v2183_v34, %v2189_v39 }
 0x977   : > { %v2186_v41 = vpop.xlane.xlu1 %2185 }
 0x978   : > { %v2194_v42 = vmul.f32 1.442695, %v2191_v40  ;;  %v2190_v43 = vsub.f32 %v2182_v36, %v2186_v41 }
 0x97a   : > { %6979 = vpow2.f32 %v2194_v42  ;;  %v2192_v44 = vmul.f32 1.442695, %v2190_v43 }
 0x97c   : > { %6981 = vpow2.f32 %v2192_v44 }
 0x987   : > { %v6980_v45 = vpop.eup %6979 }
 0x988   : > { %v2199_v46 = vsel %vm1095_vm3, %v6980_v45, 0.0 }
 0x989   : > { %v6982_v47 = vpop.eup %6981  ;;  %2200 = vadd.xlane.f32.xlu1 %v2199_v46 }
 0x98a   : > { %v2196_v48 = vsel %vm1095_vm3, %v6982_v47, 0.0 }
 0x98b   : > { %2197 = vadd.xlane.f32.xlu0 %v2196_v48 }
 0x99a   : > { %2467 = vrot.lane.b32.xlu1 %v7286_v3, %s8145_s24 }
 0x99e   : > { %2465 = vrot.lane.b32.xlu1 %v7306_v6, %s8145_s24 }
 0x9a1   : > { %2017 = vrot.lane.b32.xlu0 %v7329_v11, %s8137_s23  ;;  %s8186_s23 = smov 48  }
 0x9a2   : > { %2377 = vrot.lane.b32.xlu1 %v7286_v3, %s8143_s25 }
 0x9a5   : > { %2463 = vrot.lane.b32.xlu0 %v7291_v4, %s8145_s24 }
 0x9a6   : > { %2375 = vrot.lane.b32.xlu1 %v7306_v6, %s8143_s25 }
 0x9a9   : > { %2461 = vrot.lane.b32.xlu0 %v7315_v9, %s8145_s24 }
 0x9aa   : > { %2371 = vrot.lane.b32.xlu1 %v7315_v9, %s8143_s25 }
 0x9ad   : > { %2373 = vrot.lane.b32.xlu0 %v7291_v4, %s8143_s25 }
 0x9ae   : > { %2383 = vrot.lane.b32.xlu1 %v7329_v11, %s8143_s25 }
 0x9b1   : > { %2473 = vrot.lane.b32.xlu0 %v7329_v11, %s8145_s24  ;;  %s8181_s24 = smov 88  }
 0x9b2   : > { %2555 = vrot.lane.b32.xlu1 %v7306_v6, %s8141_s3  ;;  %v6549_v6 = vpop.f32.mrf.mxu1 }
 0x9b4   : > { %v2086_v54 = vpop.f32.mrf.mxu1 }
 0x9b5   : > { %2557 = vrot.lane.b32.xlu0 %v7286_v3, %s8141_s3 }
 0x9b6   : > { %2551 = vrot.lane.b32.xlu1 %v7315_v9, %s8141_s3 }
 0x9b9   : > { %2553 = vrot.lane.b32.xlu0 %v7291_v4, %s8141_s3 }
 0xa12   : > { %v2201_v50 = vpop.xlane.xlu1 %2200 }
 0xa13   : > { %6983 = vrcp.f32 %v2201_v50  ;;  %v2833_v50 = vld [vmem:[%s8179_s6 + $0x18] sm:$0xff] }
 0xa14   : > { %v2198_v51 = vpop.xlane.xlu0 %2197 }
 0xa15   : > { %6985 = vrcp.f32 %v2198_v51 }
 0xa16   : > { %v2468_v52 = vpop.permute.xlu1 %2467 }
 0xa17   : > { %6580 = vmatprep.subr.mxu0 %v2468_v52 }
 0xa18   : > { %v2018_v3 = vpop.permute.xlu0 %2017 }
 0xa19   : > { %v2092_v53 = vadd.f32 %v6549_v6, %v2018_v3  ;;  %v2087_v55 = vadd.f32 %v2086_v54, %v2018_v3 }
 0xa1a   : > { %v2466_v9 = vpop.permute.xlu1 %2465 }
 0xa1b   : > { %6557 = vmatprep.subr.mxu1 %v2092_v53 }
 0xa1c   : > { %6558 = vmatpush3.msra.mxu1 %v2092_v53  ;;  %v2464_v56 = vpop.permute.xlu0 %2463 }
 0xa1d   : > { %6559 = vmatprep.subr.mxu1 %v2087_v55 }
 0xa1e   : > { %6560 = vmatpush3.msra.mxu1 %v2087_v55  ;;  %v2378_v57 = vpop.permute.xlu1 %2377 }
 0xa1f   : > { %6569 = vmatprep.subr.mxu1 %v2378_v57 }
 0xa20   : > { %v2462_v4 = vpop.permute.xlu0 %2461  ;;  %v6984_v58 = vpop.eup %6983 }
 0xa21   : > { %v2205_v63 = vmul.f32 %v6984_v58, %v6980_v45 }
 0xa22   : > { %v6986_v59 = vpop.eup %6985  ;;  %v2376_v60 = vpop.permute.xlu1 %2375 }
 0xa23   : > { %v2204_v61 = vmul.f32 %v6986_v59, %v6982_v47 }
 0xa24   : > { %v2374_v62 = vpop.permute.xlu0 %2373 }
 0xa25   : > { %6561 = vmatprep.mubr.msk.f32.mxu1 %vm1095_vm3, %v2204_v61 }
 0xa26   : > { %6562 = vmatmul.mubr.msk.f32.vlgmr.msra.gmra.mxu1 %vm1095_vm3, %v2205_v63  ;;  %v2372_v0 = vpop.permute.xlu1 %2371 }
 0xa27   : > { %6570 = vmatpush3.msra.mxu1 %v2378_v57  ;;  %6577 = vmatprep.mubr.msk.f32.mxu1 %vm739_vm1, %v7357_v29 }
 0xa28   : > { %6571 = vmatprep.subr.mxu1 %v2376_v60  ;;  %v2474_v1 = vpop.permute.xlu0 %2473 }
 0xa29   : > { %6572 = vmatpush3.msra.mxu1 %v2376_v60 }
 0xa2a   : > { %6573 = vmatprep.subr.mxu1 %v2374_v62  ;;  %v2384_v2 = vpop.permute.xlu1 %2383 }
 0xa2b   : > { %6574 = vmatpush3.msra.mxu1 %v2374_v62 }
 0xa2c   : > { %6575 = vmatprep.subr.mxu1 %v2372_v0  ;;  %v2558_v5 = vpop.permute.xlu0 %2557 }
 0xa2d   : > { %6576 = vmatpush3.msra.mxu1 %v2372_v0 }
 0xa2e   : > { %6578 = vmatmul.mubr.msk.f32.vlgmr.msra.gmra.mxu1 %vm739_vm1, %v7359_v30  ;;  %6591 = vmatprep.subr.mxu1 %v2558_v5  ;;  %v2556_v7 = vpop.permute.xlu1 %2555 }
 0xa2f   : > { %6592 = vmatpush3.msra.mxu1 %v2558_v5  ;;  %6599 = vmatprep.mubr.msk.f32.mxu1 %vm739_vm1, %v7357_v29 }
 0xa30   : > { %6593 = vmatprep.subr.mxu1 %v2556_v7  ;;  %v2554_v8 = vpop.permute.xlu0 %2553 }
 0xa31   : > { %6594 = vmatpush3.msra.mxu1 %v2556_v7 }
 0xa32   : > { %6595 = vmatprep.subr.mxu1 %v2554_v8  ;;  %v2552_v10 = vpop.permute.xlu1 %2551 }
 0xa33   : > { %6596 = vmatpush3.msra.mxu1 %v2554_v8 }
 0xa34   : > { %6597 = vmatprep.subr.mxu1 %v2552_v10 }
 0xa35   : > { %6598 = vmatpush3.msra.mxu1 %v2552_v10 }
 0xa36   : > { %6600 = vmatmul.mubr.msk.f32.vlgmr.msra.gmra.mxu1 %vm739_vm1, %v7359_v30 }
 0xae6   : > { %v6563_v12 = vpop.f32.mrf.mxu1 }
 0xae8   : > { %v2278_v13 = vpop.f32.mrf.mxu1 }
 0xae9   : > { %6566 = vmatprep.mubr.msk.f32.mxu0 %vm1005_vm2, %v2278_v13 }
 0xaea   : > { %6567 = vmatmul.mubr.msk.f32.vlgmr.msra.gmra.mxu0 %vm1005_vm2, %v6563_v12 }
 0xaeb   : > { %6581 = vmatpush3.msra.mxu0 %v2468_v52  ;;  %6588 = vmatprep.mubr.msk.f32.mxu0 %vm739_vm1, %v7357_v29 }
 0xaec   : > { %6582 = vmatprep.subr.mxu0 %v2466_v9 }
 0xaed   : > { %6583 = vmatpush3.msra.mxu0 %v2466_v9 }
 0xaee   : > { %v6579_v14 = vpop.f32.mrf.mxu1  ;;  %6584 = vmatprep.subr.mxu0 %v2464_v56 }
 0xaef   : > { %6585 = vmatpush3.msra.mxu0 %v2464_v56  ;;  %v2458_v15 = vadd.f32 %v6579_v14, %v2384_v2 }
 0xaf0   : > { %v2452_v16 = vpop.f32.mrf.mxu1  ;;  %6586 = vmatprep.subr.mxu0 %v2462_v4 }
 0xaf1   : > { %v2453_v17 = vadd.f32 %v2452_v16, %v2384_v2  ;;  %6587 = vmatpush3.msra.mxu0 %v2462_v4  ;;  %v6003_v4 = vld [vmem:[%s8180_s7] ss:$0 sm:$0xff] }
 0xaf2   : > { %6589 = vmatmul.mubr.msk.f32.vlgmr.msra.gmra.mxu0 %vm739_vm1, %v7359_v30 }
 0xaf3   : > { %6606 = vmatprep.mubr.msk.f32.mxu0 %vm1005_vm2, %v2453_v17  ;;  %v2975_v17 = vld [vmem:[%s8112_s10 + $0x10] sm:$0xff] }
 0xaf6   : > { %v6601_v38 = vpop.f32.mrf.mxu1 }
 0xaf8   : > { %v2632_v45 = vpop.f32.mrf.mxu1 }
 0xbaa   : > { %v6568_v20 = vpop.f32.mrf.mxu0 }
 0xbab   : > { %v7571_v22 = vadd.f32 %v6568_v20, %v1822_v19  ;;  %v2974_v19 = vld [vmem:[%s8112_s10 + $0x8] sm:$0xff]  ;;  %v2973_v20 = vld [vmem:[%s8112_s10] sm:$0xff] }
 0xbac   : > { %v2360_v23 = vpop.f32.mrf.mxu0 }
 0xbad   : > { %v7573_v24 = vadd.f32 %v2360_v23, %v1817_v21  ;;  %v3074_v21 = vld [vmem:[%s8114_s12 + $0x38] sm:$0xff]  ;;  %v3072_v23 = vld [vmem:[%s8114_s12 + $0x28] sm:$0xff] }
 0xbb2   : > { %v6590_v27 = vpop.f32.mrf.mxu0 }
 0xbb3   : > { %v2548_v28 = vadd.f32 %v6590_v27, %v2474_v1 }
 0xbb4   : > { %v2542_v31 = vpop.f32.mrf.mxu0 }
 0xbb5   : > { %v2543_v32 = vadd.f32 %v2542_v31, %v2474_v1  ;;  %6602 = vmatprep.subr.msk.mxu0 %vm1005_vm2, %v2548_v28 }
 0xbb6   : > { %6603 = vmatpush3.xpose.msk.msra.mxu0 %vm1005_vm2, %v2548_v28 }
 0xbb7   : > { %6604 = vmatprep.subr.msk.mxu0 %vm1005_vm2, %v2543_v32 }
 0xbba   : > { %6605 = vmatpush3.xpose.msk.msra.mxu0 %vm1005_vm2, %v2543_v32 }
 0xbbb   : > { %6616 = vmatprep.subr.mxu0 %v2833_v50 }
 0xbbd   : > { %6607 = vmatmul.mubr.msk.f32.vlgmr.msra.gmra.mxu0 %vm1005_vm2, %v2458_v15 }
 0xbbe   : > { %6617 = vmatpush3.msra.mxu0 %v2833_v50 }
 0xbbf   : > { %6632 = vmatprep.subr.mxu0 %v3074_v21 }
 0xc7d   : > { %v6608_v18 = vpop.f32.mrf.mxu0 }
 0xc7e   : > { %v2729_v25 = vmul.f32 0.35355338, %v6608_v18 }
 0xc7f   : > { %v2719_v26 = vpop.f32.mrf.mxu0 }
 0xc80   : > { %v2728_v33 = vmul.f32 0.35355338, %v2719_v26  ;;  %v2733_v34 = vsel %vm1095_vm3, %v2729_v25, -inf  ;;  %v6004_v26 = vld [vmem:[%s8110_s8] ss:$0 sm:$0xff] }
 0xc81   : > { %2734 = vmax.xlane.f32.xlu1 %v2733_v34  ;;  %v6005_v34 = vld [vmem:[%s8111_s9] ss:$0 sm:$0xff] }
 0xc82   : > { %v2730_v35 = vsel %vm1095_vm3, %v2728_v33, -inf }
 0xc83   : > { %2731 = vmax.xlane.f32.xlu0 %v2730_v35 }
 0xc92   : > { %2563 = vrot.lane.b32.xlu1 %v7329_v11, %s8141_s3 }
 0xd0a   : > { %v2735_v36 = vpop.xlane.xlu1 %2734 }
 0xd0b   : > { %v2737_v37 = vsub.f32 %v2729_v25, %v2735_v36 }
 0xd0c   : > { %v2732_v39 = vpop.xlane.xlu0 %2731 }
 0xd0d   : > { %v2736_v40 = vsub.f32 %v2728_v33, %v2732_v39  ;;  %v2740_v42 = vmul.f32 1.442695, %v2737_v37 }
 0xd0e   : > { %v2564_v41 = vpop.permute.xlu1 %2563 }
 0xd0f   : > { %v2738_v43 = vmul.f32 1.442695, %v2736_v40  ;;  %v2638_v44 = vadd.f32 %v6601_v38, %v2564_v41  ;;  %v2633_v46 = vadd.f32 %v2632_v45, %v2564_v41  ;;  %v3070_v41 = vld [vmem:[%s8114_s12 + $0x18] sm:$0xff]  ;;  %v6006_v45 = vld [vmem:[%s8113_s11] ss:$0 sm:$0xff] }
 0xd11   : > { %6987 = vpow2.f32 %v2738_v43  ;;  %6609 = vmatprep.subr.mxu1 %v2638_v44  ;;  %v3068_v43 = vld [vmem:[%s8114_s12 + $0x8] sm:$0xff] }
 0xd12   : > { %6610 = vmatpush3.msra.mxu1 %v2638_v44  ;;  %6989 = vpow2.f32 %v2740_v42  ;;  %v3069_v42 = vld [vmem:[%s8114_s12 + $0x10] sm:$0xff]  ;;  %v3067_v44 = vld [vmem:[%s8114_s12] sm:$0xff] }
 0xd13   : > { %6611 = vmatprep.subr.mxu1 %v2633_v46 }
 0xd14   : > { %6612 = vmatpush3.msra.mxu1 %v2633_v46 }
 0xd1e   : > { %v6988_v47 = vpop.eup %6987 }
 0xd1f   : > { %v2742_v11 = vsel %vm1095_vm3, %v6988_v47, 0.0  ;;  %v6990_v48 = vpop.eup %6989 }
 0xd20   : > { %2743 = vadd.xlane.f32.xlu0 %v2742_v11  ;;  %v2745_v49 = vsel %vm1095_vm3, %v6990_v48, 0.0 }
 0xd24   : > { %2746 = vadd.xlane.f32.xlu0 %v2745_v49 }
 0xda9   : > { %v2744_v51 = vpop.xlane.xlu0 %2743 }
 0xdaa   : > { %6991 = vrcp.f32 %v2744_v51  ;;  %v6009_v51 = vld [vmem:[%s8115_s13] ss:$0 sm:$0xff] }
 0xdad   : > { %v2747_v6 = vpop.xlane.xlu0 %2746 }
 0xdae   : > { %6993 = vrcp.f32 %v2747_v6 }
 0xdb7   : > { %v6992_v52 = vpop.eup %6991 }
 0xdb8   : > { %v2750_v3 = vmul.f32 %v6992_v52, %v6988_v47 }
 0xdba   : > { %6613 = vmatprep.mubr.msk.f32.mxu1 %vm1095_vm3, %v2750_v3 }
 0xdbb   : > { %v6994_v53 = vpop.eup %6993 }
 0xdbc   : > { %v2751_v54 = vmul.f32 %v6994_v53, %v6990_v48 }
 0xdbe   : > { %6614 = vmatmul.mubr.msk.f32.vlgmr.msra.gmra.mxu1 %vm1095_vm3, %v2751_v54 }
 0xe7e   : > { %v6615_v9 = vpop.f32.mrf.mxu1 }
 0xe80   : > { %v2824_v55 = vpop.f32.mrf.mxu1 }
 0xe81   : > { %6618 = vmatprep.mubr.msk.f32.mxu0 %vm1005_vm2, %v2824_v55 }
 0xe82   : > { %6619 = vmatmul.mubr.msk.f32.vlgmr.msra.gmra.mxu0 %vm1005_vm2, %v6615_v9 }
 0xe83   : > { %6633 = vmatpush3.msra.mxu0 %v3074_v21 }
 0xf42   : > { %v6620_v56 = vpop.f32.mrf.mxu0 }
 0xf43   : > { %v2916_v57 = vadd.f32 %v6620_v56, %v7571_v22  ;;  %v3073_v22 = vld [vmem:[%s8114_s12 + $0x30] sm:$0xff] }
 0xf44   : > { %v2906_v58 = vpop.f32.mrf.mxu0  ;;  %6634 = vmatprep.subr.mxu0 %v3073_v22 }
 0xf45   : > { %v2915_v59 = vadd.f32 %v2906_v58, %v7573_v24  ;;  %v2925_v60 = vadd.f32 %v6003_v4, %v2916_v57  ;;  %6635 = vmatpush3.msra.mxu0 %v3073_v22  ;;  %v3071_v24 = vld [vmem:[%s8114_s12 + $0x20] sm:$0xff]  ;;  %v7661_v57 = vld [vmem:[%s8172_s20 + $0x38] sm:$0xff]  ;;  %v7675_v58 = vld [vmem:[%s8172_s20 + $0x28] sm:$0xff] }
 0xf46   : > { %6636 = vmatprep.subr.mxu0 %v3072_v23  ;;  %v6012_v22 = vld [vmem:[%s8116_s14] ss:$0 sm:$0xff] }
 0xf47   : > { %v2924_v61 = vadd.f32 %v6003_v4, %v2915_v59  ;;  %v2927_v0 = vadd.f32 %v2925_v60, %v7359_v30  ;;  %v2976_v30 = vld [vmem:[%s8112_s10 + $0x18] sm:$0xff]  ;;  %6637 = vmatpush3.msra.mxu0 %v3072_v23  ;;  %v7668_v4 = vld [vmem:[%s8172_s20 + $0x30] sm:$0xff]  ;;  %v7683_v59 = vld [vmem:[%s8172_s20 + $0x20] sm:$0xff] }
 0xf48   : > { %6621 = vmatprep.subr.mxu1 %v2976_v30  ;;  %6638 = vmatprep.subr.mxu0 %v3071_v24 }
 0xf49   : > { %v2926_v62 = vadd.f32 %v2924_v61, %v7357_v29  ;;  %v2933_v1 = vsel %vm739_vm1, %v2927_v0, 0.0  ;;  %6622 = vmatpush3.msra.mxu1 %v2976_v30  ;;  %6639 = vmatpush3.msra.mxu0 %v3071_v24  ;;  %v6013_v24 = vld [vmem:[%s8117_s15] ss:$0 sm:$0xff] }
 0xf4a   : > { %6623 = vmatprep.subr.mxu1 %v2975_v17  ;;  %6640 = vmatprep.subr.mxu0 %v3070_v41 }
 0xf4b   : > { %v2930_v63 = vsel %vm739_vm1, %v2926_v62, 0.0  ;;  %6624 = vmatpush3.msra.mxu1 %v2975_v17  ;;  %6641 = vmatpush3.msra.mxu0 %v3070_v41 }
 0xf4c   : > { %2931 = vadd.xlane.f32.xlu0 %v2930_v63  ;;  %6625 = vmatprep.subr.mxu1 %v2974_v19 }
 0xf4d   : > { %6626 = vmatpush3.msra.mxu1 %v2974_v19  ;;  %6642 = vmatprep.subr.mxu0 %v3069_v42 }
 0xf4e   : > { %6627 = vmatprep.subr.mxu1 %v2973_v20  ;;  %6643 = vmatpush3.msra.mxu0 %v3069_v42 }
 0xf4f   : > { %6628 = vmatpush3.msra.mxu1 %v2973_v20  ;;  %6644 = vmatprep.subr.mxu0 %v3068_v43 }
 0xf50   : > { %2934 = vadd.xlane.f32.xlu0 %v2933_v1  ;;  %6645 = vmatpush3.msra.mxu0 %v3068_v43 }
 0xf51   : > { %6646 = vmatprep.subr.mxu0 %v3067_v44  ;;  %6651 = vmatprep.subr.mxu1 %v7661_v57 }
 0xf52   : > { %6647 = vmatpush3.msra.mxu0 %v3067_v44 }
 0xfd5   : > { %v2932_v2 = vpop.xlane.xlu0 %2931 }
 0xfd6   : > { %v2937_v5 = vmul.f32 0.03125, %v2932_v2 }
 0xfd8   : > { %v2939_v7 = vsub.f32 %v2926_v62, %v2937_v5 }
 0xfd9   : > { %v2935_v8 = vpop.xlane.xlu0 %2934 }
 0xfda   : > { %v2938_v10 = vmul.f32 0.03125, %v2935_v8  ;;  %v2941_v12 = vmul.f32 %v2939_v7, %v2939_v7 }
 0xfdc   : > { %v2940_v13 = vsub.f32 %v2927_v0, %v2938_v10  ;;  %v2943_v14 = vsel %vm739_vm1, %v2941_v12, 0.0  ;;  %v7701_v10 = vld [vmem:[%s8175_s5 + $0x1] ss:$0 sm:$0xff] }
 0xfdd   : > { %2944 = vadd.xlane.f32.xlu0 %v2943_v14 }
 0xfde   : > { %v2942_v16 = vmul.f32 %v2940_v13, %v2940_v13 }
 0xfe0   : > { %v2946_v29 = vsel %vm739_vm1, %v2942_v16, 0.0 }
 0xfe1   : > { %2947 = vadd.xlane.f32.xlu0 %v2946_v29 }
0x1066   : > { %v2945_v27 = vpop.xlane.xlu0 %2944 }
0x1067   : > { %v2949_v28 = vmul.f32 0.03125, %v2945_v27 }
0x1069   : > { %v2951_v31 = vadd.f32 1e-05, %v2949_v28 }
0x106a   : > { %v2948_v32 = vpop.xlane.xlu0 %2947 }
0x106b   : > { %6995 = vrsqrt.f32 %v2951_v31  ;;  %v2950_v15 = vmul.f32 0.03125, %v2948_v32 }
0x106d   : > { %v2952_v18 = vadd.f32 1e-05, %v2950_v15 }
0x106f   : > { %6997 = vrsqrt.f32 %v2952_v18 }
0x1078   : > { %v6996_v25 = vpop.eup %6995 }
0x1079   : > { %v2955_v33 = vmul.f32 %v6996_v25, %v2939_v7 }
0x107b   : > { %v2963_v35 = vmul.f32 %v6004_v26, %v2955_v33 }
0x107c   : > { %v6998_v36 = vpop.eup %6997 }
0x107d   : > { %v2956_v37 = vmul.f32 %v6998_v36, %v2940_v13  ;;  %v2971_v38 = vadd.f32 %v6005_v34, %v2963_v35 }
0x107f   : > { %v2964_v39 = vmul.f32 %v6004_v26, %v2956_v37  ;;  %6629 = vmatprep.mubr.msk.f32.mxu1 %vm739_vm1, %v2971_v38 }
0x1081   : > { %v2972_v40 = vadd.f32 %v6005_v34, %v2964_v39 }
0x1083   : > { %6630 = vmatmul.mubr.msk.f32.vlgmr.msra.gmra.mxu1 %vm739_vm1, %v2972_v40 }
0x1084   : > { %6652 = vmatpush3.msra.mxu1 %v7661_v57 }
0x1085   : > { %6653 = vmatprep.subr.mxu1 %v7668_v4 }
0x1086   : > { %6654 = vmatpush3.msra.mxu1 %v7668_v4 }
0x1087   : > { %6655 = vmatprep.subr.mxu1 %v7675_v58 }
0x1088   : > { %6656 = vmatpush3.msra.mxu1 %v7675_v58 }
0x1089   : > { %6657 = vmatprep.subr.mxu1 %v7683_v59 }
0x108a   : > { %6658 = vmatpush3.msra.mxu1 %v7683_v59 }
0x1143   : > { %v6631_v46 = vpop.f32.mrf.mxu1 }
0x1144   : > { %v3062_v47 = vadd.f32 %v6631_v46, %v6006_v45 }
0x1145   : > { %v3056_v11 = vpop.f32.mrf.mxu1 }
0x1146   : > { %v3057_v48 = vadd.f32 %v6006_v45, %v3056_v11  ;;  %v3066_v50 = vmax.f32 %v3062_v47, 0.0 }
0x1148   : > { %v3065_v49 = vmax.f32 %v3057_v48, 0.0 }
0x114a   : > { %6648 = vmatprep.mubr.msk.f32.mxu0 %vm3082_vm4, %v3065_v49 }
0x114b   : > { %6649 = vmatmul.mubr.msk.f32.vlgmr.msra.gmra.mxu0 %vm3082_vm4, %v3066_v50 }
0x120b   : > { %v6650_v6 = vpop.f32.mrf.mxu0 }
0x120c   : > { %v3161_v52 = vadd.f32 %v6650_v6, %v6009_v51 }
0x120d   : > { %v3155_v3 = vpop.f32.mrf.mxu0 }
0x120e   : > { %v3156_v53 = vadd.f32 %v6009_v51, %v3155_v3  ;;  %v3165_v54 = vadd.f32 %v3161_v52, %v2972_v40 }
0x1210   : > { %v3171_v9 = vsel %vm739_vm1, %v3165_v54, 0.0  ;;  %v3164_v55 = vadd.f32 %v3156_v53, %v2971_v38 }
0x1211   : > { %3172 = vadd.xlane.f32.xlu0 %v3171_v9 }
0x1212   : > { %v3168_v56 = vsel %vm739_vm1, %v3164_v55, 0.0 }
0x1213   : > { %3169 = vadd.xlane.f32.xlu1 %v3168_v56 }
0x1224   : > { %3310 = vrot.lane.b32.xlu1 %v7675_v58, %s8174_s1 }
0x1228   : > { %3400 = vrot.lane.b32.xlu1 %v7675_v58, %s7106_s29 }
0x129a   : > { %v3173_v60 = vpop.xlane.xlu0 %3172 }
0x129b   : > { %v3175_v61 = vmul.f32 0.03125, %v3173_v60 }
0x129c   : > { %v3170_v62 = vpop.xlane.xlu1 %3169 }
0x129d   : > { %v3174_v63 = vmul.f32 0.03125, %v3170_v62  ;;  %v3177_v0 = vsub.f32 %v3165_v54, %v3175_v61 }
0x129f   : > { %v3176_v1 = vsub.f32 %v3164_v55, %v3174_v63  ;;  %v3179_v7 = vmul.f32 %v3177_v0, %v3177_v0 }
0x12a0   : > { %v3311_v18 = vpop.permute.xlu1 %3310 }
0x12a1   : > { %v3178_v2 = vmul.f32 %v3176_v1, %v3176_v1  ;;  %v3183_v8 = vsel %vm739_vm1, %v3179_v7, 0.0 }
0x12a3   : > { %v3180_v5 = vsel %vm739_vm1, %v3178_v2, 0.0 }
0x12a4   : > { %3181 = vadd.xlane.f32.xlu0 %v3180_v5  ;;  %v3401_v35 = vpop.permute.xlu1 %3400 }
0x12a8   : > { %3184 = vadd.xlane.f32.xlu0 %v3183_v8 }
0x12be   : > { %3314 = vrot.lane.b32.xlu0 %v7661_v57, %s8174_s1 }
0x12c2   : > { %3312 = vrot.lane.b32.xlu0 %v7668_v4, %s8174_s1 }
0x12c6   : > { %3308 = vrot.lane.b32.xlu0 %v7683_v59, %s8174_s1 }
0x12ca   : > { %3320 = vrot.lane.b32.xlu0 %v7701_v10, %s8174_s1  ;;  %s6112_s1 = sshll.u32 %s7245_s2, 4  ;;  %s7118_s2 = smov [#allocation2]  }
0x12ce   : > { %3404 = vrot.lane.b32.xlu0 %v7661_v57, %s7106_s29 }
0x12d2   : > { %3402 = vrot.lane.b32.xlu0 %v7668_v4, %s7106_s29 }
0x12d6   : > { %3398 = vrot.lane.b32.xlu0 %v7683_v59, %s7106_s29 }
0x132d   : > { %v3182_v12 = vpop.xlane.xlu0 %3181 }
0x132e   : > { %v3186_v13 = vmul.f32 0.03125, %v3182_v12 }
0x1330   : > { %v3188_v14 = vadd.f32 1e-05, %v3186_v13 }
0x1331   : > { %v3185_v16 = vpop.xlane.xlu0 %3184 }
0x1332   : > { %6999 = vrsqrt.f32 %v3188_v14  ;;  %v3187_v29 = vmul.f32 0.03125, %v3185_v16 }
0x1334   : > { %v3189_v30 = vadd.f32 1e-05, %v3187_v29 }
0x1335   : > { %v3315_v17 = vpop.permute.xlu0 %3314 }
0x1336   : > { %7001 = vrsqrt.f32 %v3189_v30  ;;  %6662 = vmatprep.subr.mxu1 %v3315_v17 }
0x1339   : > { %v3313_v19 = vpop.permute.xlu0 %3312 }
0x133d   : > { %v3309_v20 = vpop.permute.xlu0 %3308 }
0x133f   : > { %v7000_v21 = vpop.eup %6999 }
0x1340   : > { %v3192_v23 = vmul.f32 %v7000_v21, %v3176_v1 }
0x1341   : > { %v3321_v27 = vpop.permute.xlu0 %3320 }
0x1342   : > { %v3200_v28 = vmul.f32 %v6012_v22, %v3192_v23 }
0x1343   : > { %v7002_v31 = vpop.eup %7001 }
0x1344   : > { %v7717_v32 = vadd.f32 %v6013_v24, %v3200_v28  ;;  %v3193_v15 = vmul.f32 %v7002_v31, %v3177_v0 }
0x1345   : > { %v3405_v25 = vpop.permute.xlu0 %3404 }
0x1346   : > { %v3201_v26 = vmul.f32 %v6012_v22, %v3193_v15  ;;  %6659 = vmatprep.mubr.msk.f32.mxu1 %vm739_vm1, %v7717_v32  ;;  %6681 = vmatprep.mubr.msk.f32.mxu0 %vm739_vm1, %v7717_v32 }
0x1347   : > { %6673 = vmatprep.subr.mxu0 %v3405_v25 }
0x1348   : > { %v7723_v33 = vadd.f32 %v6013_v24, %v3201_v26  ;;  %6674 = vmatpush3.msra.mxu0 %v3405_v25 }
0x1349   : > { %v3403_v34 = vpop.permute.xlu0 %3402 }
0x134a   : > { %6660 = vmatmul.mubr.msk.f32.vlgmr.msra.gmra.mxu1 %vm739_vm1, %v7723_v33  ;;  %6675 = vmatprep.subr.mxu0 %v3403_v34 }
0x134b   : > { %6663 = vmatpush3.msra.mxu1 %v3315_v17  ;;  %6670 = vmatprep.mubr.msk.f32.mxu1 %vm739_vm1, %v7717_v32 }
0x134c   : > { %6664 = vmatprep.subr.mxu1 %v3313_v19  ;;  %6676 = vmatpush3.msra.mxu0 %v3403_v34 }
0x134d   : > { %6665 = vmatpush3.msra.mxu1 %v3313_v19  ;;  %6677 = vmatprep.subr.mxu0 %v3401_v35  ;;  %v3399_v36 = vpop.permute.xlu0 %3398 }
0x134e   : > { %6666 = vmatprep.subr.mxu1 %v3311_v18  ;;  %6678 = vmatpush3.msra.mxu0 %v3401_v35 }
0x134f   : > { %6667 = vmatpush3.msra.mxu1 %v3311_v18  ;;  %6679 = vmatprep.subr.mxu0 %v3399_v36 }
0x1350   : > { %6668 = vmatprep.subr.mxu1 %v3309_v20  ;;  %6680 = vmatpush3.msra.mxu0 %v3399_v36 }
0x1351   : > { %6669 = vmatpush3.msra.mxu1 %v3309_v20  ;;  %6682 = vmatmul.mubr.msk.f32.vlgmr.msra.gmra.mxu0 %vm739_vm1, %v7723_v33 }
0x1352   : > { %6671 = vmatmul.mubr.msk.f32.vlgmr.msra.gmra.mxu1 %vm739_vm1, %v7723_v33 }
0x140a   : > { %v6661_v37 = vpop.f32.mrf.mxu1 }
0x140b   : > { %v3301_v44 = vadd.f32 %v6661_v37, %v7701_v10 }
0x140c   : > { %v3295_v38 = vpop.f32.mrf.mxu1 }
0x140d   : > { %v3296_v39 = vadd.f32 %v7701_v10, %v3295_v38 }
0x140f   : > { %6688 = vmatprep.mubr.msk.f32.mxu1 %vm1005_vm2, %v3296_v39 }
0x1411   : > { %v6683_v6 = vpop.f32.mrf.mxu0 }
0x1412   : > { %v6672_v40 = vpop.f32.mrf.mxu1 }
0x1413   : > { %v3395_v41 = vadd.f32 %v6672_v40, %v3321_v27  ;;  %v3479_v56 = vpop.f32.mrf.mxu0 }
0x1414   : > { %v3389_v42 = vpop.f32.mrf.mxu1 }
0x1415   : > { %v3390_v43 = vadd.f32 %v3389_v42, %v3321_v27  ;;  %6684 = vmatprep.subr.msk.mxu1 %vm1005_vm2, %v3395_v41 }
0x1416   : > { %6685 = vmatpush3.xpose.msk.msra.mxu1 %vm1005_vm2, %v3395_v41 }
0x1417   : > { %6686 = vmatprep.subr.msk.mxu1 %vm1005_vm2, %v3390_v43 }
0x141a   : > { %6687 = vmatpush3.xpose.msk.msra.mxu1 %vm1005_vm2, %v3390_v43 }
0x141d   : > { %6689 = vmatmul.mubr.msk.f32.vlgmr.msra.gmra.mxu1 %vm1005_vm2, %v3301_v44 }
0x141e   : > { %6717 = vmatprep.mubr.msk.f32.mxu1 %vm739_vm1, %v7717_v32 }
0x14dd   : > { %v6690_v45 = vpop.f32.mrf.mxu1 }
0x14de   : > { %v3576_v46 = vmul.f32 0.35355338, %v6690_v45 }
0x14df   : > { %v3566_v47 = vpop.f32.mrf.mxu1 }
0x14e0   : > { %v3575_v11 = vmul.f32 0.35355338, %v3566_v47  ;;  %v3580_v48 = vsel %vm1095_vm3, %v3576_v46, -inf }
0x14e1   : > { %3581 = vmax.xlane.f32.xlu0 %v3580_v48 }
0x14e2   : > { %v3577_v49 = vsel %vm1095_vm3, %v3575_v11, -inf }
0x14e3   : > { %3578 = vmax.xlane.f32.xlu1 %v3577_v49 }
0x14f4   : > { %3778 = vrot.lane.b32.xlu1 %v7661_v57, %s8181_s24 }
0x14f7   : > { %3410 = vrot.lane.b32.xlu0 %v7701_v10, %s7106_s29  ;;  %s8183_s29 = smov 56  }
0x14f8   : > { %3776 = vrot.lane.b32.xlu1 %v7668_v4, %s8181_s24 }
0x14fb   : > { %3774 = vrot.lane.b32.xlu0 %v7675_v58, %s8181_s24 }
0x14fc   : > { %3688 = vrot.lane.b32.xlu1 %v7661_v57, %s8182_s30 }
0x156a   : > { %v3582_v50 = vpop.xlane.xlu0 %3581 }
0x156b   : > { %v3584_v51 = vsub.f32 %v3576_v46, %v3582_v50 }
0x156c   : > { %v3579_v52 = vpop.xlane.xlu1 %3578 }
0x156d   : > { %v3587_v3 = vmul.f32 1.442695, %v3584_v51  ;;  %v3583_v53 = vsub.f32 %v3575_v11, %v3579_v52 }
0x156e   : > { %v3411_v54 = vpop.permute.xlu0 %3410 }
0x156f   : > { %7003 = vpow2.f32 %v3587_v3  ;;  %v3585_v9 = vmul.f32 1.442695, %v3583_v53  ;;  %v3485_v55 = vadd.f32 %v6683_v6, %v3411_v54  ;;  %v3480_v61 = vadd.f32 %v3479_v56, %v3411_v54  ;;  %v6032_v56 = vld [vmem:[%s8179_s6 + $0x20] sm:$0xff] }
0x1570   : > { %v3779_v60 = vpop.permute.xlu1 %3778 }
0x1571   : > { %7005 = vpow2.f32 %v3585_v9  ;;  %6691 = vmatprep.subr.mxu0 %v3485_v55  ;;  %6709 = vmatprep.subr.mxu1 %v3779_v60 }
0x1572   : > { %6692 = vmatpush3.msra.mxu0 %v3485_v55  ;;  %6710 = vmatpush3.msra.mxu1 %v3779_v60  ;;  %v3775_v63 = vpop.permute.xlu0 %3774  ;;  %v6045_v60 = vld [vmem:[%s8179_s6 + $0x28] sm:$0xff] }
0x1573   : > { %6693 = vmatprep.subr.mxu0 %v3480_v61 }
0x1574   : > { %6694 = vmatpush3.msra.mxu0 %v3480_v61  ;;  %v3777_v62 = vpop.permute.xlu1 %3776 }
0x1575   : > { %6711 = vmatprep.subr.mxu1 %v3777_v62 }
0x1576   : > { %6712 = vmatpush3.msra.mxu1 %v3777_v62 }
0x1577   : > { %6713 = vmatprep.subr.mxu1 %v3775_v63 }
0x1578   : > { %v3689_v0 = vpop.permute.xlu1 %3688  ;;  %6714 = vmatpush3.msra.mxu1 %v3775_v63 }
0x1579   : > { %6698 = vmatprep.subr.mxu0 %v3689_v0 }
0x157c   : > { %v7004_v1 = vpop.eup %7003 }
0x157d   : > { %v3592_v2 = vsel %vm1095_vm3, %v7004_v1, 0.0 }
0x157e   : > { %v7006_v5 = vpop.eup %7005  ;;  %3593 = vadd.xlane.f32.xlu1 %v3592_v2 }
0x157f   : > { %v3589_v7 = vsel %vm1095_vm3, %v7006_v5, 0.0 }
0x1580   : > { %3590 = vadd.xlane.f32.xlu0 %v3589_v7 }
0x158f   : > { %3686 = vrot.lane.b32.xlu1 %v7668_v4, %s8182_s30 }
0x1593   : > { %3682 = vrot.lane.b32.xlu1 %v7683_v59, %s8182_s30 }
0x1596   : > { %3772 = vrot.lane.b32.xlu0 %v7683_v59, %s8181_s24 }
0x1597   : > { %3694 = vrot.lane.b32.xlu1 %v7701_v10, %s8182_s30 }
0x159a   : > { %3684 = vrot.lane.b32.xlu0 %v7675_v58, %s8182_s30  ;;  %s8188_s30 = smov 104  }
0x159b   : > { %3866 = vrot.lane.b32.xlu1 %v7668_v4, %s8183_s29 }
0x159e   : > { %3784 = vrot.lane.b32.xlu0 %v7701_v10, %s8181_s24  ;;  %s8187_s24 = smov 72  }
0x159f   : > { %3862 = vrot.lane.b32.xlu1 %v7683_v59, %s8183_s29 }
0x15a2   : > { %3868 = vrot.lane.b32.xlu0 %v7661_v57, %s8183_s29 }
0x15a6   : > { %3864 = vrot.lane.b32.xlu0 %v7675_v58, %s8183_s29 }
0x1607   : > { %v3594_v8 = vpop.xlane.xlu1 %3593 }
0x1608   : > { %7007 = vrcp.f32 %v3594_v8 }
0x1609   : > { %v3591_v12 = vpop.xlane.xlu0 %3590 }
0x160a   : > { %7009 = vrcp.f32 %v3591_v12 }
0x160b   : > { %v3687_v14 = vpop.permute.xlu1 %3686 }
0x160d   : > { %v3773_v13 = vpop.permute.xlu0 %3772 }
0x160e   : > { %6715 = vmatprep.subr.mxu1 %v3773_v13 }
0x160f   : > { %6716 = vmatpush3.msra.mxu1 %v3773_v13  ;;  %v3683_v29 = vpop.permute.xlu1 %3682 }
0x1610   : > { %6718 = vmatmul.mubr.msk.f32.vlgmr.msra.gmra.mxu1 %vm739_vm1, %v7723_v33 }
0x1611   : > { %v3685_v16 = vpop.permute.xlu0 %3684 }
0x1613   : > { %v3695_v22 = vpop.permute.xlu1 %3694 }
0x1615   : > { %v7008_v30 = vpop.eup %7007  ;;  %v3785_v20 = vpop.permute.xlu0 %3784 }
0x1616   : > { %v3598_v21 = vmul.f32 %v7008_v30, %v7004_v1 }
0x1617   : > { %v7010_v17 = vpop.eup %7009  ;;  %v3867_v24 = vpop.permute.xlu1 %3866 }
0x1618   : > { %v3597_v19 = vmul.f32 %v7010_v17, %v7006_v5 }
0x1619   : > { %v3869_v23 = vpop.permute.xlu0 %3868 }
0x161a   : > { %6695 = vmatprep.mubr.msk.f32.mxu0 %vm1095_vm3, %v3597_v19 }
0x161b   : > { %6696 = vmatmul.mubr.msk.f32.vlgmr.msra.gmra.mxu0 %vm1095_vm3, %v3598_v21  ;;  %v3863_v28 = vpop.permute.xlu1 %3862 }
0x161c   : > { %6699 = vmatpush3.msra.mxu0 %v3689_v0  ;;  %6706 = vmatprep.mubr.msk.f32.mxu0 %vm739_vm1, %v7717_v32 }
0x161d   : > { %6700 = vmatprep.subr.mxu0 %v3687_v14  ;;  %v3865_v27 = vpop.permute.xlu0 %3864 }
0x161e   : > { %6701 = vmatpush3.msra.mxu0 %v3687_v14 }
0x161f   : > { %6702 = vmatprep.subr.mxu0 %v3685_v16 }
0x1620   : > { %6703 = vmatpush3.msra.mxu0 %v3685_v16 }
0x1621   : > { %6704 = vmatprep.subr.mxu0 %v3683_v29 }
0x1622   : > { %6705 = vmatpush3.msra.mxu0 %v3683_v29 }
0x1623   : > { %6707 = vmatmul.mubr.msk.f32.vlgmr.msra.gmra.mxu0 %vm739_vm1, %v7723_v33  ;;  %6720 = vmatprep.subr.mxu0 %v3869_v23 }
0x1624   : > { %6721 = vmatpush3.msra.mxu0 %v3869_v23  ;;  %6728 = vmatprep.mubr.msk.f32.mxu0 %vm739_vm1, %v7717_v32 }
0x1625   : > { %6722 = vmatprep.subr.mxu0 %v3867_v24 }
0x1626   : > { %6723 = vmatpush3.msra.mxu0 %v3867_v24 }
0x1627   : > { %6724 = vmatprep.subr.mxu0 %v3865_v27 }
0x1628   : > { %6725 = vmatpush3.msra.mxu0 %v3865_v27 }
0x1629   : > { %6726 = vmatprep.subr.mxu0 %v3863_v28 }
0x162a   : > { %6727 = vmatpush3.msra.mxu0 %v3863_v28 }
0x162b   : > { %6729 = vmatmul.mubr.msk.f32.vlgmr.msra.gmra.mxu0 %vm739_vm1, %v7723_v33 }
0x16d0   : > { %v6719_v31 = vpop.f32.mrf.mxu1 }
0x16d1   : > { %v3859_v15 = vadd.f32 %v6719_v31, %v3785_v20 }
0x16d2   : > { %v3853_v18 = vpop.f32.mrf.mxu1 }
0x16d3   : > { %v3854_v25 = vadd.f32 %v3853_v18, %v3785_v20  ;;  %6731 = vmatprep.subr.msk.mxu1 %vm1005_vm2, %v3859_v15 }
0x16d4   : > { %6732 = vmatpush3.xpose.msk.msra.mxu1 %vm1005_vm2, %v3859_v15 }
0x16d5   : > { %6733 = vmatprep.subr.msk.mxu1 %vm1005_vm2, %v3854_v25 }
0x16d8   : > { %6734 = vmatpush3.xpose.msk.msra.mxu1 %vm1005_vm2, %v3854_v25 }
0x16d9   : > { %6745 = vmatprep.subr.mxu1 %v6045_v60 }
0x16db   : > { %v7793_v26 = vpop.f32.mrf.mxu0 }
0x16dd   : > { %v7795_v34 = vpop.f32.mrf.mxu0 }
0x16e3   : > { %v6708_v35 = vpop.f32.mrf.mxu0 }
0x16e4   : > { %v3769_v38 = vadd.f32 %v6708_v35, %v3695_v22 }
0x16e5   : > { %v3763_v36 = vpop.f32.mrf.mxu0 }
0x16e6   : > { %v3764_v37 = vadd.f32 %v3763_v36, %v3695_v22 }
0x16e8   : > { %6735 = vmatprep.mubr.msk.f32.mxu1 %vm1005_vm2, %v3764_v37 }
0x16e9   : > { %6736 = vmatmul.mubr.msk.f32.vlgmr.msra.gmra.mxu1 %vm1005_vm2, %v3769_v38 }
0x16ea   : > { %6746 = vmatpush3.msra.mxu1 %v6045_v60 }
0x16eb   : > { %v6730_v47 = vpop.f32.mrf.mxu0 }
0x16ed   : > { %v3943_v52 = vpop.f32.mrf.mxu0 }
0x17a9   : > { %v6737_v39 = vpop.f32.mrf.mxu1 }
0x17aa   : > { %v4040_v40 = vmul.f32 0.35355338, %v6737_v39 }
0x17ab   : > { %v4030_v41 = vpop.f32.mrf.mxu1 }
0x17ac   : > { %v4039_v42 = vmul.f32 0.35355338, %v4030_v41  ;;  %v4044_v43 = vsel %vm1095_vm3, %v4040_v40, -inf }
0x17ad   : > { %4045 = vmax.xlane.f32.xlu1 %v4044_v43 }
0x17ae   : > { %v4041_v44 = vsel %vm1095_vm3, %v4039_v42, -inf }
0x17af   : > { %4042 = vmax.xlane.f32.xlu0 %v4041_v44 }
0x17be   : > { %3874 = vrot.lane.b32.xlu1 %v7701_v10, %s8183_s29  ;;  %s8189_s29 = smov 40  }
0x17c2   : > { %4401 = vrot.lane.b32.xlu1 %v7668_v4, %s8184_s0 }
0x17c6   : > { %4399 = vrot.lane.b32.xlu1 %v7675_v58, %s8184_s0 }
0x17ca   : > { %4397 = vrot.lane.b32.xlu1 %v7683_v59, %s8184_s0 }
0x17ce   : > { %4309 = vrot.lane.b32.xlu1 %v7675_v58, %s8185_s26 }
0x17d2   : > { %4409 = vrot.lane.b32.xlu1 %v7701_v10, %s8184_s0 }
0x17d6   : > { %4493 = vrot.lane.b32.xlu1 %v7661_v57, %s8186_s23 }
0x17da   : > { %4489 = vrot.lane.b32.xlu1 %v7675_v58, %s8186_s23 }
0x1836   : > { %v4046_v45 = vpop.xlane.xlu1 %4045 }
0x1837   : > { %v4048_v46 = vsub.f32 %v4040_v40, %v4046_v45 }
0x1838   : > { %v4043_v11 = vpop.xlane.xlu0 %4042 }
0x1839   : > { %v4047_v48 = vsub.f32 %v4039_v42, %v4043_v11  ;;  %v4051_v50 = vmul.f32 1.442695, %v4048_v46 }
0x183a   : > { %v3875_v49 = vpop.permute.xlu1 %3874 }
0x183b   : > { %v4049_v51 = vmul.f32 1.442695, %v4047_v48  ;;  %v3949_v6 = vadd.f32 %v6730_v47, %v3875_v49  ;;  %v3944_v3 = vadd.f32 %v3943_v52, %v3875_v49 }
0x183d   : > { %7011 = vpow2.f32 %v4049_v51  ;;  %6738 = vmatprep.subr.mxu0 %v3949_v6 }
0x183e   : > { %6739 = vmatpush3.msra.mxu0 %v3949_v6  ;;  %7013 = vpow2.f32 %v4051_v50  ;;  %v4402_v5 = vpop.permute.xlu1 %4401 }
0x183f   : > { %6740 = vmatprep.subr.mxu0 %v3944_v3 }
0x1840   : > { %6741 = vmatpush3.msra.mxu0 %v3944_v3  ;;  %v6062_v3 = vld [vmem:[%s8179_s6 + $0x30] sm:$0xff] }
0x1841   : > { %6750 = vmatprep.subr.mxu0 %v6032_v56 }
0x1842   : > { %v4400_v12 = vpop.permute.xlu1 %4399 }
0x1846   : > { %v4398_v13 = vpop.permute.xlu1 %4397 }
0x184a   : > { %v7012_v53 = vpop.eup %7011  ;;  %v4310_v16 = vpop.permute.xlu1 %4309 }
0x184b   : > { %v4053_v54 = vsel %vm1095_vm3, %v7012_v53, 0.0  ;;  %v7014_v9 = vpop.eup %7013 }
0x184c   : > { %4054 = vadd.xlane.f32.xlu0 %v4053_v54  ;;  %v4056_v55 = vsel %vm1095_vm3, %v7014_v9, 0.0 }
0x184e   : > { %v4410_v17 = vpop.permute.xlu1 %4409 }
0x1850   : > { %4057 = vadd.xlane.f32.xlu0 %v4056_v55 }
0x1852   : > { %v4494_v22 = vpop.permute.xlu1 %4493 }
0x1856   : > { %v4490_v31 = vpop.permute.xlu1 %4489 }
0x1866   : > { %4403 = vrot.lane.b32.xlu0 %v7661_v57, %s8184_s0  ;;  %s620_s0 = sand.u32 1, %s7095_s22  }
0x1867   : > { %s621_s25 = scalar_lea.vmem [#allocation2], %s620_s0  ;;  %s5870_s5 = scalar_lea.sflag [#allocation3], %s620_s0 }
0x1868   : > { %s5882_s3 = sshll.u32 %s621_s25, 4  ;;  %s5883_s3 = int_to_ptr.vmem [resolvable:$true] %s5882_s3 }
0x186a   : > { %4313 = vrot.lane.b32.xlu0 %v7661_v57, %s8185_s26 }
0x186e   : > { %4311 = vrot.lane.b32.xlu0 %v7668_v4, %s8185_s26 }
0x1872   : > { %4307 = vrot.lane.b32.xlu0 %v7683_v59, %s8185_s26 }
0x1876   : > { %4319 = vrot.lane.b32.xlu0 %v7701_v10, %s8185_s26  ;;  %s7047_s26 = sshll.u32 %s7118_s2, 4  ;;  %s7048_s26 = int_to_ptr.vmem [resolvable:$false] %s7047_s26 }
0x1877   : > { %p7050_p0 = scmp.lt.s32.totalorder %s5883_s3, %s7048_s26 }
0x187a   : > { %4491 = vrot.lane.b32.xlu0 %v7668_v4, %s8186_s23 }
0x187e   : > { %4487 = vrot.lane.b32.xlu0 %v7683_v59, %s8186_s23 }
0x18d5   : > { %v4055_v61 = vpop.xlane.xlu0 %4054 }
0x18d6   : > { %7015 = vrcp.f32 %v4055_v61 }
0x18d9   : > { %v4058_v62 = vpop.xlane.xlu0 %4057 }
0x18da   : > { %7017 = vrcp.f32 %v4058_v62 }
0x18dd   : > { %v4404_v63 = vpop.permute.xlu0 %4403 }
0x18e1   : > { %v4314_v0 = vpop.permute.xlu0 %4313 }
0x18e2   : > { %6755 = vmatprep.subr.mxu1 %v4314_v0 }
0x18e3   : > { %v7016_v1 = vpop.eup %7015 }
0x18e4   : > { %v4061_v2 = vmul.f32 %v7016_v1, %v7012_v53 }
0x18e5   : > { %v4312_v14 = vpop.permute.xlu0 %4311 }
0x18e6   : > { %6742 = vmatprep.mubr.msk.f32.mxu0 %vm1095_vm3, %v4061_v2 }
0x18e7   : > { %v7018_v7 = vpop.eup %7017 }
0x18e8   : > { %v4062_v8 = vmul.f32 %v7018_v7, %v7014_v9 }
0x18e9   : > { %v4308_v29 = vpop.permute.xlu0 %4307 }
0x18ea   : > { %6743 = vmatmul.mubr.msk.f32.vlgmr.msra.gmra.mxu0 %vm1095_vm3, %v4062_v8 }
0x18eb   : > { %6752 = vmatprep.mubr.msk.f32.mxu0 %vm1005_vm2, %v7795_v34  ;;  %6751 = vmatpush3.msra.mxu0 %v6032_v56 }
0x18ec   : > { %6766 = vmatprep.subr.mxu0 %v4404_v63 }
0x18ed   : > { %v4320_v20 = vpop.permute.xlu0 %4319 }
0x18ee   : > { %6753 = vmatmul.mubr.msk.f32.vlgmr.msra.gmra.mxu0 %vm1005_vm2, %v7793_v26 }
0x18ef   : > { %6767 = vmatpush3.msra.mxu0 %v4404_v63  ;;  %6774 = vmatprep.mubr.msk.f32.mxu0 %vm739_vm1, %v7717_v32 }
0x18f0   : > { %6768 = vmatprep.subr.mxu0 %v4402_v5 }
0x18f1   : > { %6769 = vmatpush3.msra.mxu0 %v4402_v5  ;;  %v4492_v23 = vpop.permute.xlu0 %4491 }
0x18f2   : > { %6770 = vmatprep.subr.mxu0 %v4400_v12 }
0x18f3   : > { %6771 = vmatpush3.msra.mxu0 %v4400_v12 }
0x18f4   : > { %6772 = vmatprep.subr.mxu0 %v4398_v13 }
0x18f5   : > { %6773 = vmatpush3.msra.mxu0 %v4398_v13  ;;  %v4488_v25 = vpop.permute.xlu0 %4487 }
0x18f6   : > { %6775 = vmatmul.mubr.msk.f32.vlgmr.msra.gmra.mxu0 %vm739_vm1, %v7723_v33 }
0x19aa   : > { %v6744_v30 = vpop.f32.mrf.mxu0 }
0x19ac   : > { %v4135_v19 = vpop.f32.mrf.mxu0 }
0x19ad   : > { %6747 = vmatprep.mubr.msk.f32.mxu1 %vm1005_vm2, %v4135_v19 }
0x19ae   : > { %6748 = vmatmul.mubr.msk.f32.vlgmr.msra.gmra.mxu1 %vm1005_vm2, %v6744_v30  ;;  %v7853_v21 = vpop.f32.mrf.mxu0 }
0x19af   : > { %6756 = vmatpush3.msra.mxu1 %v4314_v0  ;;  %6763 = vmatprep.mubr.msk.f32.mxu1 %vm739_vm1, %v7717_v32 }
0x19b0   : > { %6757 = vmatprep.subr.mxu1 %v4312_v14  ;;  %v7855_v24 = vpop.f32.mrf.mxu0 }
0x19b1   : > { %6758 = vmatpush3.msra.mxu1 %v4312_v14 }
0x19b2   : > { %6759 = vmatprep.subr.mxu1 %v4310_v16 }
0x19b3   : > { %6760 = vmatpush3.msra.mxu1 %v4310_v16 }
0x19b4   : > { %6761 = vmatprep.subr.mxu1 %v4308_v29 }
0x19b5   : > { %6762 = vmatpush3.msra.mxu1 %v4308_v29 }
0x19b6   : > { %6764 = vmatmul.mubr.msk.f32.vlgmr.msra.gmra.mxu1 %vm739_vm1, %v7723_v33  ;;  %v6776_v27 = vpop.f32.mrf.mxu0  ;;  %6777 = vmatprep.subr.mxu1 %v4494_v22 }
0x19b7   : > { %v4484_v28 = vadd.f32 %v6776_v27, %v4410_v17  ;;  %6778 = vmatpush3.msra.mxu1 %v4494_v22  ;;  %6785 = vmatprep.mubr.msk.f32.mxu1 %vm739_vm1, %v7717_v32 }
0x19b8   : > { %v4478_v15 = vpop.f32.mrf.mxu0  ;;  %6779 = vmatprep.subr.mxu1 %v4492_v23 }
0x19b9   : > { %v4479_v18 = vadd.f32 %v4478_v15, %v4410_v17  ;;  %6780 = vmatpush3.msra.mxu1 %v4492_v23  ;;  %6788 = vmatprep.subr.msk.mxu0 %vm1005_vm2, %v4484_v28 }
0x19ba   : > { %6781 = vmatprep.subr.mxu1 %v4490_v31  ;;  %6789 = vmatpush3.xpose.msk.msra.mxu0 %vm1005_vm2, %v4484_v28 }
0x19bb   : > { %6782 = vmatpush3.msra.mxu1 %v4490_v31  ;;  %6790 = vmatprep.subr.msk.mxu0 %vm1005_vm2, %v4479_v18 }
0x19bc   : > { %6783 = vmatprep.subr.mxu1 %v4488_v25 }
0x19bd   : > { %6784 = vmatpush3.msra.mxu1 %v4488_v25 }
0x19be   : > { %6786 = vmatmul.mubr.msk.f32.vlgmr.msra.gmra.mxu1 %vm739_vm1, %v7723_v33  ;;  %6791 = vmatpush3.xpose.msk.msra.mxu0 %vm1005_vm2, %v4479_v18 }
0x19bf   : > { %6802 = vmatprep.subr.mxu0 %v6062_v3 }
0x1a6e   : > { %v7867_v26 = vpop.f32.mrf.mxu1 }
0x1a6f   : > { %v4304_v27 = vadd.f32 %v7853_v21, %v7867_v26 }
0x1a70   : > { %v7869_v34 = vpop.f32.mrf.mxu1 }
0x1a71   : > { %v4299_v31 = vadd.f32 %v7855_v24, %v7869_v34 }
0x1a76   : > { %v6765_v35 = vpop.f32.mrf.mxu1 }
0x1a77   : > { %v4394_v38 = vadd.f32 %v6765_v35, %v4320_v20 }
0x1a78   : > { %v4388_v36 = vpop.f32.mrf.mxu1 }
0x1a79   : > { %v4389_v37 = vadd.f32 %v4388_v36, %v4320_v20 }
0x1a7b   : > { %6792 = vmatprep.mubr.msk.f32.mxu0 %vm1005_vm2, %v4389_v37 }
0x1a7c   : > { %6793 = vmatmul.mubr.msk.f32.vlgmr.msra.gmra.mxu0 %vm1005_vm2, %v4394_v38 }
0x1a7d   : > { %6803 = vmatpush3.msra.mxu0 %v6062_v3 }
0x1b3c   : > { %v6794_v39 = vpop.f32.mrf.mxu0 }
0x1b3d   : > { %v4665_v40 = vmul.f32 0.35355338, %v6794_v39 }
0x1b3e   : > { %v4655_v41 = vpop.f32.mrf.mxu0 }
0x1b3f   : > { %v4664_v42 = vmul.f32 0.35355338, %v4655_v41  ;;  %v4669_v43 = vsel %vm1095_vm3, %v4665_v40, -inf }
0x1b40   : > { %4670 = vmax.xlane.f32.xlu0 %v4669_v43 }
0x1b41   : > { %v4666_v44 = vsel %vm1095_vm3, %v4664_v42, -inf }
0x1b42   : > { %4667 = vmax.xlane.f32.xlu1 %v4666_v44 }
0x1bc9   : > { %v4671_v45 = vpop.xlane.xlu0 %4670 }
0x1bca   : > { %v4673_v46 = vsub.f32 %v4665_v40, %v4671_v45 }
0x1bcb   : > { %v4668_v47 = vpop.xlane.xlu1 %4667 }
0x1bcc   : > { %v4676_v11 = vmul.f32 1.442695, %v4673_v46  ;;  %v4672_v48 = vsub.f32 %v4664_v42, %v4668_v47 }
0x1bce   : > { %7019 = vpow2.f32 %v4676_v11  ;;  %v4674_v49 = vmul.f32 1.442695, %v4672_v48 }
0x1bd0   : > { %7021 = vpow2.f32 %v4674_v49 }
0x1bdb   : > { %v7020_v50 = vpop.eup %7019 }
0x1bdc   : > { %v4681_v51 = vsel %vm1095_vm3, %v7020_v50, 0.0 }
0x1bdd   : > { %v7022_v6 = vpop.eup %7021  ;;  %4682 = vadd.xlane.f32.xlu1 %v4681_v51 }
0x1bde   : > { %v4678_v52 = vsel %vm1095_vm3, %v7022_v6, 0.0 }
0x1bdf   : > { %4679 = vadd.xlane.f32.xlu0 %v4678_v52 }
0x1bee   : > { %4949 = vrot.lane.b32.xlu1 %v7661_v57, %s8187_s24 }
0x1bf2   : > { %4947 = vrot.lane.b32.xlu1 %v7668_v4, %s8187_s24 }
0x1bf5   : > { %4499 = vrot.lane.b32.xlu0 %v7701_v10, %s8186_s23  ;;  %s7049_s23 = scalar_lea.vmem %s7048_s26, 32 }
0x1bf6   : > { %4859 = vrot.lane.b32.xlu1 %v7661_v57, %s8188_s30 }
0x1bf9   : > { %4945 = vrot.lane.b32.xlu0 %v7675_v58, %s8187_s24 }
0x1bfa   : > { %4857 = vrot.lane.b32.xlu1 %v7668_v4, %s8188_s30 }
0x1bfd   : > { %4943 = vrot.lane.b32.xlu0 %v7683_v59, %s8187_s24 }
0x1bfe   : > { %4853 = vrot.lane.b32.xlu1 %v7683_v59, %s8188_s30 }
0x1c01   : > { %4855 = vrot.lane.b32.xlu0 %v7675_v58, %s8188_s30 }
0x1c02   : > { %4865 = vrot.lane.b32.xlu1 %v7701_v10, %s8188_s30  ;;  %s8190_s30 = sld [smem:[#allocation19_spill]] }
0x1c05   : > { %4955 = vrot.lane.b32.xlu0 %v7701_v10, %s8187_s24 }
0x1c06   : > { %5037 = vrot.lane.b32.xlu1 %v7668_v4, %s8189_s29  ;;  %v6787_v4 = vpop.f32.mrf.mxu1 }
0x1c08   : > { %v4568_v56 = vpop.f32.mrf.mxu1 }
0x1c09   : > { %5039 = vrot.lane.b32.xlu0 %v7661_v57, %s8189_s29 }
0x1c0a   : > { %5033 = vrot.lane.b32.xlu1 %v7683_v59, %s8189_s29 }
0x1c0d   : > { %5035 = vrot.lane.b32.xlu0 %v7675_v58, %s8189_s29 }
0x1c66   : > { %v4683_v53 = vpop.xlane.xlu1 %4682 }
0x1c67   : > { %7023 = vrcp.f32 %v4683_v53  ;;  %v6077_v53 = vld [vmem:[%s8179_s6 + $0x38] sm:$0xff]  ;;  %s7043_s6 = scalar_lea.vmem %s5883_s3, 16 }
0x1c68   : > { %v4680_v54 = vpop.xlane.xlu0 %4679  ;;  %p7044_p11 = scmp.ne.s32.totalorder %s5883_s3, %s7043_s6  ;;  %p7051_p1 = scmp.lt.s32.totalorder %s7049_s23, %s7043_s6 }
0x1c69   : > { %7025 = vrcp.f32 %v4680_v54 }
0x1c6a   : > { %v4950_v9 = vpop.permute.xlu1 %4949  ;;  %p7045_p12 = pnand %p7044_p11, %p7262_p5  ;;  %p7052_p2 = por %p7051_p1, %p7050_p0 }
0x1c6b   : > { %6818 = vmatprep.subr.mxu0 %v4950_v9 }
0x1c6c   : > { %v4500_v57 = vpop.permute.xlu0 %4499  ;;  %p7046_p13 = pneg %p7045_p12 }
0x1c6d   : > { %v4574_v55 = vadd.f32 %v6787_v4, %v4500_v57  ;;  %v4569_v60 = vadd.f32 %v4568_v56, %v4500_v57 }
0x1c6e   : > { %v4948_v59 = vpop.permute.xlu1 %4947  ;;  %p7053_p3 = pnand %p7052_p2, %p7046_p13 }
0x1c6f   : > { %6795 = vmatprep.subr.mxu1 %v4574_v55 }
0x1c70   : > { %6796 = vmatpush3.msra.mxu1 %v4574_v55  ;;  %v4946_v61 = vpop.permute.xlu0 %4945 }
0x1c71   : > { %6797 = vmatprep.subr.mxu1 %v4569_v60 }
0x1c72   : > { %6798 = vmatpush3.msra.mxu1 %v4569_v60  ;;  %v4860_v62 = vpop.permute.xlu1 %4859 }
0x1c73   : > { %6807 = vmatprep.subr.mxu1 %v4860_v62 }
0x1c74   : > { %v4944_v58 = vpop.permute.xlu0 %4943  ;;  %v7024_v63 = vpop.eup %7023 }
0x1c75   : > { %v4687_v7 = vmul.f32 %v7024_v63, %v7020_v50 }
0x1c76   : > { %v7026_v0 = vpop.eup %7025  ;;  %v4858_v1 = vpop.permute.xlu1 %4857 }
0x1c77   : > { %v4686_v2 = vmul.f32 %v7026_v0, %v7022_v6 }
0x1c78   : > { %v4856_v5 = vpop.permute.xlu0 %4855 }
0x1c79   : > { %6799 = vmatprep.mubr.msk.f32.mxu1 %vm1095_vm3, %v4686_v2 }
0x1c7a   : > { %6800 = vmatmul.mubr.msk.f32.vlgmr.msra.gmra.mxu1 %vm1095_vm3, %v4687_v7  ;;  %v4854_v8 = vpop.permute.xlu1 %4853 }
0x1c7b   : > { %6808 = vmatpush3.msra.mxu1 %v4860_v62  ;;  %6815 = vmatprep.mubr.msk.f32.mxu1 %vm739_vm1, %v7717_v32 }
0x1c7c   : > { %6809 = vmatprep.subr.mxu1 %v4858_v1  ;;  %v4956_v12 = vpop.permute.xlu0 %4955 }
0x1c7d   : > { %6810 = vmatpush3.msra.mxu1 %v4858_v1 }
0x1c7e   : > { %6811 = vmatprep.subr.mxu1 %v4856_v5  ;;  %v4866_v13 = vpop.permute.xlu1 %4865 }
0x1c7f   : > { %6812 = vmatpush3.msra.mxu1 %v4856_v5 }
0x1c80   : > { %6813 = vmatprep.subr.mxu1 %v4854_v8  ;;  %v5040_v14 = vpop.permute.xlu0 %5039 }
0x1c81   : > { %6814 = vmatpush3.msra.mxu1 %v4854_v8 }
0x1c82   : > { %6816 = vmatmul.mubr.msk.f32.vlgmr.msra.gmra.mxu1 %vm739_vm1, %v7723_v33  ;;  %6829 = vmatprep.subr.mxu1 %v5040_v14  ;;  %v5038_v16 = vpop.permute.xlu1 %5037 }
0x1c83   : > { %6830 = vmatpush3.msra.mxu1 %v5040_v14  ;;  %6837 = vmatprep.mubr.msk.f32.mxu1 %vm739_vm1, %v7717_v32 }
0x1c84   : > { %6831 = vmatprep.subr.mxu1 %v5038_v16  ;;  %v5036_v29 = vpop.permute.xlu0 %5035 }
0x1c85   : > { %6832 = vmatpush3.msra.mxu1 %v5038_v16 }
0x1c86   : > { %6833 = vmatprep.subr.mxu1 %v5036_v29  ;;  %v5034_v30 = vpop.permute.xlu1 %5033 }
0x1c87   : > { %6834 = vmatpush3.msra.mxu1 %v5036_v29 }
0x1c88   : > { %6835 = vmatprep.subr.mxu1 %v5034_v30 }
0x1c89   : > { %6836 = vmatpush3.msra.mxu1 %v5034_v30 }
0x1c8a   : > { %6838 = vmatmul.mubr.msk.f32.vlgmr.msra.gmra.mxu1 %vm739_vm1, %v7723_v33 }
0x1d3a   : > { %v6801_v17 = vpop.f32.mrf.mxu1 }
0x1d3c   : > { %v4760_v19 = vpop.f32.mrf.mxu1 }
0x1d3d   : > { %6804 = vmatprep.mubr.msk.f32.mxu0 %vm1005_vm2, %v4760_v19 }
0x1d3e   : > { %6805 = vmatmul.mubr.msk.f32.vlgmr.msra.gmra.mxu0 %vm1005_vm2, %v6801_v17 }
0x1d3f   : > { %6819 = vmatpush3.msra.mxu0 %v4950_v9  ;;  %6826 = vmatprep.mubr.msk.f32.mxu0 %vm739_vm1, %v7717_v32 }
0x1d40   : > { %6820 = vmatprep.subr.mxu0 %v4948_v59 }
0x1d41   : > { %6821 = vmatpush3.msra.mxu0 %v4948_v59 }
0x1d42   : > { %v6817_v20 = vpop.f32.mrf.mxu1  ;;  %6822 = vmatprep.subr.mxu0 %v4946_v61 }
0x1d43   : > { %6823 = vmatpush3.msra.mxu0 %v4946_v61  ;;  %v4940_v21 = vadd.f32 %v6817_v20, %v4866_v13 }
0x1d44   : > { %v4934_v22 = vpop.f32.mrf.mxu1  ;;  %6824 = vmatprep.subr.mxu0 %v4944_v58 }
0x1d45   : > { %v4935_v23 = vadd.f32 %v4934_v22, %v4866_v13  ;;  %6825 = vmatpush3.msra.mxu0 %v4944_v58  ;;  %v6081_v58 = vld [vmem:[%s8180_s7 + $0x1] ss:$0 sm:$0xff] }
0x1d46   : > { %6827 = vmatmul.mubr.msk.f32.vlgmr.msra.gmra.mxu0 %vm739_vm1, %v7723_v33 }
0x1d47   : > { %6844 = vmatprep.mubr.msk.f32.mxu0 %vm1005_vm2, %v4935_v23  ;;  %v6088_v23 = vld [vmem:[%s8112_s10 + $0x30] sm:$0xff] }
0x1d4a   : > { %v6839_v44 = vpop.f32.mrf.mxu1 }
0x1d4c   : > { %v5114_v50 = vpop.f32.mrf.mxu1 }
0x1dfe   : > { %v6806_v28 = vpop.f32.mrf.mxu0 }
0x1dff   : > { %v7931_v15 = vadd.f32 %v6806_v28, %v4304_v27  ;;  %v6087_v27 = vld [vmem:[%s8112_s10 + $0x28] sm:$0xff]  ;;  %v6086_v28 = vld [vmem:[%s8112_s10 + $0x20] sm:$0xff] }
0x1e00   : > { %v4842_v18 = vpop.f32.mrf.mxu0 }
0x1e01   : > { %v7933_v25 = vadd.f32 %v4842_v18, %v4299_v31  ;;  %v6101_v31 = vld [vmem:[%s8114_s12 + $0x78] sm:$0xff]  ;;  %v6099_v18 = vld [vmem:[%s8114_s12 + $0x68] sm:$0xff] }
0x1e06   : > { %v6828_v35 = vpop.f32.mrf.mxu0 }
0x1e07   : > { %v5030_v36 = vadd.f32 %v6828_v35, %v4956_v12 }
0x1e08   : > { %v5024_v37 = vpop.f32.mrf.mxu0 }
0x1e09   : > { %v5025_v38 = vadd.f32 %v5024_v37, %v4956_v12  ;;  %6840 = vmatprep.subr.msk.mxu0 %vm1005_vm2, %v5030_v36 }
0x1e0a   : > { %6841 = vmatpush3.xpose.msk.msra.mxu0 %vm1005_vm2, %v5030_v36 }
0x1e0b   : > { %6842 = vmatprep.subr.msk.mxu0 %vm1005_vm2, %v5025_v38 }
0x1e0e   : > { %6843 = vmatpush3.xpose.msk.msra.mxu0 %vm1005_vm2, %v5025_v38 }
0x1e0f   : > { %6854 = vmatprep.subr.mxu0 %v6077_v53 }
0x1e11   : > { %6845 = vmatmul.mubr.msk.f32.vlgmr.msra.gmra.mxu0 %vm1005_vm2, %v4940_v21 }
0x1e12   : > { %6855 = vmatpush3.msra.mxu0 %v6077_v53 }
0x1e13   : > { %6870 = vmatprep.subr.mxu0 %v6101_v31 }
0x1ed1   : > { %v6846_v24 = vpop.f32.mrf.mxu0 }
0x1ed2   : > { %v5211_v26 = vmul.f32 0.35355338, %v6846_v24 }
0x1ed3   : > { %v5201_v34 = vpop.f32.mrf.mxu0 }
0x1ed4   : > { %v5210_v39 = vmul.f32 0.35355338, %v5201_v34  ;;  %v5215_v40 = vsel %vm1095_vm3, %v5211_v26, -inf  ;;  %v6084_v34 = vld [vmem:[%s8110_s8 + $0x1] ss:$0 sm:$0xff] }
0x1ed5   : > { %5216 = vmax.xlane.f32.xlu1 %v5215_v40  ;;  %v6085_v40 = vld [vmem:[%s8111_s9 + $0x1] ss:$0 sm:$0xff] }
0x1ed6   : > { %v5212_v41 = vsel %vm1095_vm3, %v5210_v39, -inf }
0x1ed7   : > { %5213 = vmax.xlane.f32.xlu0 %v5212_v41 }
0x1ee6   : > { %5045 = vrot.lane.b32.xlu1 %v7701_v10, %s8189_s29  ;;  %s8067_s29 = scalar_lea.hbm %s8190_s30, %s6112_s1 }
0x1f5e   : > { %v5217_v42 = vpop.xlane.xlu1 %5216 }
0x1f5f   : > { %v5219_v43 = vsub.f32 %v5211_v26, %v5217_v42 }
0x1f60   : > { %v5214_v45 = vpop.xlane.xlu0 %5213 }
0x1f61   : > { %v5218_v46 = vsub.f32 %v5210_v39, %v5214_v45  ;;  %v5222_v11 = vmul.f32 1.442695, %v5219_v43 }
0x1f62   : > { %v5046_v47 = vpop.permute.xlu1 %5045 }
0x1f63   : > { %v5220_v48 = vmul.f32 1.442695, %v5218_v46  ;;  %v5120_v49 = vadd.f32 %v6839_v44, %v5046_v47  ;;  %v5115_v51 = vadd.f32 %v5114_v50, %v5046_v47  ;;  %v6097_v47 = vld [vmem:[%s8114_s12 + $0x58] sm:$0xff]  ;;  %v6091_v50 = vld [vmem:[%s8113_s11 + $0x1] ss:$0 sm:$0xff] }
0x1f65   : > { %7027 = vpow2.f32 %v5220_v48  ;;  %6847 = vmatprep.subr.mxu1 %v5120_v49  ;;  %v6095_v48 = vld [vmem:[%s8114_s12 + $0x48] sm:$0xff] }
0x1f66   : > { %6848 = vmatpush3.msra.mxu1 %v5120_v49  ;;  %7029 = vpow2.f32 %v5222_v11  ;;  %v6096_v11 = vld [vmem:[%s8114_s12 + $0x50] sm:$0xff]  ;;  %v6094_v49 = vld [vmem:[%s8114_s12 + $0x40] sm:$0xff] }
0x1f67   : > { %6849 = vmatprep.subr.mxu1 %v5115_v51 }
0x1f68   : > { %6850 = vmatpush3.msra.mxu1 %v5115_v51 }
0x1f72   : > { %v7028_v6 = vpop.eup %7027 }
0x1f73   : > { %v5224_v10 = vsel %vm1095_vm3, %v7028_v6, 0.0  ;;  %v7030_v52 = vpop.eup %7029 }
0x1f74   : > { %5225 = vadd.xlane.f32.xlu0 %v5224_v10  ;;  %v5227_v3 = vsel %vm1095_vm3, %v7030_v52, 0.0 }
0x1f78   : > { %5228 = vadd.xlane.f32.xlu0 %v5227_v3 }
0x1ffd   : > { %v5226_v54 = vpop.xlane.xlu0 %5225 }
0x1ffe   : > { %7031 = vrcp.f32 %v5226_v54  ;;  %v6103_v54 = vld [vmem:[%s8115_s13 + $0x1] ss:$0 sm:$0xff] }
0x2001   : > { %v5229_v4 = vpop.xlane.xlu0 %5228 }
0x2002   : > { %7033 = vrcp.f32 %v5229_v4 }
0x200b   : > { %v7032_v9 = vpop.eup %7031 }
0x200c   : > { %v5232_v57 = vmul.f32 %v7032_v9, %v7028_v6 }
0x200e   : > { %6851 = vmatprep.mubr.msk.f32.mxu1 %vm1095_vm3, %v5232_v57 }
0x200f   : > { %v7034_v55 = vpop.eup %7033 }
0x2010   : > { %v5233_v56 = vmul.f32 %v7034_v55, %v7030_v52 }
0x2012   : > { %6852 = vmatmul.mubr.msk.f32.vlgmr.msra.gmra.mxu1 %vm1095_vm3, %v5233_v56 }
0x20d2   : > { %v6853_v59 = vpop.f32.mrf.mxu1 }
0x20d4   : > { %v5306_v60 = vpop.f32.mrf.mxu1 }
0x20d5   : > { %6856 = vmatprep.mubr.msk.f32.mxu0 %vm1005_vm2, %v5306_v60 }
0x20d6   : > { %6857 = vmatmul.mubr.msk.f32.vlgmr.msra.gmra.mxu0 %vm1005_vm2, %v6853_v59 }
0x20d7   : > { %6871 = vmatpush3.msra.mxu0 %v6101_v31 }
0x2196   : > { %v6858_v61 = vpop.f32.mrf.mxu0 }
0x2197   : > { %v5398_v62 = vadd.f32 %v6858_v61, %v7931_v15  ;;  %v6100_v15 = vld [vmem:[%s8114_s12 + $0x70] sm:$0xff] }
0x2198   : > { %v5388_v63 = vpop.f32.mrf.mxu0  ;;  %6872 = vmatprep.subr.mxu0 %v6100_v15 }
0x2199   : > { %v5397_v0 = vadd.f32 %v5388_v63, %v7933_v25  ;;  %v5408_v1 = vadd.f32 %v6081_v58, %v5398_v62  ;;  %6873 = vmatpush3.msra.mxu0 %v6100_v15  ;;  %v6098_v25 = vld [vmem:[%s8114_s12 + $0x60] sm:$0xff] }
0x219a   : > { %6874 = vmatprep.subr.mxu0 %v6099_v18 }
0x219b   : > { %v5407_v2 = vadd.f32 %v6081_v58, %v5397_v0  ;;  %v5410_v8 = vadd.f32 %v5408_v1, %v7723_v33  ;;  %v6089_v33 = vld [vmem:[%s8112_s10 + $0x38] sm:$0xff]  ;;  %6875 = vmatpush3.msra.mxu0 %v6099_v18  ;;  %v6109_v18 = vld [vmem:[%s8117_s15 + $0x1] ss:$0 sm:$0xff] }
0x219c   : > { %6859 = vmatprep.subr.mxu1 %v6089_v33  ;;  %6876 = vmatprep.subr.mxu0 %v6098_v25 }
0x219d   : > { %v5409_v5 = vadd.f32 %v5407_v2, %v7717_v32  ;;  %v5418_v12 = vsel %vm739_vm1, %v5410_v8, 0.0  ;;  %6860 = vmatpush3.msra.mxu1 %v6089_v33  ;;  %6877 = vmatpush3.msra.mxu0 %v6098_v25 }
0x219e   : > { %6861 = vmatprep.subr.mxu1 %v6088_v23  ;;  %6878 = vmatprep.subr.mxu0 %v6097_v47 }
0x219f   : > { %v5415_v7 = vsel %vm739_vm1, %v5409_v5, 0.0  ;;  %6862 = vmatpush3.msra.mxu1 %v6088_v23  ;;  %6879 = vmatpush3.msra.mxu0 %v6097_v47  ;;  %v5789_v47 = vld [vmem:[%s8120_s18] sm:$0xff] }
0x21a0   : > { %5416 = vadd.xlane.f32.xlu0 %v5415_v7  ;;  %6863 = vmatprep.subr.mxu1 %v6087_v27 }
0x21a1   : > { %6864 = vmatpush3.msra.mxu1 %v6087_v27  ;;  %6880 = vmatprep.subr.mxu0 %v6096_v11  ;;  %v6108_v27 = vld [vmem:[%s8116_s14 + $0x1] ss:$0 sm:$0xff] }
0x21a2   : > { %6865 = vmatprep.subr.mxu1 %v6086_v28  ;;  %6881 = vmatpush3.msra.mxu0 %v6096_v11  ;;  %v5714_v11 = vld [vmem:[%s8119_s17] sm:$0x1] }
0x21a3   : > { %6866 = vmatpush3.msra.mxu1 %v6086_v28  ;;  %6882 = vmatprep.subr.mxu0 %v6095_v48 }
0x21a4   : > { %5419 = vadd.xlane.f32.xlu0 %v5418_v12  ;;  %6883 = vmatpush3.msra.mxu0 %v6095_v48 }
0x21a5   : > { %6884 = vmatprep.subr.mxu0 %v6094_v49 }
0x21a6   : > { %6885 = vmatpush3.msra.mxu0 %v6094_v49 }
0x2229   : > { %v5417_v13 = vpop.xlane.xlu0 %5416 }
0x222a   : > { %v5421_v14 = vmul.f32 0.03125, %v5417_v13  ;;  %v5713_v13 = vld [vmem:[%s8118_s16 + $0x18] sm:$0xff] }
0x222c   : > { %v5423_v16 = vsub.f32 %v5409_v5, %v5421_v14  ;;  %v7116_v14 = vmov 0.0  }
0x222d   : > { %v5420_v29 = vpop.xlane.xlu0 %5419  ;;  %6889 = vmatprep.subr.mxu1 %v7116_v14 }
0x222e   : > { %v5422_v30 = vmul.f32 0.03125, %v5420_v29  ;;  %v5425_v17 = vmul.f32 %v5423_v16, %v5423_v16  ;;  %v5711_v29 = vld [vmem:[%s8118_s16 + $0x8] sm:$0xff] }
0x2230   : > { %v5424_v19 = vsub.f32 %v5410_v8, %v5422_v30  ;;  %v5427_v20 = vsel %vm739_vm1, %v5425_v17, 0.0  ;;  %v5710_v30 = vld [vmem:[%s8118_s16] sm:$0xff] }
0x2231   : > { %5428 = vadd.xlane.f32.xlu0 %v5427_v20 }
0x2232   : > { %v5426_v22 = vmul.f32 %v5424_v19, %v5424_v19 }
0x2234   : > { %v5430_v32 = vsel %vm739_vm1, %v5426_v22, 0.0 }
0x2235   : > { %5431 = vadd.xlane.f32.xlu0 %v5430_v32 }
0x22ba   : > { %v5429_v35 = vpop.xlane.xlu0 %5428 }
0x22bb   : > { %v5433_v36 = vmul.f32 0.03125, %v5429_v35 }
0x22bd   : > { %v5435_v37 = vadd.f32 1e-05, %v5433_v36 }
0x22be   : > { %v5432_v38 = vpop.xlane.xlu0 %5431 }
0x22bf   : > { %7035 = vrsqrt.f32 %v5435_v37  ;;  %v5434_v21 = vmul.f32 0.03125, %v5432_v38 }
0x22c1   : > { %v5436_v24 = vadd.f32 1e-05, %v5434_v21 }
0x22c3   : > { %7037 = vrsqrt.f32 %v5436_v24 }
0x22cc   : > { %v7036_v26 = vpop.eup %7035 }
0x22cd   : > { %v5439_v39 = vmul.f32 %v7036_v26, %v5423_v16  ;;  %v5712_v16 = vld [vmem:[%s8118_s16 + $0x10] sm:$0xff] }
0x22cf   : > { %v5447_v41 = vmul.f32 %v6084_v34, %v5439_v39 }
0x22d0   : > { %v7038_v42 = vpop.eup %7037 }
0x22d1   : > { %v5440_v43 = vmul.f32 %v7038_v42, %v5424_v19  ;;  %v5455_v44 = vadd.f32 %v6085_v40, %v5447_v41 }
0x22d3   : > { %v5448_v45 = vmul.f32 %v6084_v34, %v5440_v43  ;;  %6867 = vmatprep.mubr.msk.f32.mxu1 %vm739_vm1, %v5455_v44 }
0x22d5   : > { %v5456_v46 = vadd.f32 %v6085_v40, %v5448_v45  ;;  %v5791_v45 = vld [vmem:[%s8120_s18 + $0x10] sm:$0xff] }
0x22d7   : > { %6868 = vmatmul.mubr.msk.f32.vlgmr.msra.gmra.mxu1 %vm739_vm1, %v5456_v46 }
0x22d8   : > { %6897 = vmatprep.mubr.msk.f32.mxu1 %vm7117_vm5, %v7116_v14  ;;  %6890 = vmatpush3.msra.mxu1 %v5713_v13 }
0x22d9   : > { %6891 = vmatprep.subr.mxu1 %v7116_v14 }
0x22da   : > { %6892 = vmatpush3.msra.mxu1 %v5712_v16 }
0x22db   : > { %6893 = vmatprep.subr.mxu1 %v7116_v14 }
0x22dc   : > { %6894 = vmatpush3.msra.mxu1 %v5711_v29 }
0x22dd   : > { %6895 = vmatprep.subr.mxu1 %v7116_v14 }
0x22de   : > { %6896 = vmatpush3.msra.mxu1 %v5710_v30 }
0x22df   : > { %6900 = vmatprep.subr.mxu1 %v7116_v14 }
0x2397   : > { %v6869_v51 = vpop.f32.mrf.mxu1 }
0x2398   : > { %v5548_v6 = vadd.f32 %v6869_v51, %v6091_v50 }
0x2399   : > { %v5542_v10 = vpop.f32.mrf.mxu1 }
0x239a   : > { %v5543_v52 = vadd.f32 %v6091_v50, %v5542_v10  ;;  %v5552_v53 = vmax.f32 %v5548_v6, 0.0  ;;  %v5793_v6 = vld [vmem:[%s8121_s19] sm:$0x1] }
0x239c   : > { %v5551_v3 = vmax.f32 %v5543_v52, 0.0 }
0x239e   : > { %6886 = vmatprep.mubr.msk.f32.mxu0 %vm3082_vm4, %v5551_v3 }
0x239f   : > { %6887 = vmatmul.mubr.msk.f32.vlgmr.msra.gmra.mxu0 %vm3082_vm4, %v5552_v53 }
0x245f   : > { %v6888_v4 = vpop.f32.mrf.mxu0 }
0x2460   : > { %v5648_v9 = vadd.f32 %v6888_v4, %v6103_v54 }
0x2461   : > { %v5642_v57 = vpop.f32.mrf.mxu0 }
0x2462   : > { %v5652_v55 = vadd.f32 %v5648_v9, %v5456_v46  ;;  %v5643_v56 = vadd.f32 %v6103_v54, %v5642_v57  ;;  %v5790_v46 = vld [vmem:[%s8120_s18 + $0x8] sm:$0xff] }
0x2464   : > { %v5651_v59 = vadd.f32 %v5643_v56, %v5455_v44  ;;  %v5660_v60 = vsel %vm739_vm1, %v5652_v55, 0.0  ;;  %v5792_v44 = vld [vmem:[%s8120_s18 + $0x18] sm:$0xff] }
0x2465   : > { %5661 = vadd.xlane.f32.xlu0 %v5660_v60 }
0x2466   : > { %v5657_v61 = vsel %vm739_vm1, %v5651_v59, 0.0 }
0x2467   : > { %5658 = vadd.xlane.f32.xlu1 %v5657_v61 }
0x24ee   : > { %v5662_v62 = vpop.xlane.xlu0 %5661 }
0x24ef   : > { %v5664_v58 = vmul.f32 0.03125, %v5662_v62 }
0x24f0   : > { %v5659_v63 = vpop.xlane.xlu1 %5658 }
0x24f1   : > { %v5663_v0 = vmul.f32 0.03125, %v5659_v63  ;;  %v5666_v1 = vsub.f32 %v5652_v55, %v5664_v58 }
0x24f3   : > { %v5665_v2 = vsub.f32 %v5651_v59, %v5663_v0  ;;  %v5668_v8 = vmul.f32 %v5666_v1, %v5666_v1 }
0x24f5   : > { %v5667_v5 = vmul.f32 %v5665_v2, %v5665_v2  ;;  %v5672_v12 = vsel %vm739_vm1, %v5668_v8, 0.0 }
0x24f7   : > { %v5669_v7 = vsel %vm739_vm1, %v5667_v5, 0.0 }
0x24f8   : > { %5670 = vadd.xlane.f32.xlu0 %v5669_v7 }
0x24fc   : > { %5673 = vadd.xlane.f32.xlu0 %v5672_v12 }
0x2581   : > { %v5671_v17 = vpop.xlane.xlu0 %5670 }
0x2582   : > { %v5675_v19 = vmul.f32 0.03125, %v5671_v17 }
0x2584   : > { %v5677_v20 = vadd.f32 1e-05, %v5675_v19 }
0x2585   : > { %v5674_v22 = vpop.xlane.xlu0 %5673 }
0x2586   : > { %7039 = vrsqrt.f32 %v5677_v20  ;;  %v5676_v32 = vmul.f32 0.03125, %v5674_v22 }
0x2588   : > { %v5678_v33 = vadd.f32 1e-05, %v5676_v32 }
0x258a   : > { %7041 = vrsqrt.f32 %v5678_v33 }
0x2593   : > { %v7040_v23 = vpop.eup %7039 }
0x2594   : > { %v5681_v28 = vmul.f32 %v7040_v23, %v5665_v2 }
0x2596   : > { %v5689_v31 = vmul.f32 %v6108_v27, %v5681_v28 }
0x2597   : > { %v7042_v15 = vpop.eup %7041 }
0x2598   : > { %v5682_v25 = vmul.f32 %v7042_v15, %v5666_v1  ;;  %v5697_v35 = vadd.f32 %v6109_v18, %v5689_v31 }
0x259a   : > { %v5690_v36 = vmul.f32 %v6108_v27, %v5682_v25  ;;  %v5699_v38 = vsel %vm739_vm1, %v5697_v35, 0.0 }
0x259c   : > { %v5698_v37 = vadd.f32 %v6109_v18, %v5690_v36 }
0x259e   : > { %v5700_v21 = vsel %vm739_vm1, %v5698_v37, 0.0 }
0x259f   : > { %v5701_v24 = vadd.f32 %v5700_v21, %v5699_v38 }
0x25a1   : > { %v5702_v26 = vrot.slane %v5701_v24, 4 }
0x25a3   : > { %v5703_v34 = vadd.f32 %v5702_v26, %v5701_v24 }
0x25a5   : > { %v5704_v39 = vrot.slane %v5703_v34, 2 }
0x25a7   : > { %v5705_v40 = vadd.f32 %v5704_v39, %v5703_v34 }
0x25a9   : > { %v5706_v41 = vrot.slane %v5705_v40, 1 }
0x25ab   : > { %v5707_v42 = vadd.f32 %v5706_v41, %v5705_v40 }
0x25ad   : > { %v5709_v43 = vmul.f32 0.0625, %v5707_v42 }
0x25af   : > { %6898 = vmatmul.mubr.msk.f32.vlgmr.msra.gmra.mxu1 %vm739_vm1, %v5709_v43 }
0x25b0   : > { %6901 = vmatpush3.msra.mxu1 %v5792_v44  ;;  %6908 = vmatprep.mubr.msk.f32.mxu1 %vm7117_vm5, %v7116_v14 }
0x25b1   : > { %6902 = vmatprep.subr.mxu1 %v7116_v14 }
0x25b2   : > { %6903 = vmatpush3.msra.mxu1 %v5791_v45 }
0x25b3   : > { %6904 = vmatprep.subr.mxu1 %v7116_v14 }
0x25b4   : > { %6905 = vmatpush3.msra.mxu1 %v5790_v46 }
0x25b5   : > { %6906 = vmatprep.subr.mxu1 %v7116_v14 }
0x25b6   : > { %6907 = vmatpush3.msra.mxu1 %v5789_v47 }
0x266f   : > { %v5784_v48 = vpop.f32.mrf.mxu1 }
0x2670   : > { %v5785_v49 = vadd.f32 %v5784_v48, %v5714_v11 }
0x2671   : > { %v6899_v50 = vpop.f32.mrf.mxu1 }
0x2672   : > { %v5788_v51 = vmax.f32 %v5785_v49, 0.0 }
0x2674   : > { %6909 = vmatmul.mubr.msk.f32.vlgmr.msra.gmra.mxu1 %vm739_vm1, %v5788_v51 }
0x2734   : > { %v5863_v10 = vpop.f32.mrf.mxu1 }
0x2735   : > { %v5864_v52 = vadd.f32 %v5863_v10, %v5793_v6 }
0x2736   : > { %v6910_v3 = vpop.f32.mrf.mxu1 }
0x2737   : > { %5868 = vst.msk [vmem:[%s621_s25] sm:$0x1] %vm5867_vm6, %v5864_v52 }
0x2738   : > { %7056 = shalt.err (!%p7053_p3)
}
0x2739   : > { %s7057_s1 = scalar_lea.hbm %s8067_s29, 16  ;;  %s7061_s28 = scalar_lea.hbm %s8190_s30, 32 }
0x273a   : > { %p7058_p4 = scmp.ne.s32.totalorder %s8067_s29, %s7057_s1  ;;  %p7062_p9 = scmp.lt.s32.totalorder %s8067_s29, %s8190_s30 }
0x273b   : > { %p7063_p10 = scmp.lt.s32.totalorder %s7061_s28, %s7057_s1 }
0x273c   : > { %p7059_p7 = pnand %p7058_p4, %p7262_p5 }
0x273d   : > { %p7064_p11 = por %p7063_p10, %p7062_p9 }
0x273e   : > { %p7060_p8 = pneg %p7059_p7 }
0x2740   : > { %p7065_p12 = pnand %p7064_p11, %p7060_p8 }
0x2742   : > { %7068 = shalt.err (!%p7065_p12)
}
0x2743   : > { %6911 = dma.vmem_to_hbm [thread:$0]  (%p7262_p5), %s5883_s3, 16, %s8067_s29, %s5870_s5  }
0x2744 PF: > { %s8191_s6 = sld [smem:[#allocation7_spill]] }
0x2745   : > { %s8192_s26 = sld [smem:[#allocation5_spill]] }
0x274a   : > { %p6917_p13 = scmp.ge.s32.totalorder %s8191_s6, 2 }
0x274b   : > { %s5894_s7 = sand.u32 1, %s8192_s26  }
0x274c   : > { %p6914_p0 = pnand %p6917_p13, %p7266_p6  ;;  %s5895_s0 = scalar_lea.sflag [#allocation3], %s5894_s7 }
0x274e   : > { %p6915_p1 = pneg %p6914_p0 }
0x2750   : > { %7086 = dma.done.wait (%p6915_p1), %s5895_s0, 16  }
0x2751   : > { %7088 = vsyncadd (%p6915_p1), %s5895_s0, 4294967280  ;;  %s8194_s24 = sld [smem:[#allocation8_spill]]  ;;  %s8197_s1 = smov %s7095_s22 }
0x2752   : > { %s8195_s25 = sld [smem:[#allocation6_spill]] }
0x2753   : > { %s8196_s23 = sld [smem:[#allocation9_spill]] }
0x2757   : > { %p30_p2 = scmp.ge.s32.totalorder %s8194_s24, 4  }
0x2758   : > { %s8198_s22 = smov %s8195_s25 }
0x2759   :  { %32 = sbr.rel (!%p30_p2) target bundleno = 13 (0xd), region = 147 }
0x275e   :  { %5899 = vsyncpa [#allocation3], 1 }
0x275f   :  { %5901 = vsyncpa [#allocation3 + $0x1], 1 }

</bundles_post_ra>
